<compile_context>
chip_gen: v6e
topology: v6e:2x2x1
jax: 0.10.0
libtpu: 0.0.40
codegen_flags: <defaults>
</compile_context>

<pallas_src>
import jax
import jax.numpy as jnp
from jax.experimental import pallas as pl
from jax.experimental.pallas import tpu as pltpu


def _round_up(n, m):
    return ((n + m - 1) // m) * m


def _pick_tile(b):
    """Largest sublane-aligned batch tile (<=512) that still yields >=2 tiles."""
    tb = min(512, _round_up(b, 8))
    while tb > 8 and pl.cdiv(b, tb) < 2:
        tb = _round_up(tb // 2, 8)
    return tb


# ---------------------------------------------------------------------------
# Fused velocity net on one batch tile:
#   out = gelu(x @ W1 + t * wt + y_emb) @ W2 + b2
# y_emb materialized in-kernel: one-hot [tb, NC] @ table[NC, Hd] on the MXU.
# bf16 MXU operands, f32 accumulation; tanh-GELU (EUP slot).
# ---------------------------------------------------------------------------
def _fused_body(x, y_idx, cond, w1, ytab, w2, b2, o_ref):
    tb = x.shape[0]
    nc = ytab.shape[0]
    h = jnp.dot(x.astype(jnp.bfloat16), w1,
                preferred_element_type=jnp.float32)              # [tb, Hd] f32
    onehot = (jax.lax.broadcasted_iota(jnp.int32, (tb, nc), 1) == y_idx
              ).astype(jnp.bfloat16)                             # [tb, NC]
    yemb = jnp.dot(onehot, ytab, preferred_element_type=jnp.float32)
    h = h + cond + yemb
    h = jax.nn.gelu(h, approximate=True)                         # tanh -> EUP
    out = jnp.dot(h.astype(jnp.bfloat16), w2,
                  preferred_element_type=jnp.float32)            # [tb, D] f32
    o_ref[...] = out + b2


def _kernel_const_t(x_ref, y_ref, cond_ref, w1_ref, ytab_ref, w2_ref, b2_ref,
                    o_ref):
    _fused_body(x_ref[...], y_ref[...], cond_ref[...], w1_ref[...],
                ytab_ref[...], w2_ref[...], b2_ref[...], o_ref)


def _kernel_per_t(x_ref, y_ref, t_ref, wt_ref, w1_ref, ytab_ref, w2_ref,
                  b2_ref, o_ref):
    cond = t_ref[...] * wt_ref[...]
    _fused_body(x_ref[...], y_ref[...], cond, w1_ref[...],
                ytab_ref[...], w2_ref[...], b2_ref[...], o_ref)


def _velocity_net(x_flat, y_col, t_or_cond, w1, wt, ytab, w2, b2,
                  *, per_sample_t, tb):
    b, d = x_flat.shape
    hd = w1.shape[1]
    nc = ytab.shape[0]
    n_tiles = pl.cdiv(b, tb)

    lane = lambda n: _round_up(n, 128)
    # per-tile streamed bytes (x in, y in, out, optional t), double-buffered
    stream_bytes = tb * lane(d) * 4 + tb * 128 * 4 + tb * lane(d) * 4
    if per_sample_t:
        stream_bytes += tb * 128 * 4
    weight_bytes = (d * hd + hd * d + nc * hd) * 2 \
        + 8 * lane(d) * 4 + 8 * lane(hd) * 4

    try:
        cap = int(pltpu.get_tpu_info().vmem_capacity_bytes)
    except Exception:
        cap = 64 << 20      # conservative (v7x per-TC) default

    cost = pl.CostEstimate(
        flops=int(4 * b * d * hd + 2 * b * nc * hd),
        transcendentals=int(b * hd),
        bytes_accessed=int(b * (8 * d + 8) + weight_bytes))

    def _build(single_buffer_weights):
        def const_spec(shape):
            if single_buffer_weights:
                return pl.BlockSpec(shape, lambda i: (0, 0),
                                    pipeline_mode=pl.Buffered(1))
            return pl.BlockSpec(shape, lambda i: (0, 0))

        batch_spec = lambda cols: pl.BlockSpec((tb, cols), lambda i: (i, 0))

        copies = 1 if single_buffer_weights else 2
        footprint = 2 * stream_bytes + copies * weight_bytes
        vmem_limit = int(min(max(footprint + (4 << 20), 16 << 20),
                             cap * 3 // 4))

        if per_sample_t:
            kernel = _kernel_per_t
            in_specs = [batch_spec(d), batch_spec(1), batch_spec(1),
                        const_spec((1, hd)), const_spec((d, hd)),
                        const_spec((nc, hd)), const_spec((hd, d)),
                        const_spec((1, d))]
            operands = (x_flat, y_col, t_or_cond, wt, w1, ytab, w2, b2)
        else:
            kernel = _kernel_const_t
            in_specs = [batch_spec(d), batch_spec(1),
                        const_spec((1, hd)), const_spec((d, hd)),
                        const_spec((nc, hd)), const_spec((hd, d)),
                        const_spec((1, d))]
            operands = (x_flat, y_col, t_or_cond, w1, ytab, w2, b2)

        call = pl.pallas_call(
            kernel,
            out_shape=jax.ShapeDtypeStruct((b, d), jnp.float32),
            grid=(n_tiles,),
            in_specs=in_specs,
            out_specs=pl.BlockSpec((tb, d), lambda i: (i, 0)),
            compiler_params=pltpu.CompilerParams(
                dimension_semantics=("parallel",),     # megacore on v7x
                vmem_limit_bytes=vmem_limit),
            cost_estimate=cost)
        return call(*operands)

    try:
        return _build(single_buffer_weights=True)
    except Exception:
        # TODO(synk): pipeline_mode=pl.Buffered(1) rejected on this JAX
        # version; fall back to default double-buffered constant blocks.
        return _build(single_buffer_weights=False)


class FlowMatchingPallas:
    """JAX/Pallas port of Flow_Matching.forward with a synthetic `net`."""

    def __init__(self, channels, height, width, hidden=256, num_classes=10,
                 seed=0):
        self.C, self.H, self.W = channels, height, width
        self.D = channels * height * width
        self.Hd = hidden
        self.num_classes = num_classes

        k1, k2, k3, k4 = jax.random.split(jax.random.PRNGKey(seed), 4)
        s1 = 1.0 / jnp.sqrt(self.D)
        s2 = 1.0 / jnp.sqrt(self.Hd)
        # MXU-facing weights stored in bf16; small conditioning vectors in f32
        self.w1 = (jax.random.normal(k1, (self.D, self.Hd), jnp.float32)
                   * s1).astype(jnp.bfloat16)
        self.wt = jax.random.normal(k2, (1, self.Hd), jnp.float32)
        self.w2 = (jax.random.normal(k3, (self.Hd, self.D), jnp.float32)
                   * s2).astype(jnp.bfloat16)
        self.b2 = jnp.zeros((1, self.D), jnp.float32)
        # Label-embedding table, b1 (zero here) folded in, padded to 128 class
        # rows so the in-kernel one-hot matmul has an MXU-native K dim.
        b1 = jnp.zeros((1, self.Hd), jnp.float32)
        nc_pad = _round_up(max(num_classes, 1), 128)
        tab = jax.random.normal(k4, (num_classes, self.Hd), jnp.float32) + b1
        tab = jnp.pad(tab, ((0, nc_pad - num_classes), (0, 0)))
        self.y_table = tab.astype(jnp.bfloat16)

    def forward(self, t, x, y):
        """t: scalar or [B]; x: [B, C, H, W] (NCHW); y: int [B]."""
        B = x.shape[0]
        t = jnp.asarray(t, jnp.float32)
        per_sample_t = int(t.size) != 1

        x_flat = x.reshape(B, self.D).astype(jnp.float32)   # cast to bf16 in-kernel
        y_col = jnp.asarray(y, jnp.int32).reshape(B, 1)

        if per_sample_t:
            t_or_cond = t.reshape(B, 1)
        else:
            # t.numel() == 1 -> expand over batch == one constant t*wt row
            t_or_cond = jnp.reshape(t, ()) * self.wt         # (1, Hd)

        # Tiny batches: pad to one 8-row sublane tile (negligible copy).
        # Larger batches run un-padded; partial last block handled by Pallas.
        Bp = B
        if B < 8:
            pad = 8 - B
            x_flat = jnp.pad(x_flat, ((0, pad), (0, 0)))
            y_col = jnp.pad(y_col, ((0, pad), (0, 0)))
            if per_sample_t:
                t_or_cond = jnp.pad(t_or_cond, ((0, pad), (0, 0)))
            Bp = 8

        tb = _pick_tile(Bp)
        pred = _velocity_net(x_flat, y_col, t_or_cond,
                             self.w1, self.wt, self.y_table, self.w2, self.b2,
                             per_sample_t=per_sample_t, tb=tb)
        if Bp != B:
            pred = pred[:B]
        # net returns a single tensor -> _pred = res (same-shape velocity)
        return pred.reshape(B, self.C, self.H, self.W)

    __call__ = forward


def _reference(model, t, x, y):
    """Pure-JAX reference of the same synthetic velocity net (bf16 weights)."""
    B = x.shape[0]
    t = jnp.asarray(t, jnp.float32)
    if t.size == 1:
        t = jnp.broadcast_to(jnp.reshape(t, ()), (B,))
    xq = x.reshape(B, model.D).astype(jnp.bfloat16).astype(jnp.float32)
    w1 = model.w1.astype(jnp.float32)
    w2 = model.w2.astype(jnp.float32)
    tab = model.y_table.astype(jnp.float32)
    h = xq @ w1 + t[:, None] * model.wt + tab[jnp.asarray(y, jnp.int32)]
    h = jax.nn.gelu(h, approximate=True)
    out = h.astype(jnp.bfloat16).astype(jnp.float32) @ w2 + model.b2
    return out.reshape(B, model.C, model.H, model.W)


if __name__ == "__main__":
    key = jax.random.PRNGKey(0)
    kx, ky, kt = jax.random.split(key, 3)

    B, C, H, W = 2, 4, 16, 16
    x = jax.random.normal(kx, (B, C, H, W), jnp.float32)    # NCHW like PyTorch
    y = jax.random.randint(ky, (B,), 0, 10)
    t = jax.random.uniform(kt, ())                           # scalar t -> expand

    model = FlowMatchingPallas(C, H, W, hidden=256, num_classes=10, seed=0)

    # scalar-t path (matches Flow_Matching.forward's t.numel()==1 branch)
    pred = jax.block_until_ready(model(t, x, y))
    assert pred.shape == (B, C, H, W), pred.shape
    assert pred.dtype == jnp.float32
    assert bool(jnp.all(jnp.isfinite(pred)))
    ref = _reference(model, t, x, y)
    assert bool(jnp.allclose(pred, ref, atol=5e-2, rtol=5e-2))

    # per-sample-t path (flow-matching training case)
    t_vec = jax.random.uniform(kt, (B,))
    pred2 = jax.block_until_ready(model(t_vec, x, y))
    assert pred2.shape == (B, C, H, W)
    ref2 = _reference(model, t_vec, x, y)
    assert bool(jnp.allclose(pred2, ref2, atol=5e-2, rtol=5e-2))

    print("KERNEL_OK")
</pallas_src>

<mosaic_0001>
module attributes {stable_mosaic.version = 11 : i64} {
  func.func @_kernel_const_t(%arg0: i32, %arg1: memref<8x1024xf32, #tpu.memory_space<vmem>>, %arg2: memref<8x1xi32, #tpu.memory_space<vmem>>, %arg3: memref<1x256xf32, #tpu.memory_space<vmem>>, %arg4: memref<1024x256xbf16, #tpu.memory_space<vmem>>, %arg5: memref<128x256xbf16, #tpu.memory_space<vmem>>, %arg6: memref<256x1024xbf16, #tpu.memory_space<vmem>>, %arg7: memref<1x1024xf32, #tpu.memory_space<vmem>>, %arg8: memref<8x1024xf32, #tpu.memory_space<vmem>>) attributes {dimension_semantics = [#tpu.dimension_semantics<parallel>], iteration_bounds = array<i64: 1>, scalar_prefetch = 0 : i64, scratch_operands = 0 : i64, tpu.core_type = #tpu.core_type<tc>, window_params = [{transform_indices = @transform_0, window_bounds = array<i64: 8, 1024>}, {transform_indices = @transform_1, window_bounds = array<i64: 8, 1>}, {pipeline_mode = #tpu.pipeline_mode<synchronous>, transform_indices = @transform_2, window_bounds = array<i64: 1, 256>}, {pipeline_mode = #tpu.pipeline_mode<synchronous>, transform_indices = @transform_3, window_bounds = array<i64: 1024, 256>}, {pipeline_mode = #tpu.pipeline_mode<synchronous>, transform_indices = @transform_4, window_bounds = array<i64: 128, 256>}, {pipeline_mode = #tpu.pipeline_mode<synchronous>, transform_indices = @transform_5, window_bounds = array<i64: 256, 1024>}, {pipeline_mode = #tpu.pipeline_mode<synchronous>, transform_indices = @transform_6, window_bounds = array<i64: 1, 1024>}, {transform_indices = @transform_7, window_bounds = array<i64: 8, 1024>}]} {
    %c0 = arith.constant 0 : index
    %c0_0 = arith.constant 0 : index
    %0 = vector.load %arg1[%c0, %c0_0] : memref<8x1024xf32, #tpu.memory_space<vmem>>, vector<8x1024xf32>
    %c0_1 = arith.constant 0 : index
    %c0_2 = arith.constant 0 : index
    %1 = vector.load %arg2[%c0_1, %c0_2] : memref<8x1xi32, #tpu.memory_space<vmem>>, vector<8x1xi32>
    %c0_3 = arith.constant 0 : index
    %c0_4 = arith.constant 0 : index
    %2 = vector.load %arg3[%c0_3, %c0_4] : memref<1x256xf32, #tpu.memory_space<vmem>>, vector<1x256xf32>
    %c0_5 = arith.constant 0 : index
    %c0_6 = arith.constant 0 : index
    %3 = vector.load %arg4[%c0_5, %c0_6] : memref<1024x256xbf16, #tpu.memory_space<vmem>>, vector<1024x256xbf16>
    %c0_7 = arith.constant 0 : index
    %c0_8 = arith.constant 0 : index
    %4 = vector.load %arg5[%c0_7, %c0_8] : memref<128x256xbf16, #tpu.memory_space<vmem>>, vector<128x256xbf16>
    %c0_9 = arith.constant 0 : index
    %c0_10 = arith.constant 0 : index
    %5 = vector.load %arg6[%c0_9, %c0_10] : memref<256x1024xbf16, #tpu.memory_space<vmem>>, vector<256x1024xbf16>
    %c0_11 = arith.constant 0 : index
    %c0_12 = arith.constant 0 : index
    %6 = vector.load %arg7[%c0_11, %c0_12] : memref<1x1024xf32, #tpu.memory_space<vmem>>, vector<1x1024xf32>
    %7 = arith.truncf %0 : vector<8x1024xf32> to vector<8x1024xbf16>
    %cst = arith.constant dense<0.000000e+00> : vector<8x256xf32>
    %8 = tpu.matmul %7, %3, %cst {dimension_numbers = #tpu.dot_dimension_numbers<[1], [0], [0], [1], [0, 0, 1, 1], [], []>} : vector<8x1024xbf16>, vector<1024x256xbf16>, vector<8x256xf32> -> vector<8x256xf32>
    %9 = tpu.iota {dimensions = array<i32: 1>} : vector<8x128xi32>
    %10 = vector.broadcast %1 : vector<8x1xi32> to vector<8x128xi32>
    %11 = arith.cmpi eq, %9, %10 : vector<8x128xi32>
    %12 = arith.extui %11 : vector<8x128xi1> to vector<8x128xi32>
    %13 = arith.sitofp %12 : vector<8x128xi32> to vector<8x128xf32>
    %14 = arith.truncf %13 : vector<8x128xf32> to vector<8x128xbf16>
    %cst_13 = arith.constant dense<0.000000e+00> : vector<8x256xf32>
    %15 = tpu.matmul %14, %4, %cst_13 {dimension_numbers = #tpu.dot_dimension_numbers<[1], [0], [0], [1], [0, 0, 1, 1], [], []>} : vector<8x128xbf16>, vector<128x256xbf16>, vector<8x256xf32> -> vector<8x256xf32>
    %16 = vector.broadcast %2 : vector<1x256xf32> to vector<8x256xf32>
    %17 = arith.addf %8, %16 : vector<8x256xf32>
    %18 = arith.addf %17, %15 : vector<8x256xf32>
    %19 = arith.mulf %18, %18 : vector<8x256xf32>
    %20 = arith.mulf %18, %19 : vector<8x256xf32>
    %cst_14 = arith.constant 4.471500e-02 : f32
    %21 = vector.broadcast %cst_14 : f32 to vector<8x256xf32>
    %22 = arith.mulf %21, %20 : vector<8x256xf32>
    %23 = arith.addf %18, %22 : vector<8x256xf32>
    %cst_15 = arith.constant 0.797884583 : f32
    %24 = vector.broadcast %cst_15 : f32 to vector<8x256xf32>
    %25 = arith.mulf %24, %23 : vector<8x256xf32>
    %26 = math.tanh %25 : vector<8x256xf32>
    %cst_16 = arith.constant 1.000000e+00 : f32
    %27 = vector.broadcast %cst_16 : f32 to vector<8x256xf32>
    %28 = arith.addf %27, %26 : vector<8x256xf32>
    %cst_17 = arith.constant 5.000000e-01 : f32
    %29 = vector.broadcast %cst_17 : f32 to vector<8x256xf32>
    %30 = arith.mulf %29, %28 : vector<8x256xf32>
    %31 = arith.mulf %18, %30 : vector<8x256xf32>
    %32 = arith.truncf %31 : vector<8x256xf32> to vector<8x256xbf16>
    %cst_18 = arith.constant dense<0.000000e+00> : vector<8x1024xf32>
    %33 = tpu.matmul %32, %5, %cst_18 {dimension_numbers = #tpu.dot_dimension_numbers<[1], [0], [0], [1], [0, 0, 1, 1], [], []>} : vector<8x256xbf16>, vector<256x1024xbf16>, vector<8x1024xf32> -> vector<8x1024xf32>
    %34 = vector.broadcast %6 : vector<1x1024xf32> to vector<8x1024xf32>
    %35 = arith.addf %33, %34 : vector<8x1024xf32>
    %c0_19 = arith.constant 0 : index
    %c0_20 = arith.constant 0 : index
    %36 = vector.load %arg8[%c0_19, %c0_20] : memref<8x1024xf32, #tpu.memory_space<vmem>>, vector<8x1024xf32>
    tpu.vector_store %arg8[%c0_19, %c0_20], %35 {strides = array<i32>} : memref<8x1024xf32, #tpu.memory_space<vmem>>, vector<8x1024xf32>,
    return
  }
  func.func @transform_0(%arg0: i32) -> (i32, i32) {
    %c0_i32 = arith.constant 0 : i32
    %c0_i32_0 = arith.constant 0 : i32
    return %arg0, %c0_i32 : i32, i32
  }
  func.func @transform_1(%arg0: i32) -> (i32, i32) {
    %c0_i32 = arith.constant 0 : i32
    %c0_i32_0 = arith.constant 0 : i32
    return %arg0, %c0_i32 : i32, i32
  }
  func.func @transform_2(%arg0: i32) -> (i32, i32) {
    %c0_i32 = arith.constant 0 : i32
    %c0_i32_0 = arith.constant 0 : i32
    %c0_i32_1 = arith.constant 0 : i32
    return %c0_i32, %c0_i32_0 : i32, i32
  }
  func.func @transform_3(%arg0: i32) -> (i32, i32) {
    %c0_i32 = arith.constant 0 : i32
    %c0_i32_0 = arith.constant 0 : i32
    %c0_i32_1 = arith.constant 0 : i32
    return %c0_i32, %c0_i32_0 : i32, i32
  }
  func.func @transform_4(%arg0: i32) -> (i32, i32) {
    %c0_i32 = arith.constant 0 : i32
    %c0_i32_0 = arith.constant 0 : i32
    %c0_i32_1 = arith.constant 0 : i32
    return %c0_i32, %c0_i32_0 : i32, i32
  }
  func.func @transform_5(%arg0: i32) -> (i32, i32) {
    %c0_i32 = arith.constant 0 : i32
    %c0_i32_0 = arith.constant 0 : i32
    %c0_i32_1 = arith.constant 0 : i32
    return %c0_i32, %c0_i32_0 : i32, i32
  }
  func.func @transform_6(%arg0: i32) -> (i32, i32) {
    %c0_i32 = arith.constant 0 : i32
    %c0_i32_0 = arith.constant 0 : i32
    %c0_i32_1 = arith.constant 0 : i32
    return %c0_i32, %c0_i32_0 : i32, i32
  }
  func.func @transform_7(%arg0: i32) -> (i32, i32) {
    %c0_i32 = arith.constant 0 : i32
    %c0_i32_0 = arith.constant 0 : i32
    return %arg0, %c0_i32 : i32, i32
  }
}

module attributes {stable_mosaic.version = 11 : i64} {
  func.func @_kernel_const_t(%arg0: i32, %arg1: memref<8x1024xf32, #tpu.memory_space<vmem>>, %arg2: memref<8x1xi32, #tpu.memory_space<vmem>>, %arg3: memref<1x256xf32, #tpu.memory_space<vmem>>, %arg4: memref<1024x256xbf16, #tpu.memory_space<vmem>>, %arg5: memref<128x256xbf16, #tpu.memory_space<vmem>>, %arg6: memref<256x1024xbf16, #tpu.memory_space<vmem>>, %arg7: memref<1x1024xf32, #tpu.memory_space<vmem>>, %arg8: memref<8x1024xf32, #tpu.memory_space<vmem>>) attributes {dimension_semantics = [#tpu.dimension_semantics<parallel>], iteration_bounds = array<i64: 1>, scalar_prefetch = 0 : i64, scratch_operands = 0 : i64, tpu.core_type = #tpu.core_type<tc>, window_params = [{transform_indices = @transform_0, window_bounds = array<i64: 8, 1024>}, {transform_indices = @transform_1, window_bounds = array<i64: 8, 1>}, {pipeline_mode = #tpu.pipeline_mode<synchronous>, transform_indices = @transform_2, window_bounds = array<i64: 1, 256>}, {pipeline_mode = #tpu.pipeline_mode<synchronous>, transform_indices = @transform_3, window_bounds = array<i64: 1024, 256>}, {pipeline_mode = #tpu.pipeline_mode<synchronous>, transform_indices = @transform_4, window_bounds = array<i64: 128, 256>}, {pipeline_mode = #tpu.pipeline_mode<synchronous>, transform_indices = @transform_5, window_bounds = array<i64: 256, 1024>}, {pipeline_mode = #tpu.pipeline_mode<synchronous>, transform_indices = @transform_6, window_bounds = array<i64: 1, 1024>}, {transform_indices = @transform_7, window_bounds = array<i64: 8, 1024>}]} {
    %c0 = arith.constant 0 : index
    %c0_0 = arith.constant 0 : index
    %0 = vector.load %arg1[%c0, %c0_0] : memref<8x1024xf32, #tpu.memory_space<vmem>>, vector<8x1024xf32>
    %c0_1 = arith.constant 0 : index
    %c0_2 = arith.constant 0 : index
    %1 = vector.load %arg2[%c0_1, %c0_2] : memref<8x1xi32, #tpu.memory_space<vmem>>, vector<8x1xi32>
    %c0_3 = arith.constant 0 : index
    %c0_4 = arith.constant 0 : index
    %2 = vector.load %arg3[%c0_3, %c0_4] : memref<1x256xf32, #tpu.memory_space<vmem>>, vector<1x256xf32>
    %c0_5 = arith.constant 0 : index
    %c0_6 = arith.constant 0 : index
    %3 = vector.load %arg4[%c0_5, %c0_6] : memref<1024x256xbf16, #tpu.memory_space<vmem>>, vector<1024x256xbf16>
    %c0_7 = arith.constant 0 : index
    %c0_8 = arith.constant 0 : index
    %4 = vector.load %arg5[%c0_7, %c0_8] : memref<128x256xbf16, #tpu.memory_space<vmem>>, vector<128x256xbf16>
    %c0_9 = arith.constant 0 : index
    %c0_10 = arith.constant 0 : index
    %5 = vector.load %arg6[%c0_9, %c0_10] : memref<256x1024xbf16, #tpu.memory_space<vmem>>, vector<256x1024xbf16>
    %c0_11 = arith.constant 0 : index
    %c0_12 = arith.constant 0 : index
    %6 = vector.load %arg7[%c0_11, %c0_12] : memref<1x1024xf32, #tpu.memory_space<vmem>>, vector<1x1024xf32>
    %7 = arith.truncf %0 : vector<8x1024xf32> to vector<8x1024xbf16>
    %cst = arith.constant dense<0.000000e+00> : vector<8x256xf32>
    %8 = tpu.matmul %7, %3, %cst {dimension_numbers = #tpu.dot_dimension_numbers<[1], [0], [0], [1], [0, 0, 1, 1], [], []>} : vector<8x1024xbf16>, vector<1024x256xbf16>, vector<8x256xf32> -> vector<8x256xf32>
    %9 = tpu.iota {dimensions = array<i32: 1>} : vector<8x128xi32>
    %10 = vector.broadcast %1 : vector<8x1xi32> to vector<8x128xi32>
    %11 = arith.cmpi eq, %9, %10 : vector<8x128xi32>
    %12 = arith.extui %11 : vector<8x128xi1> to vector<8x128xi32>
    %13 = arith.sitofp %12 : vector<8x128xi32> to vector<8x128xf32>
    %14 = arith.truncf %13 : vector<8x128xf32> to vector<8x128xbf16>
    %cst_13 = arith.constant dense<0.000000e+00> : vector<8x256xf32>
    %15 = tpu.matmul %14, %4, %cst_13 {dimension_numbers = #tpu.dot_dimension_numbers<[1], [0], [0], [1], [0, 0, 1, 1], [], []>} : vector<8x128xbf16>, vector<128x256xbf16>, vector<8x256xf32> -> vector<8x256xf32>
    %16 = vector.broadcast %2 : vector<1x256xf32> to vector<8x256xf32>
    %17 = arith.addf %8, %16 : vector<8x256xf32>
    %18 = arith.addf %17, %15 : vector<8x256xf32>
    %19 = arith.mulf %18, %18 : vector<8x256xf32>
    %20 = arith.mulf %18, %19 : vector<8x256xf32>
    %cst_14 = arith.constant 4.471500e-02 : f32
    %21 = vector.broadcast %cst_14 : f32 to vector<8x256xf32>
    %22 = arith.mulf %21, %20 : vector<8x256xf32>
    %23 = arith.addf %18, %22 : vector<8x256xf32>
    %cst_15 = arith.constant 0.797884583 : f32
    %24 = vector.broadcast %cst_15 : f32 to vector<8x256xf32>
    %25 = arith.mulf %24, %23 : vector<8x256xf32>
    %26 = math.tanh %25 : vector<8x256xf32>
    %cst_16 = arith.constant 1.000000e+00 : f32
    %27 = vector.broadcast %cst_16 : f32 to vector<8x256xf32>
    %28 = arith.addf %27, %26 : vector<8x256xf32>
    %cst_17 = arith.constant 5.000000e-01 : f32
    %29 = vector.broadcast %cst_17 : f32 to vector<8x256xf32>
    %30 = arith.mulf %29, %28 : vector<8x256xf32>
    %31 = arith.mulf %18, %30 : vector<8x256xf32>
    %32 = arith.truncf %31 : vector<8x256xf32> to vector<8x256xbf16>
    %cst_18 = arith.constant dense<0.000000e+00> : vector<8x1024xf32>
    %33 = tpu.matmul %32, %5, %cst_18 {dimension_numbers = #tpu.dot_dimension_numbers<[1], [0], [0], [1], [0, 0, 1, 1], [], []>} : vector<8x256xbf16>, vector<256x1024xbf16>, vector<8x1024xf32> -> vector<8x1024xf32>
    %34 = vector.broadcast %6 : vector<1x1024xf32> to vector<8x1024xf32>
    %35 = arith.addf %33, %34 : vector<8x1024xf32>
    %c0_19 = arith.constant 0 : index
    %c0_20 = arith.constant 0 : index
    %36 = vector.load %arg8[%c0_19, %c0_20] : memref<8x1024xf32, #tpu.memory_space<vmem>>, vector<8x1024xf32>
    tpu.vector_store %arg8[%c0_19, %c0_20], %35 {strides = array<i32>} : memref<8x1024xf32, #tpu.memory_space<vmem>>, vector<8x1024xf32>,
    return
  }
  func.func @transform_0(%arg0: i32) -> (i32, i32) {
    %c0_i32 = arith.constant 0 : i32
    %c0_i32_0 = arith.constant 0 : i32
    return %arg0, %c0_i32 : i32, i32
  }
  func.func @transform_1(%arg0: i32) -> (i32, i32) {
    %c0_i32 = arith.constant 0 : i32
    %c0_i32_0 = arith.constant 0 : i32
    return %arg0, %c0_i32 : i32, i32
  }
  func.func @transform_2(%arg0: i32) -> (i32, i32) {
    %c0_i32 = arith.constant 0 : i32
    %c0_i32_0 = arith.constant 0 : i32
    %c0_i32_1 = arith.constant 0 : i32
    return %c0_i32, %c0_i32_0 : i32, i32
  }
  func.func @transform_3(%arg0: i32) -> (i32, i32) {
    %c0_i32 = arith.constant 0 : i32
    %c0_i32_0 = arith.constant 0 : i32
    %c0_i32_1 = arith.constant 0 : i32
    return %c0_i32, %c0_i32_0 : i32, i32
  }
  func.func @transform_4(%arg0: i32) -> (i32, i32) {
    %c0_i32 = arith.constant 0 : i32
    %c0_i32_0 = arith.constant 0 : i32
    %c0_i32_1 = arith.constant 0 : i32
    return %c0_i32, %c0_i32_0 : i32, i32
  }
  func.func @transform_5(%arg0: i32) -> (i32, i32) {
    %c0_i32 = arith.constant 0 : i32
    %c0_i32_0 = arith.constant 0 : i32
    %c0_i32_1 = arith.constant 0 : i32
    return %c0_i32, %c0_i32_0 : i32, i32
  }
  func.func @transform_6(%arg0: i32) -> (i32, i32) {
    %c0_i32 = arith.constant 0 : i32
    %c0_i32_0 = arith.constant 0 : i32
    %c0_i32_1 = arith.constant 0 : i32
    return %c0_i32, %c0_i32_0 : i32, i32
  }
  func.func @transform_7(%arg0: i32) -> (i32, i32) {
    %c0_i32 = arith.constant 0 : i32
    %c0_i32_0 = arith.constant 0 : i32
    return %arg0, %c0_i32 : i32, i32
  }
}

</mosaic_0001>

<bundles_post_ra>
// kernel: tpu_custom_call.1
= control target key start
LH: loop header
LB: loop body
LE: loop exit
PB: predicated region body
PF: predicated region fallthrough
CT: control target
= control target key end

     0   :  { %12 = vsyncpa [#allocation3], 0  ;;  %s2965_s0 = inlined_call_operand.hbm [shape: f32[8,1024], index: 0, kind: input, shape index: {}]   ;;  %s2966_s1 = inlined_call_operand.vmem [shape: s32[8,1], index: 1, kind: input, shape index: {}]   ;;  %s2967_s2 = inlined_call_operand.vmem [shape: f32[1,256], index: 2, kind: input, shape index: {}]   ;;  %s2968_s3 = inlined_call_operand.hbm [shape: bf16[1024,256], index: 3, kind: input, shape index: {}]   ;;  %s2969_s4 = inlined_call_operand.hbm [shape: bf16[128,256], index: 4, kind: input, shape index: {}]   ;;  %s2970_s5 = inlined_call_operand.hbm [shape: bf16[256,1024], index: 5, kind: input, shape index: {}]   ;;  %s2971_s6 = inlined_call_operand.vmem [shape: f32[1,1024], index: 6, kind: input, shape index: {}]   ;;  %s2972_s7 = inlined_call_operand.hbm [shape: f32[8,1024], index: 7, kind: output, shape index: {}]  }
   0x1   :  { %13 = vsyncpa [#allocation6], 0 }
   0x2   :  { %14 = vsyncpa [#allocation9], 0 }
   0x3   :  { %15 = vsyncpa [#allocation4], 0  ;;  %s2824_s24 = smov [#allocation5]  }
   0x4   :  { %s35_s25 = sshll.u32 %s2824_s24, 4  ;;  %s36_s25 = int_to_ptr.vmem [resolvable:$true] %s35_s25 }
   0x5   :  { %s2724_s26 = scalar_lea.vmem %s36_s25, 16384  ;;  %p2729_p1 = scmp.lt.s32.totalorder %s36_s25, %s36_s25 }
   0x6   :  { %p2725_p0 = scmp.ne.s32.totalorder %s36_s25, %s2724_s26  ;;  %p2730_p2 = scmp.lt.s32.totalorder %s2724_s26, %s2724_s26 }
   0x8   :  { %p2731_p3 = por %p2730_p2, %p2729_p1 }
   0xa   :  { %p2732_p4 = pnand %p2731_p3, %p2725_p0 }
   0xc   :  { %2735 = shalt.err (!%p2732_p4)
}
   0xd   :  { %s2825_s27 = smov 128   ;;  %s2826_s28 = smov 8  }
   0xe   :  { %41 = dma.hbm_to_vmem [thread:$0]  %s2968_s3, 16384, %s36_s25, [#allocation6], %s2825_s27, %s2825_s27, %s2826_s28  }
   0xf   :  { %s2827_s8 = smov [#allocation2]   ;;  %s2828_s10 = smov [#allocation7]  }
  0x10   :  { %s22_s9 = sshll.u32 %s2827_s8, 4  ;;  %s47_s11 = sshll.u32 %s2828_s10, 4  ;;  %s23_s9 = int_to_ptr.vmem [resolvable:$true] %s22_s9  ;;  %s48_s11 = int_to_ptr.vmem [resolvable:$true] %s47_s11 }
  0x11   :  { %s2744_s12 = scalar_lea.vmem %s23_s9, 1024  ;;  %p2749_p6 = scmp.lt.s32.totalorder %s23_s9, %s23_s9 }
  0x12   :  { %p2745_p5 = scmp.ne.s32.totalorder %s23_s9, %s2744_s12  ;;  %p2750_p7 = scmp.lt.s32.totalorder %s2744_s12, %s2744_s12 }
  0x14   :  { %p2751_p8 = por %p2750_p7, %p2749_p6 }
  0x16   :  { %p2752_p9 = pnand %p2751_p8, %p2745_p5 }
  0x18   :  { %2755 = shalt.err (!%p2752_p9)
}
  0x19   :  { %25 = dma.hbm_to_vmem [thread:$0]  %s2965_s0, 1024, %s23_s9, [#allocation3]  }
  0x1a   :  { %s2764_s15 = scalar_lea.vmem %s48_s11, 2048  ;;  %p2769_p11 = scmp.lt.s32.totalorder %s48_s11, %s48_s11 }
  0x1b   :  { %p2765_p10 = scmp.ne.s32.totalorder %s48_s11, %s2764_s15  ;;  %p2770_p12 = scmp.lt.s32.totalorder %s2764_s15, %s2764_s15 }
  0x1d   :  { %p2771_p13 = por %p2770_p12, %p2769_p11 }
  0x1f   :  { %p2772_p0 = pnand %p2771_p13, %p2765_p10 }
  0x21   :  { %2775 = shalt.err (!%p2772_p0)
}
  0x22   :  { %53 = dma.hbm_to_vmem [thread:$0]  %s2969_s4, 2048, %s48_s11, [#allocation6], %s2825_s27, %s2825_s27, %s2826_s28  }
  0x23   :  { %s2829_s17 = smov [#allocation8]  }
  0x24   :  { %s59_s18 = sshll.u32 %s2829_s17, 4  ;;  %s60_s18 = int_to_ptr.vmem [resolvable:$true] %s59_s18 }
  0x25   :  { %s2784_s19 = scalar_lea.vmem %s60_s18, 16384  ;;  %p2789_p2 = scmp.lt.s32.totalorder %s60_s18, %s60_s18 }
  0x26   :  { %p2785_p1 = scmp.ne.s32.totalorder %s60_s18, %s2784_s19  ;;  %p2790_p3 = scmp.lt.s32.totalorder %s2784_s19, %s2784_s19 }
  0x28   :  { %p2791_p4 = por %p2790_p3, %p2789_p2 }
  0x2a   :  { %p2792_p5 = pnand %p2791_p4, %p2785_p1 }
  0x2c   :  { %2795 = shalt.err (!%p2792_p5)
}
  0x2d   :  { %s2830_s0 = smov 512   ;;  %s2831_s20 = smov 32  }
  0x2e   :  { %65 = dma.hbm_to_vmem [thread:$0]  %s2970_s5, 16384, %s60_s18, [#allocation9], %s2830_s0, %s2830_s0, %s2831_s20  }
  0x2f   :  { %2816 = dma.done.wait [#allocation3], 1024  }
  0x30   :  { %2817 = vsyncadd [#allocation3], 4294966272 }
  0x31   :  { %2818 = dma.done.wait [#allocation6], 18432  }
  0x32   :  { %2819 = vsyncadd [#allocation6], 4294948864 }
  0x33   :  { %2820 = dma.done.wait [#allocation9], 16384  }
  0x34   :  { %2821 = vsyncadd [#allocation9], 4294950912  ;;  %v2832_v0 = vmov 0   ;;  %v89_v1 = vld [vmem:[%s2966_s1] sm:$0xff]  ;;  %v2496_v2 = vld [vmem:[#allocation5 + $0x74] ss:$8 sps:$4 sm:$0xff]  }
  0x35   :  { %2495 = vset.pattern.permute.xlu0 %v2832_v0  ;;  %493 = vmatprep.mubr.bf16.mxu0 %v2832_v0  ;;  %v2498_v3 = vld [vmem:[#allocation5 + $0x70] ss:$8 sps:$4 sm:$0xff]   ;;  %v2499_v4 = vld [vmem:[#allocation5 + $0x64] ss:$8 sps:$4 sm:$0xff]   ;;  %v2501_v5 = vld [vmem:[#allocation5 + $0x60] ss:$8 sps:$4 sm:$0xff]  }
  0x36   :  { %375 = vperm.xlu0 %2495, %v89_v1   ;;  %1153 = vmatprep.subr.bf16.mxu1 %v2496_v2  ;;  %v2502_v6 = vld [vmem:[#allocation5 + $0x54] ss:$8 sps:$4 sm:$0xff]   ;;  %v2504_v7 = vld [vmem:[#allocation5 + $0x50] ss:$8 sps:$4 sm:$0xff]   ;;  %v2505_v8 = vld [vmem:[#allocation5 + $0x44] ss:$8 sps:$4 sm:$0xff]  }
  0x37   :  { %1154 = vmatpush1.bf16.msra.mxu1 %v2498_v3  ;;  %v2507_v9 = vld [vmem:[#allocation5 + $0x40] ss:$8 sps:$4 sm:$0xff]   ;;  %v2520_v10 = vld [vmem:[#allocation7 + $0x74] ss:$8 sps:$4 sm:$0xff]   ;;  %v2522_v11 = vld [vmem:[#allocation7 + $0x70] ss:$8 sps:$4 sm:$0xff]  }
  0x38   :  { %1155 = vmatprep.subr.bf16.mxu1 %v2499_v4  ;;  %v2508_v12 = vld [vmem:[#allocation5 + $0x34] ss:$8 sps:$4 sm:$0xff]   ;;  %461 = vmatprep.subr.bf16.mxu0 %v2520_v10  ;;  %v2526_v13 = vld [vmem:[#allocation7 + $0x64] ss:$8 sps:$4 sm:$0xff]   ;;  %v2528_v14 = vld [vmem:[#allocation7 + $0x60] ss:$8 sps:$4 sm:$0xff]  }
  0x39   :  { %462 = vmatpush1.bf16.msra.mxu0 %v2522_v11  ;;  %v2510_v15 = vld [vmem:[#allocation5 + $0x30] ss:$8 sps:$4 sm:$0xff]   ;;  %v2511_v16 = vld [vmem:[#allocation5 + $0x24] ss:$8 sps:$4 sm:$0xff]   ;;  %v2532_v17 = vld [vmem:[#allocation7 + $0x54] ss:$8 sps:$4 sm:$0xff]  }
  0x3a   :  { %463 = vmatprep.subr.bf16.mxu0 %v2526_v13  ;;  %v2534_v18 = vld [vmem:[#allocation7 + $0x50] ss:$8 sps:$4 sm:$0xff]   ;;  %v2538_v19 = vld [vmem:[#allocation7 + $0x44] ss:$8 sps:$4 sm:$0xff]   ;;  %v2513_v20 = vld [vmem:[#allocation5 + $0x20] ss:$8 sps:$4 sm:$0xff]  }
  0x3b   :  { %1156 = vmatpush1.bf16.msra.mxu1 %v2501_v5  ;;  %v2514_v21 = vld [vmem:[#allocation5 + $0x14] ss:$8 sps:$4 sm:$0xff]   ;;  %v2540_v22 = vld [vmem:[#allocation7 + $0x40] ss:$8 sps:$4 sm:$0xff]   ;;  %v2516_v24 = vld [vmem:[#allocation5 + $0x10] ss:$8 sps:$4 sm:$0xff]  }
  0x3c   :  { %1157 = vmatprep.subr.bf16.mxu1 %v2502_v6  ;;  %v2544_v23 = vld [vmem:[#allocation7 + $0x34] ss:$8 sps:$4 sm:$0xff]   ;;  %v2517_v25 = vld [vmem:[#allocation5 + $0x4] ss:$8 sps:$4 sm:$0xff]   ;;  %v2546_v26 = vld [vmem:[#allocation7 + $0x30] ss:$8 sps:$4 sm:$0xff]  }
  0x3d   :  { %464 = vmatpush1.bf16.msra.mxu0 %v2528_v14  ;;  %v2550_v27 = vld [vmem:[#allocation7 + $0x24] ss:$8 sps:$4 sm:$0xff]   ;;  %v2519_v28 = vld [vmem:[#allocation5] ss:$8 sps:$4 sm:$0xff]   ;;  %v2523_v29 = vld [vmem:[#allocation5 + $0xf4] ss:$8 sps:$4 sm:$0xff]  }
  0x3e   :  { %465 = vmatprep.subr.bf16.mxu0 %v2532_v17  ;;  %v2552_v30 = vld [vmem:[#allocation7 + $0x20] ss:$8 sps:$4 sm:$0xff]   ;;  %v2556_v31 = vld [vmem:[#allocation7 + $0x14] ss:$8 sps:$4 sm:$0xff]   ;;  %v2525_v32 = vld [vmem:[#allocation5 + $0xf0] ss:$8 sps:$4 sm:$0xff]  }
  0x3f   :  { %1158 = vmatpush1.bf16.msra.mxu1 %v2504_v7  ;;  %v2529_v33 = vld [vmem:[#allocation5 + $0xe4] ss:$8 sps:$4 sm:$0xff]   ;;  %v2558_v35 = vld [vmem:[#allocation7 + $0x10] ss:$8 sps:$4 sm:$0xff]   ;;  %v2531_v38 = vld [vmem:[#allocation5 + $0xe0] ss:$8 sps:$4 sm:$0xff]  }
  0x40   :  { %1159 = vmatprep.subr.bf16.mxu1 %v2505_v8  ;;  %v82_v34 = vld [vmem:[#allocation2 + $0x8] sm:$0xff]  ;;  %v2535_v39 = vld [vmem:[#allocation5 + $0xd4] ss:$8 sps:$4 sm:$0xff]   ;;  %v2537_v42 = vld [vmem:[#allocation5 + $0xd0] ss:$8 sps:$4 sm:$0xff]  }
  0x41   :  { %466 = vmatpush1.bf16.msra.mxu0 %v2534_v18  ;;  %v365_v36 = vpack.c.bf16 %v82_v34, %v82_v34  ;;  %v2562_v37 = vld [vmem:[#allocation7 + $0x4] ss:$8 sps:$4 sm:$0xff]   ;;  %v2564_v40 = vld [vmem:[#allocation7] ss:$8 sps:$4 sm:$0xff]   ;;  %v2570_v41 = vld [vmem:[#allocation5 + $0x174] ss:$8 sps:$4 sm:$0xff]  }
  0x42   :  { %467 = vmatprep.subr.bf16.mxu0 %v2538_v19  ;;  %v2541_v43 = vld [vmem:[#allocation5 + $0xc4] ss:$8 sps:$4 sm:$0xff]   ;;  %v2543_v44 = vld [vmem:[#allocation5 + $0xc0] ss:$8 sps:$4 sm:$0xff]   ;;  %v2547_v45 = vld [vmem:[#allocation5 + $0xb4] ss:$8 sps:$4 sm:$0xff]  }
  0x43   :  { %1160 = vmatpush1.bf16.msra.mxu1 %v2507_v9  ;;  %1185 = vmatprep.mubr.bf16.mxu1 %v365_v36  ;;  %v2549_v46 = vld [vmem:[#allocation5 + $0xb0] ss:$8 sps:$4 sm:$0xff]   ;;  %v2553_v47 = vld [vmem:[#allocation5 + $0xa4] ss:$8 sps:$4 sm:$0xff]   ;;  %v2555_v48 = vld [vmem:[#allocation5 + $0xa0] ss:$8 sps:$4 sm:$0xff]  }
  0x44   :  { %1161 = vmatprep.subr.bf16.mxu1 %v2508_v12  ;;  %v2559_v49 = vld [vmem:[#allocation5 + $0x94] ss:$8 sps:$4 sm:$0xff]   ;;  %v2561_v50 = vld [vmem:[#allocation5 + $0x90] ss:$8 sps:$4 sm:$0xff]   ;;  %v2565_v51 = vld [vmem:[#allocation5 + $0x84] ss:$8 sps:$4 sm:$0xff]  }
  0x45   :  { %468 = vmatpush1.bf16.msra.mxu0 %v2540_v22  ;;  %v2567_v52 = vld [vmem:[#allocation5 + $0x80] ss:$8 sps:$4 sm:$0xff]   ;;  %v2573_v54 = vld [vmem:[#allocation5 + $0x274] ss:$8 sps:$4 sm:$0xff]   ;;  %v2571_v56 = vld [vmem:[#allocation5 + $0x270] ss:$8 sps:$4 sm:$0xff]  }
  0x46   :  { %469 = vmatprep.subr.bf16.mxu0 %v2544_v23  ;;  %v81_v53 = vld [vmem:[#allocation2] sm:$0xff]  ;;  %v2585_v59 = vld [vmem:[#allocation5 + $0x254] ss:$8 sps:$4 sm:$0xff]   ;;  %v2583_v60 = vld [vmem:[#allocation5 + $0x250] ss:$8 sps:$4 sm:$0xff]  }
  0x47   :  { %1162 = vmatpush1.bf16.msra.mxu1 %v2510_v15  ;;  %v364_v55 = vpack.c.bf16 %v81_v53, %v81_v53  ;;  %v2579_v57 = vld [vmem:[#allocation5 + $0x264] ss:$8 sps:$4 sm:$0xff]   ;;  %v2577_v58 = vld [vmem:[#allocation5 + $0x260] ss:$8 sps:$4 sm:$0xff]   ;;  %v2597_v63 = vld [vmem:[#allocation5 + $0x234] ss:$8 sps:$4 sm:$0xff]  }
  0x48   :  { %1163 = vmatprep.subr.bf16.mxu1 %v2511_v16  ;;  %v2591_v61 = vld [vmem:[#allocation5 + $0x244] ss:$8 sps:$4 sm:$0xff]   ;;  %v2589_v62 = vld [vmem:[#allocation5 + $0x240] ss:$8 sps:$4 sm:$0xff]   ;;  %v2595_v2 = vld [vmem:[#allocation5 + $0x230] ss:$8 sps:$4 sm:$0xff]  }
  0x49   :  { %470 = vmatpush1.bf16.msra.mxu0 %v2546_v26  ;;  %v86_v0 = vld [vmem:[#allocation2 + $0x28] sm:$0xff]  ;;  %v2609_v5 = vld [vmem:[#allocation5 + $0x214] ss:$8 sps:$4 sm:$0xff]   ;;  %v2607_v6 = vld [vmem:[#allocation5 + $0x210] ss:$8 sps:$4 sm:$0xff]  }
  0x4a   :  { %471 = vmatprep.subr.bf16.mxu0 %v2550_v27  ;;  %v369_v1 = vpack.c.bf16 %v86_v0, %v86_v0  ;;  %v2603_v3 = vld [vmem:[#allocation5 + $0x224] ss:$8 sps:$4 sm:$0xff]   ;;  %v2601_v4 = vld [vmem:[#allocation5 + $0x220] ss:$8 sps:$4 sm:$0xff]   ;;  %v2621_v9 = vld [vmem:[#allocation5 + $0x2f4] ss:$8 sps:$4 sm:$0xff]  }
  0x4b   :  { %1164 = vmatpush1.bf16.msra.mxu1 %v2513_v20  ;;  %v2615_v7 = vld [vmem:[#allocation5 + $0x204] ss:$8 sps:$4 sm:$0xff]   ;;  %v2613_v8 = vld [vmem:[#allocation5 + $0x200] ss:$8 sps:$4 sm:$0xff]   ;;  %v2619_v10 = vld [vmem:[#allocation5 + $0x2f0] ss:$8 sps:$4 sm:$0xff]  }
  0x4c   :  { %1165 = vmatprep.subr.bf16.mxu1 %v2514_v21  ;;  %v2627_v11 = vld [vmem:[#allocation5 + $0x2e4] ss:$8 sps:$4 sm:$0xff]   ;;  %v2625_v12 = vld [vmem:[#allocation5 + $0x2e0] ss:$8 sps:$4 sm:$0xff]   ;;  %v2633_v13 = vld [vmem:[#allocation5 + $0x2d4] ss:$8 sps:$4 sm:$0xff]   ;;  %v372_v21 = vlaneseq }
  0x4d   :  { %472 = vmatpush1.bf16.msra.mxu0 %v2552_v30  ;;  %v2631_v14 = vld [vmem:[#allocation5 + $0x2d0] ss:$8 sps:$4 sm:$0xff]   ;;  %v2639_v15 = vld [vmem:[#allocation5 + $0x2c4] ss:$8 sps:$4 sm:$0xff]   ;;  %v2637_v16 = vld [vmem:[#allocation5 + $0x2c0] ss:$8 sps:$4 sm:$0xff]  }
  0x4e   :  { %473 = vmatprep.subr.bf16.mxu0 %v2556_v31  ;;  %v2645_v17 = vld [vmem:[#allocation5 + $0x2b4] ss:$8 sps:$4 sm:$0xff]   ;;  %v2643_v18 = vld [vmem:[#allocation5 + $0x2b0] ss:$8 sps:$4 sm:$0xff]   ;;  %v2651_v19 = vld [vmem:[#allocation5 + $0x2a4] ss:$8 sps:$4 sm:$0xff]  }
  0x4f   :  { %1166 = vmatpush1.bf16.msra.mxu1 %v2516_v24  ;;  %v2649_v20 = vld [vmem:[#allocation5 + $0x2a0] ss:$8 sps:$4 sm:$0xff]   ;;  %v2657_v22 = vld [vmem:[#allocation5 + $0x294] ss:$8 sps:$4 sm:$0xff]   ;;  %v2655_v23 = vld [vmem:[#allocation5 + $0x290] ss:$8 sps:$4 sm:$0xff]  }
  0x50   :  { %1167 = vmatprep.subr.bf16.mxu1 %v2517_v25  ;;  %v373_v24 = vand.u32 127, %v372_v21  ;;  %v2663_v25 = vld [vmem:[#allocation5 + $0x284] ss:$8 sps:$4 sm:$0xff]   ;;  %v84_v26 = vld [vmem:[#allocation2 + $0x18] sm:$0xff]  ;;  %v2661_v31 = vld [vmem:[#allocation5 + $0x280] ss:$8 sps:$4 sm:$0xff]  }
  0x51   :  { %474 = vmatpush1.bf16.msra.mxu0 %v2558_v35  ;;  %v2576_v30 = vld [vmem:[#allocation5 + $0x164] ss:$8 sps:$4 sm:$0xff]   ;;  %v2574_v34 = vld [vmem:[#allocation5 + $0x160] ss:$8 sps:$4 sm:$0xff]   ;;  %v2582_v36 = vld [vmem:[#allocation5 + $0x154] ss:$8 sps:$4 sm:$0xff]  }
  0x52   :  { %475 = vmatprep.subr.bf16.mxu0 %v2562_v37  ;;  %v2580_v37 = vld [vmem:[#allocation5 + $0x150] ss:$8 sps:$4 sm:$0xff]  }
  0x53   :  { %1168 = vmatpush1.bf16.msra.mxu1 %v2519_v28  ;;  %v2568_v28 = vld [vmem:[#allocation5 + $0x170] ss:$8 sps:$4 sm:$0xff]  }
  0x54   :  { %1169 = vmatprep.subr.bf16.mxu1 %v2523_v29  ;;  %v367_v29 = vpack.c.bf16 %v84_v26, %v84_v26  ;;  %v2628_v53 = vld [vmem:[#allocation5 + $0x1d0] ss:$8 sps:$4 sm:$0xff]  }
  0x55   :  { %476 = vmatpush1.bf16.msra.mxu0 %v2564_v40  ;;  %v2594_v40 = vld [vmem:[#allocation5 + $0x134] ss:$8 sps:$4 sm:$0xff]   ;;  %v2694_v26 = vld [vmem:[#allocation5 + $0x3d0] ss:$8 sps:$4 sm:$0xff]  }
  0x56   :  { %1194 = vmatprep.subr.bf16.mxu0 %v2570_v41  ;;  %v2592_v41 = vld [vmem:[#allocation5 + $0x130] ss:$8 sps:$4 sm:$0xff]  }
  0x57   :  { %1170 = vmatpush2.bf16.msra.mxu1 %v2525_v32  ;;  %v85_v32 = vld [vmem:[#allocation2 + $0x20] sm:$0xff]  ;;  %v83_v0 = vld [vmem:[#allocation2 + $0x10] sm:$0xff] }
  0x58   :  { %1171 = vmatprep.subr.bf16.mxu1 %v2529_v33  ;;  %v2833_v33 = vmov 1.0|1.0   ;;  %v368_v35 = vpack.c.bf16 %v85_v32, %v85_v32  ;;  %v2703_v32 = vld [vmem:[#allocation5 + $0x3a0] ss:$8 sps:$4 sm:$0xff]  }
  0x5b   :  { %1172 = vmatpush2.bf16.msra.mxu1 %v2531_v38  ;;  %v2588_v38 = vld [vmem:[#allocation5 + $0x144] ss:$8 sps:$4 sm:$0xff]  }
  0x5c   :  { %1173 = vmatprep.subr.bf16.mxu1 %v2535_v39  ;;  %v2586_v39 = vld [vmem:[#allocation5 + $0x140] ss:$8 sps:$4 sm:$0xff]  }
  0x5f   :  { %1174 = vmatpush2.bf16.msra.mxu1 %v2537_v42  ;;  %v2600_v42 = vld [vmem:[#allocation5 + $0x124] ss:$8 sps:$4 sm:$0xff]  }
  0x60   :  { %1175 = vmatprep.subr.bf16.mxu1 %v2541_v43  ;;  %v2598_v43 = vld [vmem:[#allocation5 + $0x120] ss:$8 sps:$4 sm:$0xff]  }
  0x63   :  { %1176 = vmatpush2.bf16.msra.mxu1 %v2543_v44  ;;  %v2606_v44 = vld [vmem:[#allocation5 + $0x114] ss:$8 sps:$4 sm:$0xff]  }
  0x64   :  { %1177 = vmatprep.subr.bf16.mxu1 %v2547_v45  ;;  %v2604_v45 = vld [vmem:[#allocation5 + $0x110] ss:$8 sps:$4 sm:$0xff]  }
  0x67   :  { %1178 = vmatpush2.bf16.msra.mxu1 %v2549_v46  ;;  %v2612_v46 = vld [vmem:[#allocation5 + $0x104] ss:$8 sps:$4 sm:$0xff]  }
  0x68   :  { %1179 = vmatprep.subr.bf16.mxu1 %v2553_v47  ;;  %v2610_v47 = vld [vmem:[#allocation5 + $0x100] ss:$8 sps:$4 sm:$0xff]  }
  0x6b   :  { %1180 = vmatpush2.bf16.msra.mxu1 %v2555_v48  ;;  %v2618_v48 = vld [vmem:[#allocation5 + $0x1f4] ss:$8 sps:$4 sm:$0xff]  }
  0x6c   :  { %1181 = vmatprep.subr.bf16.mxu1 %v2559_v49  ;;  %v2616_v49 = vld [vmem:[#allocation5 + $0x1f0] ss:$8 sps:$4 sm:$0xff]  }
  0x6f   :  { %1182 = vmatpush2.bf16.msra.mxu1 %v2561_v50  ;;  %v2624_v50 = vld [vmem:[#allocation5 + $0x1e4] ss:$8 sps:$4 sm:$0xff]  }
  0x70   :  { %1183 = vmatprep.subr.bf16.mxu1 %v2565_v51  ;;  %v2622_v51 = vld [vmem:[#allocation5 + $0x1e0] ss:$8 sps:$4 sm:$0xff]  }
  0x73   :  { %1184 = vmatpush2.bf16.msra.mxu1 %v2567_v52  ;;  %v2630_v52 = vld [vmem:[#allocation5 + $0x1d4] ss:$8 sps:$4 sm:$0xff]  }
  0x74   :  { %1235 = vmatprep.subr.bf16.mxu1 %v2573_v54  ;;  %v2636_v54 = vld [vmem:[#allocation5 + $0x1c4] ss:$8 sps:$4 sm:$0xff]  }
  0x76   :  { %1186 = vmatmul.mubr.bf16.vlgmr.msra.gmra.mxu1 %v364_v55  ;;  %v2634_v55 = vld [vmem:[#allocation5 + $0x1c0] ss:$8 sps:$4 sm:$0xff]  }
  0x77   :  { %1236 = vmatpush1.bf16.msra.mxu1 %v2571_v56  ;;  %1267 = vmatprep.mubr.bf16.mxu1 %v369_v1  ;;  %v2642_v56 = vld [vmem:[#allocation5 + $0x1b4] ss:$8 sps:$4 sm:$0xff]  }
  0x78   :  { %1237 = vmatprep.subr.bf16.mxu1 %v2579_v57  ;;  %v2640_v57 = vld [vmem:[#allocation5 + $0x1b0] ss:$8 sps:$4 sm:$0xff]   ;;  %v2666_v1 = vld [vmem:[#allocation5 + $0x374] ss:$8 sps:$4 sm:$0xff]  }
  0x7b   :  { %1238 = vmatpush1.bf16.msra.mxu1 %v2577_v58  ;;  %v2648_v58 = vld [vmem:[#allocation5 + $0x1a4] ss:$8 sps:$4 sm:$0xff]  }
  0x7c   :  { %1239 = vmatprep.subr.bf16.mxu1 %v2585_v59  ;;  %v2646_v59 = vld [vmem:[#allocation5 + $0x1a0] ss:$8 sps:$4 sm:$0xff]  }
  0x7f   :  { %1240 = vmatpush1.bf16.msra.mxu1 %v2583_v60  ;;  %v2654_v60 = vld [vmem:[#allocation5 + $0x194] ss:$8 sps:$4 sm:$0xff]  }
  0x80   :  { %1241 = vmatprep.subr.bf16.mxu1 %v2591_v61  ;;  %v2652_v61 = vld [vmem:[#allocation5 + $0x190] ss:$8 sps:$4 sm:$0xff]  }
  0x83   :  { %1242 = vmatpush1.bf16.msra.mxu1 %v2589_v62  ;;  %v2660_v62 = vld [vmem:[#allocation5 + $0x184] ss:$8 sps:$4 sm:$0xff]  }
  0x84   :  { %1243 = vmatprep.subr.bf16.mxu1 %v2597_v63  ;;  %v2658_v63 = vld [vmem:[#allocation5 + $0x180] ss:$8 sps:$4 sm:$0xff]  }
  0x87   :  { %1244 = vmatpush1.bf16.msra.mxu1 %v2595_v2  ;;  %v88_v2 = vld [vmem:[#allocation2 + $0x38] sm:$0xff] }
  0x88   :  { %1245 = vmatprep.subr.bf16.mxu1 %v2603_v3  ;;  %v366_v3 = vpack.c.bf16 %v83_v0, %v83_v0 }
  0x8b   :  { %1246 = vmatpush1.bf16.msra.mxu1 %v2601_v4  ;;  %v2664_v4 = vld [vmem:[#allocation5 + $0x370] ss:$8 sps:$4 sm:$0xff]  }
  0x8c   :  { %1247 = vmatprep.subr.bf16.mxu1 %v2609_v5  ;;  %v371_v5 = vpack.c.bf16 %v88_v2, %v88_v2  ;;  %v271_v2 = vld [vmem:[#allocation8 + $0x120] sm:$0xff] }
  0x8f   :  { %1248 = vmatpush1.bf16.msra.mxu1 %v2607_v6  ;;  %v2669_v6 = vld [vmem:[#allocation5 + $0x364] ss:$8 sps:$4 sm:$0xff]  }
  0x90   :  { %1249 = vmatprep.subr.bf16.mxu1 %v2615_v7  ;;  %v2667_v7 = vld [vmem:[#allocation5 + $0x360] ss:$8 sps:$4 sm:$0xff]  }
  0x93   :  { %1250 = vmatpush1.bf16.msra.mxu1 %v2613_v8  ;;  %v2672_v8 = vld [vmem:[#allocation5 + $0x354] ss:$8 sps:$4 sm:$0xff]  }
  0x94   :  { %1251 = vmatprep.subr.bf16.mxu1 %v2621_v9  ;;  %v2670_v9 = vld [vmem:[#allocation5 + $0x350] ss:$8 sps:$4 sm:$0xff]  }
  0x97   :  { %1252 = vmatpush2.bf16.msra.mxu1 %v2619_v10  ;;  %v2675_v10 = vld [vmem:[#allocation5 + $0x344] ss:$8 sps:$4 sm:$0xff]  }
  0x98   :  { %1253 = vmatprep.subr.bf16.mxu1 %v2627_v11  ;;  %v2673_v11 = vld [vmem:[#allocation5 + $0x340] ss:$8 sps:$4 sm:$0xff]  }
  0x9b   :  { %1254 = vmatpush2.bf16.msra.mxu1 %v2625_v12  ;;  %v2678_v12 = vld [vmem:[#allocation5 + $0x334] ss:$8 sps:$4 sm:$0xff]  }
  0x9c   :  { %1255 = vmatprep.subr.bf16.mxu1 %v2633_v13  ;;  %v2676_v13 = vld [vmem:[#allocation5 + $0x330] ss:$8 sps:$4 sm:$0xff]  }
  0x9f   :  { %1256 = vmatpush2.bf16.msra.mxu1 %v2631_v14  ;;  %v2681_v14 = vld [vmem:[#allocation5 + $0x324] ss:$8 sps:$4 sm:$0xff]  }
  0xa0   :  { %1257 = vmatprep.subr.bf16.mxu1 %v2639_v15  ;;  %v2679_v15 = vld [vmem:[#allocation5 + $0x320] ss:$8 sps:$4 sm:$0xff]  }
  0xa3   :  { %1258 = vmatpush2.bf16.msra.mxu1 %v2637_v16  ;;  %v2684_v16 = vld [vmem:[#allocation5 + $0x314] ss:$8 sps:$4 sm:$0xff]  }
  0xa4   :  { %1259 = vmatprep.subr.bf16.mxu1 %v2645_v17  ;;  %v2682_v17 = vld [vmem:[#allocation5 + $0x310] ss:$8 sps:$4 sm:$0xff]  }
  0xa7   :  { %1260 = vmatpush2.bf16.msra.mxu1 %v2643_v18  ;;  %v2687_v18 = vld [vmem:[#allocation5 + $0x304] ss:$8 sps:$4 sm:$0xff]  }
  0xa8   :  { %1261 = vmatprep.subr.bf16.mxu1 %v2651_v19  ;;  %v2685_v19 = vld [vmem:[#allocation5 + $0x300] ss:$8 sps:$4 sm:$0xff]  }
  0xab   :  { %1262 = vmatpush2.bf16.msra.mxu1 %v2649_v20  ;;  %v2690_v20 = vld [vmem:[#allocation5 + $0x3f4] ss:$8 sps:$4 sm:$0xff]  }
  0xac   :  { %1263 = vmatprep.subr.bf16.mxu1 %v2657_v22  ;;  %v2688_v22 = vld [vmem:[#allocation5 + $0x3f0] ss:$8 sps:$4 sm:$0xff]  }
  0xaf   :  { %1264 = vmatpush2.bf16.msra.mxu1 %v2655_v23  ;;  %v2693_v23 = vld [vmem:[#allocation5 + $0x3e4] ss:$8 sps:$4 sm:$0xff]  }
  0xb0   :  { %1265 = vmatprep.subr.bf16.mxu1 %v2663_v25  ;;  %v2696_v25 = vld [vmem:[#allocation5 + $0x3d4] ss:$8 sps:$4 sm:$0xff]  }
  0xb1   :  { %v376_v27 = vpop.permute.xlu0 %375 }
  0xb2   :  { %vm377_vm0 = vcmp.eq.s32.totalorder %v373_v24, %v376_v27  ;;  %v2691_v24 = vld [vmem:[#allocation5 + $0x3e0] ss:$8 sps:$4 sm:$0xff]   ;;  %v2699_v27 = vld [vmem:[#allocation5 + $0x3c4] ss:$8 sps:$4 sm:$0xff]  }
  0xb3   :  { %vm2226_vm1 = vmpackc.low %vm377_vm0, %vm377_vm0  ;;  %1266 = vmatpush2.bf16.msra.mxu1 %v2661_v31  ;;  %v2705_v31 = vld [vmem:[#allocation5 + $0x3a4] ss:$8 sps:$4 sm:$0xff]  }
  0xb4   :  { %2227 = vmatmul.mubr.msk.bf16.vlgmr.msra.gmra.mxu0 %vm2226_vm1, %v2833_v33  ;;  %v2708_v33 = vld [vmem:[#allocation5 + $0x394] ss:$8 sps:$4 sm:$0xff]  }
  0xb5   :  { %1195 = vmatpush1.bf16.msra.mxu0 %v2568_v28  ;;  %1226 = vmatprep.mubr.bf16.mxu0 %v367_v29  ;;  %v2697_v28 = vld [vmem:[#allocation5 + $0x3c0] ss:$8 sps:$4 sm:$0xff]   ;;  %v2702_v29 = vld [vmem:[#allocation5 + $0x3b4] ss:$8 sps:$4 sm:$0xff]  }
  0xb6   :  { %1196 = vmatprep.subr.bf16.mxu0 %v2576_v30  ;;  %1268 = vmatmul.mubr.bf16.vlgmr.msra.gmra.mxu1 %v368_v35  ;;  %v2700_v30 = vld [vmem:[#allocation5 + $0x3b0] ss:$8 sps:$4 sm:$0xff]   ;;  %v2711_v35 = vld [vmem:[#allocation5 + $0x384] ss:$8 sps:$4 sm:$0xff]  }
  0xb9   :  { %1197 = vmatpush1.bf16.msra.mxu0 %v2574_v34  ;;  %v2706_v34 = vld [vmem:[#allocation5 + $0x390] ss:$8 sps:$4 sm:$0xff]  }
  0xba   :  { %1198 = vmatprep.subr.bf16.mxu0 %v2582_v36  ;;  %v2709_v36 = vld [vmem:[#allocation5 + $0x380] ss:$8 sps:$4 sm:$0xff]  }
  0xbd   :  { %1199 = vmatpush1.bf16.msra.mxu0 %v2580_v37  ;;  %v87_v37 = vld [vmem:[#allocation2 + $0x30] sm:$0xff] }
  0xbe   :  { %1200 = vmatprep.subr.bf16.mxu0 %v2588_v38  ;;  %v370_v38 = vpack.c.bf16 %v87_v37, %v87_v37  ;;  %v235_v37 = vld [vmem:[#allocation8] sm:$0xff] }
  0xc1   :  { %1201 = vmatpush1.bf16.msra.mxu0 %v2586_v39 }
  0xc2   :  { %1202 = vmatprep.subr.bf16.mxu0 %v2594_v40 }
  0xc5   :  { %1203 = vmatpush1.bf16.msra.mxu0 %v2592_v41  ;;  %v291_v41 = vld [vmem:[#allocation8 + $0x1c0] sm:$0xff] }
  0xc6   :  { %1204 = vmatprep.subr.bf16.mxu0 %v2600_v42  ;;  %v295_v42 = vld [vmem:[#allocation8 + $0x1e0] sm:$0xff] }
  0xc9   :  { %1205 = vmatpush1.bf16.msra.mxu0 %v2598_v43  ;;  %v292_v43 = vld [vmem:[#allocation8 + $0x1c8] sm:$0xff] }
  0xca   :  { %1206 = vmatprep.subr.bf16.mxu0 %v2606_v44  ;;  %v2412_v44 = vcombine.low %v291_v41, %v295_v42 }
  0xcd   :  { %1207 = vmatpush1.bf16.msra.mxu0 %v2604_v45  ;;  %v2413_v45 = vcombine.high %v291_v41, %v295_v42  ;;  %v236_v41 = vld [vmem:[#allocation8 + $0x8] sm:$0xff] }
  0xce   :  { %1208 = vmatprep.subr.bf16.mxu0 %v2612_v46  ;;  %v296_v46 = vld [vmem:[#allocation8 + $0x1e8] sm:$0xff] }
  0xcf   :  { %2020 = vmatprep.subr.bf16.mxu1 %v2413_v45 }
  0xd0   :  { %2021 = vmatpush1.bf16.msra.mxu1 %v2412_v44 }
  0xd1   :  { %1209 = vmatpush1.bf16.msra.mxu0 %v2610_v47  ;;  %v283_v47 = vld [vmem:[#allocation8 + $0x180] sm:$0xff] }
  0xd2   :  { %1210 = vmatprep.subr.bf16.mxu0 %v2618_v48  ;;  %v287_v48 = vld [vmem:[#allocation8 + $0x1a0] sm:$0xff] }
  0xd5   :  { %1211 = vmatpush2.bf16.msra.mxu0 %v2616_v49 }
  0xd6   :  { %1212 = vmatprep.subr.bf16.mxu0 %v2624_v50  ;;  %v2414_v50 = vcombine.low %v292_v43, %v296_v46 }
  0xd9   :  { %1213 = vmatpush2.bf16.msra.mxu0 %v2622_v51  ;;  %v2415_v51 = vcombine.high %v292_v43, %v296_v46  ;;  %v240_v43 = vld [vmem:[#allocation8 + $0x28] sm:$0xff] }
  0xda   :  { %1214 = vmatprep.subr.bf16.mxu0 %v2630_v52  ;;  %v2405_v52 = vcombine.high %v283_v47, %v287_v48  ;;  %v2358_v46 = vcombine.low %v236_v41, %v240_v43 }
  0xdc   :  { %2022 = vmatprep.subr.bf16.mxu1 %v2405_v52 }
  0xdd   :  { %1215 = vmatpush2.bf16.msra.mxu0 %v2628_v53  ;;  %v284_v53 = vld [vmem:[#allocation8 + $0x188] sm:$0xff] }
  0xde   :  { %1216 = vmatprep.subr.bf16.mxu0 %v2636_v54  ;;  %v288_v54 = vld [vmem:[#allocation8 + $0x1a8] sm:$0xff] }
  0xe1   :  { %1217 = vmatpush2.bf16.msra.mxu0 %v2634_v55  ;;  %v275_v55 = vld [vmem:[#allocation8 + $0x140] sm:$0xff] }
  0xe2   :  { %1218 = vmatprep.subr.bf16.mxu0 %v2642_v56  ;;  %v2407_v56 = vcombine.high %v284_v53, %v288_v54 }
  0xe5   :  { %1219 = vmatpush2.bf16.msra.mxu0 %v2640_v57  ;;  %v279_v57 = vld [vmem:[#allocation8 + $0x160] sm:$0xff] }
  0xe6   :  { %1220 = vmatprep.subr.bf16.mxu0 %v2648_v58  ;;  %v276_v58 = vld [vmem:[#allocation8 + $0x148] sm:$0xff] }
  0xe9   :  { %1221 = vmatpush2.bf16.msra.mxu0 %v2646_v59  ;;  %v280_v59 = vld [vmem:[#allocation8 + $0x168] sm:$0xff] }
  0xea   :  { %1222 = vmatprep.subr.bf16.mxu0 %v2654_v60  ;;  %v2399_v0 = vcombine.high %v276_v58, %v280_v59 }
  0xed   :  { %1223 = vmatpush2.bf16.msra.mxu0 %v2652_v61  ;;  %v2404_v61 = vcombine.low %v283_v47, %v287_v48  ;;  %v2359_v47 = vcombine.high %v236_v41, %v240_v43  ;;  %v311_v41 = vld [vmem:[#allocation8 + $0x260] sm:$0xff]  ;;  %v312_v43 = vld [vmem:[#allocation8 + $0x268] sm:$0xff] }
  0xee   :  { %1224 = vmatprep.subr.bf16.mxu0 %v2660_v62  ;;  %v2406_v62 = vcombine.low %v284_v53, %v288_v54  ;;  %v360_v54 = vld [vmem:[#allocation8 + $0x3e8] sm:$0xff] }
  0xef   :  { %2023 = vmatpush1.bf16.msra.mxu1 %v2404_v61  ;;  %v351_v61 = vld [vmem:[#allocation8 + $0x3a0] sm:$0xff] }
  0xf1   :  { %1225 = vmatpush2.bf16.msra.mxu0 %v2658_v63  ;;  %v2397_v63 = vcombine.high %v275_v55, %v279_v57 }
  0xf2   :  { %1276 = vmatprep.subr.bf16.mxu0 %v2666_v1  ;;  %v267_v1 = vld [vmem:[#allocation8 + $0x100] sm:$0xff] }
  0xf3   :  { %2024 = vmatprep.subr.bf16.mxu1 %v2397_v63 }
  0xf4   :  { %1227 = vmatmul.mubr.bf16.vlgmr.msra.gmra.mxu0 %v366_v3  ;;  %v268_v3 = vld [vmem:[#allocation8 + $0x108] sm:$0xff] }
  0xf5   :  { %1277 = vmatpush1.bf16.msra.mxu0 %v2664_v4  ;;  %1308 = vmatprep.mubr.bf16.mxu0 %v371_v5  ;;  %v272_v4 = vld [vmem:[#allocation8 + $0x128] sm:$0xff]  ;;  %v2396_v5 = vcombine.low %v275_v55, %v279_v57 }
  0xf6   :  { %1278 = vmatprep.subr.bf16.mxu0 %v2669_v6  ;;  %v2398_v6 = vcombine.low %v276_v58, %v280_v59 }
  0xf7   :  { %2025 = vmatpush1.bf16.msra.mxu1 %v2396_v5 }
  0xf9   :  { %1279 = vmatpush1.bf16.msra.mxu0 %v2667_v7  ;;  %v2389_v7 = vcombine.high %v267_v1, %v271_v2 }
  0xfa   :  { %1280 = vmatprep.subr.bf16.mxu0 %v2672_v8  ;;  %v2391_v8 = vcombine.high %v268_v3, %v272_v4 }
  0xfb   :  { %2026 = vmatprep.subr.bf16.mxu1 %v2389_v7  ;;  %v343_v7 = vld [vmem:[#allocation8 + $0x360] sm:$0xff] }
  0xfd   :  { %1281 = vmatpush1.bf16.msra.mxu0 %v2670_v9  ;;  %v259_v9 = vld [vmem:[#allocation8 + $0xc0] sm:$0xff] }
  0xfe   :  { %1282 = vmatprep.subr.bf16.mxu0 %v2675_v10  ;;  %v263_v10 = vld [vmem:[#allocation8 + $0xe0] sm:$0xff] }
 0x101   :  { %1283 = vmatpush1.bf16.msra.mxu0 %v2673_v11  ;;  %v260_v11 = vld [vmem:[#allocation8 + $0xc8] sm:$0xff] }
 0x102   :  { %1284 = vmatprep.subr.bf16.mxu0 %v2678_v12  ;;  %v264_v12 = vld [vmem:[#allocation8 + $0xe8] sm:$0xff] }
 0x105   :  { %1285 = vmatpush1.bf16.msra.mxu0 %v2676_v13  ;;  %v2388_v13 = vcombine.low %v267_v1, %v271_v2  ;;  %v352_v1 = vld [vmem:[#allocation8 + $0x3a8] sm:$0xff] }
 0x106   :  { %1286 = vmatprep.subr.bf16.mxu0 %v2681_v14  ;;  %v2390_v14 = vcombine.low %v268_v3, %v272_v4 }
 0x107   :  { %2027 = vmatpush1.bf16.msra.mxu1 %v2388_v13 }
 0x109   :  { %1287 = vmatpush1.bf16.msra.mxu0 %v2679_v15  ;;  %v2381_v15 = vcombine.high %v259_v9, %v263_v10 }
 0x10a   :  { %1288 = vmatprep.subr.bf16.mxu0 %v2684_v16  ;;  %v2383_v16 = vcombine.high %v260_v11, %v264_v12 }
 0x10b   :  { %2028 = vmatprep.subr.bf16.mxu1 %v2381_v15  ;;  %v335_v15 = vld [vmem:[#allocation8 + $0x320] sm:$0xff] }
 0x10d   :  { %1289 = vmatpush1.bf16.msra.mxu0 %v2682_v17  ;;  %v251_v17 = vld [vmem:[#allocation8 + $0x80] sm:$0xff] }
 0x10e   :  { %1290 = vmatprep.subr.bf16.mxu0 %v2687_v18  ;;  %v255_v18 = vld [vmem:[#allocation8 + $0xa0] sm:$0xff] }
 0x111   :  { %1291 = vmatpush1.bf16.msra.mxu0 %v2685_v19  ;;  %v252_v19 = vld [vmem:[#allocation8 + $0x88] sm:$0xff] }
 0x112   :  { %1292 = vmatprep.subr.bf16.mxu0 %v2690_v20  ;;  %v256_v20 = vld [vmem:[#allocation8 + $0xa8] sm:$0xff] }
 0x115   :  { %1293 = vmatpush2.bf16.msra.mxu0 %v2688_v22  ;;  %v2380_v22 = vcombine.low %v259_v9, %v263_v10  ;;  %v344_v10 = vld [vmem:[#allocation8 + $0x368] sm:$0xff] }
 0x116   :  { %1294 = vmatprep.subr.bf16.mxu0 %v2693_v23  ;;  %v2382_v23 = vcombine.low %v260_v11, %v264_v12 }
 0x117   :  { %2029 = vmatpush1.bf16.msra.mxu1 %v2380_v22  ;;  %v327_v22 = vld [vmem:[#allocation8 + $0x2e0] sm:$0xff] }
 0x119   :  { %1295 = vmatpush2.bf16.msra.mxu0 %v2691_v24  ;;  %v2373_v24 = vcombine.high %v251_v17, %v255_v18 }
 0x11a   :  { %1296 = vmatprep.subr.bf16.mxu0 %v2696_v25  ;;  %v2375_v25 = vcombine.high %v252_v19, %v256_v20 }
 0x11b   :  { %2030 = vmatprep.subr.bf16.mxu1 %v2373_v24 }
 0x11d   :  { %1297 = vmatpush2.bf16.msra.mxu0 %v2694_v26  ;;  %v243_v26 = vld [vmem:[#allocation8 + $0x40] sm:$0xff] }
 0x11e   :  { %1298 = vmatprep.subr.bf16.mxu0 %v2699_v27  ;;  %v247_v27 = vld [vmem:[#allocation8 + $0x60] sm:$0xff] }
 0x121   :  { %1299 = vmatpush2.bf16.msra.mxu0 %v2697_v28  ;;  %v244_v28 = vld [vmem:[#allocation8 + $0x48] sm:$0xff] }
 0x122   :  { %1300 = vmatprep.subr.bf16.mxu0 %v2702_v29  ;;  %v248_v29 = vld [vmem:[#allocation8 + $0x68] sm:$0xff] }
 0x125   :  { %1301 = vmatpush2.bf16.msra.mxu0 %v2700_v30  ;;  %v2372_v30 = vcombine.low %v251_v17, %v255_v18 }
 0x126   :  { %1302 = vmatprep.subr.bf16.mxu0 %v2705_v31  ;;  %v2374_v31 = vcombine.low %v252_v19, %v256_v20  ;;  %v336_v19 = vld [vmem:[#allocation8 + $0x328] sm:$0xff]  ;;  %v323_v20 = vld [vmem:[#allocation8 + $0x2c0] sm:$0xff] }
 0x127   :  { %2031 = vmatpush1.bf16.msra.mxu1 %v2372_v30  ;;  %v319_v30 = vld [vmem:[#allocation8 + $0x2a0] sm:$0xff] }
 0x129   :  { %1303 = vmatpush2.bf16.msra.mxu0 %v2703_v32  ;;  %v2365_v32 = vcombine.high %v243_v26, %v247_v27 }
 0x12a   :  { %1304 = vmatprep.subr.bf16.mxu0 %v2708_v33  ;;  %v2367_v33 = vcombine.high %v244_v28, %v248_v29 }
 0x12b   :  { %2032 = vmatprep.subr.bf16.mxu1 %v2365_v32  ;;  %v320_v32 = vld [vmem:[#allocation8 + $0x2a8] sm:$0xff] }
 0x12d   :  { %1305 = vmatpush2.bf16.msra.mxu0 %v2706_v34  ;;  %v2364_v34 = vcombine.low %v243_v26, %v247_v27  ;;  %v324_v26 = vld [vmem:[#allocation8 + $0x2c8] sm:$0xff] }
 0x12e   :  { %1306 = vmatprep.subr.bf16.mxu0 %v2711_v35  ;;  %v2366_v35 = vcombine.low %v244_v28, %v248_v29  ;;  %v328_v27 = vld [vmem:[#allocation8 + $0x2e8] sm:$0xff]  ;;  %v315_v28 = vld [vmem:[#allocation8 + $0x280] sm:$0xff] }
 0x12f   :  { %2033 = vmatpush1.bf16.msra.mxu1 %v2364_v34  ;;  %v2447_v29 = vcombine.high %v324_v26, %v328_v27  ;;  %v2446_v34 = vcombine.low %v324_v26, %v328_v27 }
 0x131   :  { %1307 = vmatpush2.bf16.msra.mxu0 %v2709_v36 }
 0x132   :  { %2061 = vmatprep.subr.bf16.mxu0 %v2415_v51  ;;  %v356_v51 = vld [vmem:[#allocation8 + $0x3c8] sm:$0xff] }
 0x133   :  { %v2478_v57 = vcombine.low %v356_v51, %v360_v54  ;;  %v2479_v58 = vcombine.high %v356_v51, %v360_v54  ;;  %v300_v51 = vld [vmem:[#allocation8 + $0x208] sm:$0xff] }
 0x134   :  { %1309 = vmatmul.mubr.bf16.vlgmr.msra.gmra.mxu0 %v370_v38  ;;  %v239_v38 = vld [vmem:[#allocation8 + $0x20] sm:$0xff] }
 0x135   :  { %2062 = vmatpush1.bf16.msra.mxu0 %v2414_v50  ;;  %v2357_v42 = vcombine.high %v235_v37, %v239_v38  ;;  %v2356_v45 = vcombine.low %v235_v37, %v239_v38  ;;  %v359_v50 = vld [vmem:[#allocation8 + $0x3e0] sm:$0xff] }
 0x136   :  { %v2891_v39 = vpop.f32.mrf.mxu1  ;;  %2063 = vmatprep.subr.bf16.mxu0 %v2407_v56  ;;  %v307_v38 = vld [vmem:[#allocation8 + $0x240] sm:$0xff] }
 0x137   :  { %2034 = vmatprep.subr.bf16.mxu1 %v2357_v42  ;;  %v308_v42 = vld [vmem:[#allocation8 + $0x248] sm:$0xff]  ;;  %v2428_v54 = vcombine.low %v307_v38, %v311_v41 }
 0x138   :  { %v2893_v40 = vpop.f32.mrf.mxu1  ;;  %2035 = vmatpush1.bf16.msra.mxu1 %v2356_v45  ;;  %v2436_v45 = vcombine.low %v315_v28, %v319_v30 }
 0x139   :  { %2064 = vmatpush1.bf16.msra.mxu0 %v2406_v62  ;;  %v348_v62 = vld [vmem:[#allocation8 + $0x388] sm:$0xff] }
 0x13a   :  { %v1191_v49 = vpop.f32.mrf.mxu1  ;;  %2065 = vmatprep.subr.bf16.mxu0 %v2399_v0  ;;  %v2470_v3 = vcombine.low %v348_v62, %v352_v1  ;;  %v2471_v4 = vcombine.high %v348_v62, %v352_v1  ;;  %v2905_v62 = vld [vmem:[#allocation8 + $0x1f0] sm:$0xff]  ;;  %v2911_v1 = vld [vmem:[#allocation8 + $0x1f8] sm:$0xff] }
 0x13b   :  { %v355_v49 = vld [vmem:[#allocation8 + $0x3c0] sm:$0xff] }
 0x13c   :  { %v1192_v60 = vpop.f32.mrf.mxu1  ;;  %v2477_v53 = vcombine.high %v355_v49, %v359_v50  ;;  %v2476_v56 = vcombine.low %v355_v49, %v359_v50  ;;  %v299_v49 = vld [vmem:[#allocation8 + $0x200] sm:$0xff] }
 0x13d   :  { %2066 = vmatpush1.bf16.msra.mxu0 %v2398_v6  ;;  %v347_v60 = vld [vmem:[#allocation8 + $0x380] sm:$0xff] }
 0x13e   :  { %2067 = vmatprep.subr.bf16.mxu0 %v2391_v8  ;;  %2036 = vmatprep.subr.bf16.mxu1 %v2477_v53  ;;  %v2469_v0 = vcombine.high %v347_v60, %v351_v61  ;;  %v2468_v2 = vcombine.low %v347_v60, %v351_v61  ;;  %v339_v6 = vld [vmem:[#allocation8 + $0x340] sm:$0xff]  ;;  %v340_v8 = vld [vmem:[#allocation8 + $0x348] sm:$0xff]  ;;  %v2903_v61 = vld [vmem:[#allocation8 + $0x1d0] sm:$0xff] }
 0x13f   :  { %2037 = vmatpush2.bf16.msra.mxu1 %v2476_v56  ;;  %v2461_v9 = vcombine.high %v339_v6, %v343_v7  ;;  %v2460_v11 = vcombine.low %v339_v6, %v343_v7  ;;  %v2462_v12 = vcombine.low %v340_v8, %v344_v10  ;;  %v2463_v13 = vcombine.high %v340_v8, %v344_v10  ;;  %v303_v50 = vld [vmem:[#allocation8 + $0x220] sm:$0xff]  ;;  %v304_v53 = vld [vmem:[#allocation8 + $0x228] sm:$0xff] }
 0x140   :  { %2038 = vmatprep.subr.bf16.mxu1 %v2469_v0  ;;  %v2421_v56 = vcombine.high %v299_v49, %v303_v50  ;;  %v2422_v60 = vcombine.low %v300_v51, %v304_v53  ;;  %v2417_v0 = vcombine.high %v2903_v61, %v2905_v62  ;;  %v90_v7 = vld [vmem:[%s2967_s2] sm:$0x3] }
 0x141   :  { %2068 = vmatpush1.bf16.msra.mxu0 %v2390_v14  ;;  %v331_v14 = vld [vmem:[#allocation8 + $0x300] sm:$0xff] }
 0x142   :  { %2069 = vmatprep.subr.bf16.mxu0 %v2383_v16  ;;  %v332_v16 = vld [vmem:[#allocation8 + $0x308] sm:$0xff]  ;;  %v2452_v17 = vcombine.low %v331_v14, %v335_v15  ;;  %v2453_v18 = vcombine.high %v331_v14, %v335_v15 }
 0x143   :  { %2039 = vmatpush2.bf16.msra.mxu1 %v2468_v2  ;;  %v2455_v24 = vcombine.high %v332_v16, %v336_v19  ;;  %v2416_v2 = vcombine.low %v2903_v61, %v2905_v62 }
 0x144   :  { %2040 = vmatprep.subr.bf16.mxu1 %v2461_v9 }
 0x145   :  { %2070 = vmatpush1.bf16.msra.mxu0 %v2382_v23  ;;  %v2454_v23 = vcombine.low %v332_v16, %v336_v19 }
 0x146   :  { %2071 = vmatprep.subr.bf16.mxu0 %v2375_v25  ;;  %v2445_v25 = vcombine.high %v323_v20, %v327_v22 }
 0x147   :  { %2041 = vmatpush2.bf16.msra.mxu1 %v2460_v11 }
 0x148   :  { %2042 = vmatprep.subr.bf16.mxu1 %v2453_v18 }
 0x149   :  { %2072 = vmatpush1.bf16.msra.mxu0 %v2374_v31  ;;  %v316_v31 = vld [vmem:[#allocation8 + $0x288] sm:$0xff] }
 0x14a   :  { %2073 = vmatprep.subr.bf16.mxu0 %v2367_v33  ;;  %v2444_v33 = vcombine.low %v323_v20, %v327_v22  ;;  %v2439_v37 = vcombine.high %v316_v31, %v320_v32 }
 0x14b   :  { %2043 = vmatpush2.bf16.msra.mxu1 %v2452_v17 }
 0x14c   :  { %2044 = vmatprep.subr.bf16.mxu1 %v2445_v25 }
 0x14d   :  { %2074 = vmatpush1.bf16.msra.mxu0 %v2366_v35  ;;  %v2437_v35 = vcombine.high %v315_v28, %v319_v30 }
 0x14e   :  { %2075 = vmatprep.subr.bf16.mxu0 %v2359_v47  ;;  %v2429_v47 = vcombine.high %v307_v38, %v311_v41 }
 0x14f   :  { %2045 = vmatpush2.bf16.msra.mxu1 %v2444_v33 }
 0x150   :  { %2046 = vmatprep.subr.bf16.mxu1 %v2437_v35 }
 0x151   :  { %2076 = vmatpush1.bf16.msra.mxu0 %v2358_v46  ;;  %v2438_v46 = vcombine.low %v316_v31, %v320_v32 }
 0x152   :  { %2077 = vmatprep.subr.bf16.mxu0 %v2479_v58  ;;  %v2420_v58 = vcombine.low %v299_v49, %v303_v50 }
 0x153   :  { %2047 = vmatpush2.bf16.msra.mxu1 %v2436_v45  ;;  %v285_v45 = vld [vmem:[#allocation8 + $0x190] sm:$0xff] }
 0x154   :  { %2048 = vmatprep.subr.bf16.mxu1 %v2429_v47  ;;  %v286_v47 = vld [vmem:[#allocation8 + $0x198] sm:$0xff] }
 0x155   :  { %2078 = vmatpush2.bf16.msra.mxu0 %v2478_v57  ;;  %v2423_v57 = vcombine.high %v300_v51, %v304_v53  ;;  %v277_v51 = vld [vmem:[#allocation8 + $0x150] sm:$0xff] }
 0x156   :  { %2079 = vmatprep.subr.bf16.mxu0 %v2471_v4 }
 0x157   :  { %2049 = vmatpush2.bf16.msra.mxu1 %v2428_v54 }
 0x158   :  { %2050 = vmatprep.subr.bf16.mxu1 %v2421_v56  ;;  %v278_v56 = vld [vmem:[#allocation8 + $0x158] sm:$0xff] }
 0x159   :  { %2080 = vmatpush2.bf16.msra.mxu0 %v2470_v3 }
 0x15a   :  { %2081 = vmatprep.subr.bf16.mxu0 %v2463_v13 }
 0x15b   :  { %2051 = vmatpush2.bf16.msra.mxu1 %v2420_v58 }
 0x15c   :  { %2102 = vmatprep.subr.bf16.mxu1 %v2417_v0 }
 0x15d   :  { %2082 = vmatpush2.bf16.msra.mxu0 %v2462_v12 }
 0x15e   :  { %2083 = vmatprep.subr.bf16.mxu0 %v2455_v24 }
 0x161   :  { %2084 = vmatpush2.bf16.msra.mxu0 %v2454_v23 }
 0x162   :  { %2085 = vmatprep.subr.bf16.mxu0 %v2447_v29 }
 0x165   :  { %2086 = vmatpush2.bf16.msra.mxu0 %v2446_v34 }
 0x166   :  { %2087 = vmatprep.subr.bf16.mxu0 %v2439_v37 }
 0x169   :  { %2088 = vmatpush2.bf16.msra.mxu0 %v2438_v46  ;;  %v289_v46 = vld [vmem:[#allocation8 + $0x1b0] sm:$0xff] }
 0x16a   :  { %v2409_v53 = vcombine.high %v285_v45, %v289_v46  ;;  %v2408_v58 = vcombine.low %v285_v45, %v289_v46 }
 0x174   :  { %v2895_v36 = vpop.f32.mrf.mxu0 }
 0x176   :  { %v2897_v44 = vpop.f32.mrf.mxu0  ;;  %v2899_v52 = vpop.f32.mrf.mxu1 }
 0x178   :  { %v499_v48 = vpop.f32.mrf.mxu0  ;;  %v2901_v59 = vpop.f32.mrf.mxu1 }
 0x179   :  { %v2431_v48 = vcombine.high %v308_v42, %v312_v43 }
 0x17a   :  { %v500_v55 = vpop.f32.mrf.mxu0  ;;  %v1273_v63 = vpop.f32.mrf.mxu1 }
 0x17b   :  { %v2430_v55 = vcombine.low %v308_v42, %v312_v43  ;;  %2089 = vmatprep.subr.bf16.mxu0 %v2431_v48  ;;  %v2907_v63 = vld [vmem:[#allocation8 + $0x1d8] sm:$0xff] }
 0x17c   :  { %v1274_v5 = vpop.f32.mrf.mxu1  ;;  %v2418_v3 = vcombine.low %v2907_v63, %v2911_v1  ;;  %v2419_v4 = vcombine.high %v2907_v63, %v2911_v1  ;;  %v290_v48 = vld [vmem:[#allocation8 + $0x1b8] sm:$0xff] }
 0x17d   :  { %2090 = vmatpush2.bf16.msra.mxu0 %v2430_v55  ;;  %v2920_v5 = vshrl.u32 %v372_v21, 7  ;;  %v2411_v54 = vcombine.high %v286_v47, %v290_v48  ;;  %v281_v55 = vld [vmem:[#allocation8 + $0x170] sm:$0xff] }
 0x17e   :  { %2091 = vmatprep.subr.bf16.mxu0 %v2423_v57  ;;  %v282_v57 = vld [vmem:[#allocation8 + $0x178] sm:$0xff]  ;;  %v2401_v0 = vcombine.high %v277_v51, %v281_v55  ;;  %v2400_v61 = vcombine.low %v277_v51, %v281_v55 }
 0x17f   :  { %v505_v6 = vsub.s32 0, %v2920_v5  ;;  %v509_v8 = vsub.s32 1, %v2920_v5  ;;  %v2402_v62 = vcombine.low %v278_v56, %v282_v57  ;;  %v350_v51 = vld [vmem:[#allocation8 + $0x398] sm:$0xff] }
 0x181   :  { %2092 = vmatpush2.bf16.msra.mxu0 %v2422_v60  ;;  %v506_v9 = vrot.slane %v90_v7, %v505_v6  ;;  %v510_v10 = vrot.slane %v90_v7, %v509_v8  ;;  %v2410_v60 = vcombine.low %v286_v47, %v290_v48  ;;  %v269_v7 = vld [vmem:[#allocation8 + $0x110] sm:$0xff] }
 0x182   :  { %2143 = vmatprep.subr.bf16.mxu0 %v2419_v4  ;;  %v2403_v4 = vcombine.high %v278_v56, %v282_v57  ;;  %v349_v48 = vld [vmem:[#allocation8 + $0x390] sm:$0xff] }
 0x183   :  { %v1188_v11 = vadd.f32 %v2891_v39, %v506_v9  ;;  %v1190_v12 = vadd.f32 %v2893_v40, %v510_v10  ;;  %v273_v9 = vld [vmem:[#allocation8 + $0x130] sm:$0xff]  ;;  %v270_v10 = vld [vmem:[#allocation8 + $0x118] sm:$0xff] }
 0x184   :  { %v2393_v63 = vcombine.high %v269_v7, %v273_v9 }
 0x1b4   :  { %v1228_v21 = vpop.f32.mrf.mxu0 }
 0x1b5   :  { %v1229_v13 = vadd.f32 %v1228_v21, %v1188_v11  ;;  %v274_v11 = vld [vmem:[#allocation8 + $0x138] sm:$0xff] }
 0x1b6   :  { %v1230_v14 = vpop.f32.mrf.mxu0  ;;  %v2395_v1 = vcombine.high %v270_v10, %v274_v11  ;;  %v266_v21 = vld [vmem:[#allocation8 + $0xf8] sm:$0xff] }
 0x1b7   :  { %v1231_v15 = vadd.f32 %v1230_v14, %v1190_v12  ;;  %v1270_v16 = vadd.f32 %v2899_v52, %v1229_v13  ;;  %v262_v12 = vld [vmem:[#allocation8 + $0xd8] sm:$0xff]  ;;  %v2392_v13 = vcombine.low %v269_v7, %v273_v9  ;;  %v2394_v14 = vcombine.low %v270_v10, %v274_v11 }
 0x1b8   :  { %v1232_v17 = vpop.f32.mrf.mxu0 }
 0x1b9   :  { %v1272_v18 = vadd.f32 %v2901_v59, %v1231_v15  ;;  %v253_v17 = vld [vmem:[#allocation8 + $0x90] sm:$0xff] }
 0x1ba   :  { %v1233_v19 = vpop.f32.mrf.mxu0 }
 0x1bb   :  { %v254_v19 = vld [vmem:[#allocation8 + $0x98] sm:$0xff] }
 0x1f4   :  { %v1310_v20 = vpop.f32.mrf.mxu0 }
 0x1f5   :  { %v1311_v22 = vadd.f32 %v1310_v20, %v1270_v16  ;;  %v2387_v16 = vcombine.high %v262_v12, %v266_v21  ;;  %v258_v20 = vld [vmem:[#allocation8 + $0xb8] sm:$0xff] }
 0x1f6   :  { %v1312_v23 = vpop.f32.mrf.mxu0 }
 0x1f7   :  { %v1317_v24 = vadd.f32 %v1311_v22, %v2895_v36  ;;  %v1313_v25 = vadd.f32 %v1312_v23, %v1272_v18  ;;  %v257_v18 = vld [vmem:[#allocation8 + $0xb0] sm:$0xff]  ;;  %v2386_v23 = vcombine.low %v262_v12, %v266_v21 }
 0x1f8   :  { %v1314_v26 = vpop.f32.mrf.mxu0 }
 0x1f9   :  { %v1319_v39 = vmul.f32 %v1317_v24, %v1317_v24  ;;  %v1318_v40 = vadd.f32 %v1313_v25, %v2897_v44  ;;  %v2379_v25 = vcombine.high %v254_v19, %v258_v20  ;;  %v245_v26 = vld [vmem:[#allocation8 + $0x50] sm:$0xff] }
 0x1fa   :  { %v1315_v27 = vpop.f32.mrf.mxu0 }
 0x1fb   :  { %v1321_v28 = vmul.f32 %v1319_v39, %v1317_v24  ;;  %v1320_v29 = vmul.f32 %v1318_v40, %v1318_v40  ;;  %v249_v39 = vld [vmem:[#allocation8 + $0x70] sm:$0xff]  ;;  %v250_v27 = vld [vmem:[#allocation8 + $0x78] sm:$0xff] }
 0x1fd   :  { %v1323_v30 = vmul.f32 0.044715, %v1321_v28  ;;  %v1322_v31 = vmul.f32 %v1320_v29, %v1318_v40  ;;  %v2376_v28 = vcombine.low %v253_v17, %v257_v18  ;;  %v2378_v29 = vcombine.low %v254_v19, %v258_v20 }
 0x1ff   :  { %v1325_v52 = vadd.f32 %v1323_v30, %v1317_v24  ;;  %v1324_v32 = vmul.f32 0.044715, %v1322_v31  ;;  %v2369_v30 = vcombine.high %v245_v26, %v249_v39 }
 0x201   :  { %v1327_v33 = vmul.f32 0.7978846, %v1325_v52  ;;  %v1326_v59 = vadd.f32 %v1324_v32, %v1318_v40  ;;  %v237_v52 = vld [vmem:[#allocation8 + $0x10] sm:$0xff] }
 0x202   :  { %v241_v32 = vld [vmem:[#allocation8 + $0x30] sm:$0xff] }
 0x203   :  { %2712 = vtanh.f32 %v1327_v33  ;;  %v1328_v34 = vmul.f32 0.7978846, %v1326_v59  ;;  %v238_v33 = vld [vmem:[#allocation8 + $0x18] sm:$0xff] }
 0x204   :  { %v242_v59 = vld [vmem:[#allocation8 + $0x38] sm:$0xff] }
 0x205   :  { %2714 = vtanh.f32 %v1328_v34  ;;  %v2368_v34 = vcombine.low %v245_v26, %v249_v39  ;;  %v2362_v45 = vcombine.low %v238_v33, %v242_v59 }
 0x210   :  { %v2713_v35 = vpop.eup %2712 }
 0x211   :  { %v1331_v37 = vadd.f32 1.0, %v2713_v35 }
 0x212   :  { %v2715_v36 = vpop.eup %2714 }
 0x213   :  { %v1332_v38 = vadd.f32 1.0, %v2715_v36  ;;  %v1333_v41 = vmul.f32 0.5, %v1331_v37  ;;  %v2361_v37 = vcombine.high %v237_v52, %v241_v32  ;;  %v2363_v36 = vcombine.high %v238_v33, %v242_v59 }
 0x215   :  { %v1334_v42 = vmul.f32 0.5, %v1332_v38  ;;  %v1335_v43 = vmul.f32 %v1333_v41, %v1317_v24  ;;  %v2377_v24 = vcombine.high %v253_v17, %v257_v18  ;;  %v357_v38 = vld [vmem:[#allocation8 + $0x3d0] sm:$0xff] }
 0x216   :  { %v361_v41 = vld [vmem:[#allocation8 + $0x3f0] sm:$0xff] }
 0x217   :  { %v1336_v44 = vmul.f32 %v1334_v42, %v1318_v40  ;;  %v2937_v50 = vpack.c.bf16 %v1335_v43, %v1335_v43  ;;  %v246_v40 = vld [vmem:[#allocation8 + $0x58] sm:$0xff]  ;;  %v2481_v46 = vcombine.high %v357_v38, %v361_v41 }
 0x218   :  { %v2371_v31 = vcombine.high %v246_v40, %v250_v27  ;;  %v2370_v35 = vcombine.low %v246_v40, %v250_v27  ;;  %v358_v42 = vld [vmem:[#allocation8 + $0x3d8] sm:$0xff] }
 0x219   :  { %v1338_v49 = vpack.c.bf16 %v1336_v44, %v1336_v44  ;;  %v362_v43 = vld [vmem:[#allocation8 + $0x3f8] sm:$0xff]  ;;  %v2360_v44 = vcombine.low %v237_v52, %v241_v32 }
 0x21a   :  { %v2483_v47 = vcombine.high %v358_v42, %v362_v43  ;;  %v2482_v55 = vcombine.low %v358_v42, %v362_v43 }
 0x21b   :  { %2052 = vmatprep.mubr.bf16.mxu1 %v1338_v49  ;;  %2093 = vmatprep.mubr.bf16.mxu0 %v1338_v49 }
 0x21c   :  { %2053 = vmatmul.mubr.bf16.vlgmr.msra.gmra.mxu1 %v2937_v50  ;;  %2094 = vmatmul.mubr.bf16.vlgmr.msra.gmra.mxu0 %v2937_v50 }
 0x21d   :  { %2103 = vmatpush1.bf16.msra.mxu1 %v2416_v2  ;;  %2144 = vmatpush1.bf16.msra.mxu0 %v2418_v3  ;;  %v261_v2 = vld [vmem:[#allocation8 + $0xd0] sm:$0xff] }
 0x21e   :  { %2134 = vmatprep.mubr.bf16.mxu1 %v1338_v49  ;;  %2175 = vmatprep.mubr.bf16.mxu0 %v1338_v49  ;;  %v265_v3 = vld [vmem:[#allocation8 + $0xf0] sm:$0xff] }
 0x21f   :  { %2104 = vmatprep.subr.bf16.mxu1 %v2409_v53  ;;  %2145 = vmatprep.subr.bf16.mxu0 %v2411_v54  ;;  %v2385_v15 = vcombine.high %v261_v2, %v265_v3  ;;  %v2384_v22 = vcombine.low %v261_v2, %v265_v3  ;;  %v353_v49 = vld [vmem:[#allocation8 + $0x3b0] sm:$0xff]  ;;  %v354_v53 = vld [vmem:[#allocation8 + $0x3b8] sm:$0xff]  ;;  %v2480_v54 = vcombine.low %v357_v38, %v361_v41 }
 0x220   :  { %v2473_v56 = vcombine.high %v349_v48, %v353_v49  ;;  %v2475_v57 = vcombine.high %v350_v51, %v354_v53  ;;  %v2472_v7 = vcombine.low %v349_v48, %v353_v49  ;;  %v2474_v9 = vcombine.low %v350_v51, %v354_v53 }
 0x221   :  { %2105 = vmatpush1.bf16.msra.mxu1 %v2408_v58  ;;  %2146 = vmatpush1.bf16.msra.mxu0 %v2410_v60  ;;  %v341_v58 = vld [vmem:[#allocation8 + $0x350] sm:$0xff]  ;;  %v1354_v48 = vsub.s32 3, %v2920_v5 }
 0x222   :  { %2106 = vmatprep.subr.bf16.mxu1 %v2401_v0  ;;  %2147 = vmatprep.subr.bf16.mxu0 %v2403_v4  ;;  %v345_v60 = vld [vmem:[#allocation8 + $0x370] sm:$0xff]  ;;  %v342_v0 = vld [vmem:[#allocation8 + $0x358] sm:$0xff] }
 0x223   :  { %v346_v4 = vld [vmem:[#allocation8 + $0x378] sm:$0xff]  ;;  %v2465_v10 = vcombine.high %v341_v58, %v345_v60  ;;  %v2464_v2 = vcombine.low %v341_v58, %v345_v60 }
 0x224   :  { %v2467_v11 = vcombine.high %v342_v0, %v346_v4  ;;  %v2466_v3 = vcombine.low %v342_v0, %v346_v4 }
 0x225   :  { %2107 = vmatpush1.bf16.msra.mxu1 %v2400_v61  ;;  %2148 = vmatpush1.bf16.msra.mxu0 %v2402_v62  ;;  %v333_v61 = vld [vmem:[#allocation8 + $0x310] sm:$0xff] }
 0x226   :  { %2108 = vmatprep.subr.bf16.mxu1 %v2393_v63  ;;  %2149 = vmatprep.subr.bf16.mxu0 %v2395_v1  ;;  %v337_v62 = vld [vmem:[#allocation8 + $0x330] sm:$0xff]  ;;  %v334_v63 = vld [vmem:[#allocation8 + $0x318] sm:$0xff] }
 0x227   :  { %v338_v1 = vld [vmem:[#allocation8 + $0x338] sm:$0xff]  ;;  %v2457_v12 = vcombine.high %v333_v61, %v337_v62  ;;  %v2456_v17 = vcombine.low %v333_v61, %v337_v62  ;;  %v1362_v61 = vsub.s32 5, %v2920_v5  ;;  %v1370_v62 = vsub.s32 7, %v2920_v5 }
 0x228   :  { %v2459_v21 = vcombine.high %v334_v63, %v338_v1  ;;  %v2458_v18 = vcombine.low %v334_v63, %v338_v1 }
 0x229   :  { %2109 = vmatpush1.bf16.msra.mxu1 %v2392_v13  ;;  %2150 = vmatpush1.bf16.msra.mxu0 %v2394_v14  ;;  %v325_v13 = vld [vmem:[#allocation8 + $0x2d0] sm:$0xff] }
 0x22a   :  { %2110 = vmatprep.subr.bf16.mxu1 %v2385_v15  ;;  %2151 = vmatprep.subr.bf16.mxu0 %v2387_v16  ;;  %v329_v14 = vld [vmem:[#allocation8 + $0x2f0] sm:$0xff]  ;;  %v326_v15 = vld [vmem:[#allocation8 + $0x2d8] sm:$0xff] }
 0x22b   :  { %v330_v16 = vld [vmem:[#allocation8 + $0x2f8] sm:$0xff]  ;;  %v2449_v19 = vcombine.high %v325_v13, %v329_v14  ;;  %v2448_v26 = vcombine.low %v325_v13, %v329_v14 }
 0x22c   :  { %v2451_v20 = vcombine.high %v326_v15, %v330_v16  ;;  %v2450_v39 = vcombine.low %v326_v15, %v330_v16 }
 0x22d   :  { %2111 = vmatpush1.bf16.msra.mxu1 %v2384_v22  ;;  %2152 = vmatpush1.bf16.msra.mxu0 %v2386_v23  ;;  %v317_v22 = vld [vmem:[#allocation8 + $0x290] sm:$0xff] }
 0x22e   :  { %2112 = vmatprep.subr.bf16.mxu1 %v2377_v24  ;;  %2153 = vmatprep.subr.bf16.mxu0 %v2379_v25  ;;  %v321_v23 = vld [vmem:[#allocation8 + $0x2b0] sm:$0xff]  ;;  %v318_v24 = vld [vmem:[#allocation8 + $0x298] sm:$0xff] }
 0x22f   :  { %v322_v25 = vld [vmem:[#allocation8 + $0x2b8] sm:$0xff]  ;;  %v2441_v40 = vcombine.high %v317_v22, %v321_v23  ;;  %v2440_v52 = vcombine.low %v317_v22, %v321_v23 }
 0x230   :  { %v2443_v27 = vcombine.high %v318_v24, %v322_v25  ;;  %v2442_v32 = vcombine.low %v318_v24, %v322_v25 }
 0x231   :  { %2113 = vmatpush1.bf16.msra.mxu1 %v2376_v28  ;;  %2154 = vmatpush1.bf16.msra.mxu0 %v2378_v29  ;;  %v309_v28 = vld [vmem:[#allocation8 + $0x250] sm:$0xff] }
 0x232   :  { %2114 = vmatprep.subr.bf16.mxu1 %v2369_v30  ;;  %2155 = vmatprep.subr.bf16.mxu0 %v2371_v31  ;;  %v313_v29 = vld [vmem:[#allocation8 + $0x270] sm:$0xff]  ;;  %v310_v30 = vld [vmem:[#allocation8 + $0x258] sm:$0xff] }
 0x233   :  { %v314_v31 = vld [vmem:[#allocation8 + $0x278] sm:$0xff]  ;;  %v2433_v33 = vcombine.high %v309_v28, %v313_v29  ;;  %v2432_v38 = vcombine.low %v309_v28, %v313_v29 }
 0x234   :  { %v2435_v59 = vcombine.high %v310_v30, %v314_v31  ;;  %v2434_v41 = vcombine.low %v310_v30, %v314_v31 }
 0x235   :  { %2115 = vmatpush1.bf16.msra.mxu1 %v2368_v34  ;;  %2156 = vmatpush1.bf16.msra.mxu0 %v2370_v35  ;;  %v301_v34 = vld [vmem:[#allocation8 + $0x210] sm:$0xff] }
 0x236   :  { %2116 = vmatprep.subr.bf16.mxu1 %v2361_v37  ;;  %2157 = vmatprep.subr.bf16.mxu0 %v2363_v36  ;;  %v305_v35 = vld [vmem:[#allocation8 + $0x230] sm:$0xff]  ;;  %v302_v37 = vld [vmem:[#allocation8 + $0x218] sm:$0xff] }
 0x237   :  { %v306_v36 = vld [vmem:[#allocation8 + $0x238] sm:$0xff]  ;;  %v2425_v42 = vcombine.high %v301_v34, %v305_v35 }
 0x238   :  { %v2427_v43 = vcombine.high %v302_v37, %v306_v36 }
 0x239   :  { %2117 = vmatpush1.bf16.msra.mxu1 %v2360_v44  ;;  %2158 = vmatpush1.bf16.msra.mxu0 %v2362_v45  ;;  %v2424_v44 = vcombine.low %v301_v34, %v305_v35  ;;  %v2426_v45 = vcombine.low %v302_v37, %v306_v36 }
 0x23a   :  { %2118 = vmatprep.subr.bf16.mxu1 %v2481_v46  ;;  %2159 = vmatprep.subr.bf16.mxu0 %v2483_v47  ;;  %v1350_v46 = vsub.s32 2, %v2920_v5  ;;  %v363_v47 = vld [vmem:[%s2971_s6] sm:$0xff]  ;;  %s2834_s6 = smov [#allocation10]  }
 0x23b   :  { %v1343_v49 = vrot.slane %v363_v47, %v505_v6  ;;  %v1347_v53 = vrot.slane %v363_v47, %v509_v8  ;;  %v1366_v8 = vsub.s32 6, %v2920_v5  ;;  %s2198_s25 = sshll.u32 %s2834_s6, 4  ;;  %s2199_s25 = int_to_ptr.vmem [resolvable:$true] %s2198_s25 }
 0x23c   :  { %v1351_v51 = vrot.slane %v363_v47, %v1350_v46  ;;  %s2796_s26 = scalar_lea.vmem %s2199_s25, 1024  ;;  %p2801_p7 = scmp.lt.s32.totalorder %s2199_s25, %s2199_s25 }
 0x23d   :  { %2119 = vmatpush2.bf16.msra.mxu1 %v2480_v54  ;;  %2160 = vmatpush2.bf16.msra.mxu0 %v2482_v55  ;;  %v1355_v54 = vrot.slane %v363_v47, %v1354_v48  ;;  %v1367_v1 = vrot.slane %v363_v47, %v1366_v8  ;;  %p2797_p6 = scmp.ne.s32.totalorder %s2199_s25, %s2796_s26  ;;  %p2802_p8 = scmp.lt.s32.totalorder %s2796_s26, %s2796_s26 }
 0x23e   :  { %2120 = vmatprep.subr.bf16.mxu1 %v2473_v56  ;;  %2161 = vmatprep.subr.bf16.mxu0 %v2475_v57 }
 0x23f   :  { %p2803_p9 = por %p2802_p8, %p2801_p7 }
 0x241   :  { %2121 = vmatpush2.bf16.msra.mxu1 %v2472_v7  ;;  %2162 = vmatpush2.bf16.msra.mxu0 %v2474_v9  ;;  %p2804_p10 = pnand %p2803_p9, %p2797_p6 }
 0x242   :  { %2122 = vmatprep.subr.bf16.mxu1 %v2465_v10  ;;  %2163 = vmatprep.subr.bf16.mxu0 %v2467_v11  ;;  %v1358_v11 = vsub.s32 4, %v2920_v5 }
 0x244   :  { %v1359_v63 = vrot.slane %v363_v47, %v1358_v11 }
 0x245   :  { %2123 = vmatpush2.bf16.msra.mxu1 %v2464_v2  ;;  %2164 = vmatpush2.bf16.msra.mxu0 %v2466_v3  ;;  %v1363_v2 = vrot.slane %v363_v47, %v1362_v61  ;;  %v1371_v3 = vrot.slane %v363_v47, %v1370_v62 }
 0x246   :  { %2124 = vmatprep.subr.bf16.mxu1 %v2457_v12  ;;  %2165 = vmatprep.subr.bf16.mxu0 %v2459_v21 }
 0x249   :  { %2125 = vmatpush2.bf16.msra.mxu1 %v2456_v17  ;;  %2166 = vmatpush2.bf16.msra.mxu0 %v2458_v18 }
 0x24a   :  { %2126 = vmatprep.subr.bf16.mxu1 %v2449_v19  ;;  %2167 = vmatprep.subr.bf16.mxu0 %v2451_v20 }
 0x24d   :  { %2127 = vmatpush2.bf16.msra.mxu1 %v2448_v26  ;;  %2168 = vmatpush2.bf16.msra.mxu0 %v2450_v39 }
 0x24e   :  { %2128 = vmatprep.subr.bf16.mxu1 %v2441_v40  ;;  %2169 = vmatprep.subr.bf16.mxu0 %v2443_v27 }
 0x251   :  { %2129 = vmatpush2.bf16.msra.mxu1 %v2440_v52  ;;  %2170 = vmatpush2.bf16.msra.mxu0 %v2442_v32 }
 0x252   :  { %2130 = vmatprep.subr.bf16.mxu1 %v2433_v33  ;;  %2171 = vmatprep.subr.bf16.mxu0 %v2435_v59 }
 0x255   :  { %2131 = vmatpush2.bf16.msra.mxu1 %v2432_v38  ;;  %2172 = vmatpush2.bf16.msra.mxu0 %v2434_v41 }
 0x256   :  { %2132 = vmatprep.subr.bf16.mxu1 %v2425_v42  ;;  %2173 = vmatprep.subr.bf16.mxu0 %v2427_v43 }
 0x259   :  { %2133 = vmatpush2.bf16.msra.mxu1 %v2424_v44  ;;  %2174 = vmatpush2.bf16.msra.mxu0 %v2426_v45 }
 0x25c   :  { %2135 = vmatmul.mubr.bf16.vlgmr.msra.gmra.mxu1 %v2937_v50  ;;  %2176 = vmatmul.mubr.bf16.vlgmr.msra.gmra.mxu0 %v2937_v50 }
 0x2dc   :  { %v2054_v55 = vpop.f32.mrf.mxu1  ;;  %v2095_v56 = vpop.f32.mrf.mxu0 }
 0x2dd   :  { %v2055_v57 = vadd.f32 %v2054_v55, %v1343_v49  ;;  %v2096_v50 = vadd.f32 %v2095_v56, %v1351_v51 }
 0x2de   :  { %v2056_v58 = vpop.f32.mrf.mxu1  ;;  %v2097_v60 = vpop.f32.mrf.mxu0 }
 0x2df   :  { %2184 = vst [vmem:[#allocation10] sm:$0xff] %v2055_v57  ;;  %2186 = vst [vmem:[#allocation10 + $0x10] sm:$0xff] %v2096_v50  ;;  %v2057_v0 = vadd.f32 %v2056_v58, %v1347_v53  ;;  %v2098_v4 = vadd.f32 %v2097_v60, %v1355_v54 }
 0x2e0   :  { %v2058_v7 = vpop.f32.mrf.mxu1  ;;  %v2099_v9 = vpop.f32.mrf.mxu0 }
 0x2e1   :  { %2185 = vst [vmem:[#allocation10 + $0x8] sm:$0xff] %v2057_v0  ;;  %2187 = vst [vmem:[#allocation10 + $0x18] sm:$0xff] %v2098_v4 }
 0x2e2   :  { %v2059_v6 = vpop.f32.mrf.mxu1  ;;  %v2100_v10 = vpop.f32.mrf.mxu0 }
 0x31c   :  { %v2136_v12 = vpop.f32.mrf.mxu1  ;;  %v2177_v21 = vpop.f32.mrf.mxu0 }
 0x31d   :  { %v2137_v13 = vadd.f32 %v2136_v12, %v1359_v63  ;;  %v2178_v14 = vadd.f32 %v2177_v21, %v1367_v1 }
 0x31e   :  { %v2138_v15 = vpop.f32.mrf.mxu1  ;;  %v2179_v16 = vpop.f32.mrf.mxu0 }
 0x31f   :  { %2188 = vst [vmem:[#allocation10 + $0x20] sm:$0xff] %v2137_v13  ;;  %2190 = vst [vmem:[#allocation10 + $0x30] sm:$0xff] %v2178_v14  ;;  %v2139_v17 = vadd.f32 %v2138_v15, %v1363_v2  ;;  %v2180_v18 = vadd.f32 %v2179_v16, %v1371_v3 }
 0x320   :  { %v2140_v19 = vpop.f32.mrf.mxu1  ;;  %v2181_v20 = vpop.f32.mrf.mxu0 }
 0x321   :  { %2189 = vst [vmem:[#allocation10 + $0x28] sm:$0xff] %v2139_v17  ;;  %2191 = vst [vmem:[#allocation10 + $0x38] sm:$0xff] %v2180_v18 }
 0x322   :  { %v2141_v5 = vpop.f32.mrf.mxu1  ;;  %v2182_v22 = vpop.f32.mrf.mxu0 }
 0x323   :  { %2807 = shalt.err (!%p2804_p10)
}
 0x324   :  { %2201 = dma.vmem_to_hbm [thread:$0]  %s2199_s25, 1024, %s2972_s7, [#allocation4]  }
 0x325   :  { %2822 = dma.done.wait [#allocation4], 1024  }
 0x326   :  { %2823 = vsyncadd [#allocation4], 4294966272 }
 0x327   :  { %2205 = vsyncpa [#allocation3], 1 }
 0x328   :  { %2206 = vsyncpa [#allocation6], 1 }
 0x329   :  { %2207 = vsyncpa [#allocation9], 1 }
 0x32a   :  { %2208 = vsyncpa [#allocation4], 1 }

// kernel: tpu_custom_call.1
= control target key start
LH: loop header
LB: loop body
LE: loop exit
PB: predicated region body
PF: predicated region fallthrough
CT: control target
= control target key end

     0   :  { %12 = vsyncpa [#allocation3], 0  ;;  %s2965_s0 = inlined_call_operand.hbm [shape: f32[8,1024], index: 0, kind: input, shape index: {}]   ;;  %s2966_s1 = inlined_call_operand.vmem [shape: s32[8,1], index: 1, kind: input, shape index: {}]   ;;  %s2967_s2 = inlined_call_operand.vmem [shape: f32[1,256], index: 2, kind: input, shape index: {}]   ;;  %s2968_s3 = inlined_call_operand.hbm [shape: bf16[1024,256], index: 3, kind: input, shape index: {}]   ;;  %s2969_s4 = inlined_call_operand.hbm [shape: bf16[128,256], index: 4, kind: input, shape index: {}]   ;;  %s2970_s5 = inlined_call_operand.hbm [shape: bf16[256,1024], index: 5, kind: input, shape index: {}]   ;;  %s2971_s6 = inlined_call_operand.vmem [shape: f32[1,1024], index: 6, kind: input, shape index: {}]   ;;  %s2972_s7 = inlined_call_operand.hbm [shape: f32[8,1024], index: 7, kind: output, shape index: {}]  }
   0x1   :  { %13 = vsyncpa [#allocation6], 0 }
   0x2   :  { %14 = vsyncpa [#allocation9], 0 }
   0x3   :  { %15 = vsyncpa [#allocation4], 0  ;;  %s2824_s24 = smov [#allocation5]  }
   0x4   :  { %s35_s25 = sshll.u32 %s2824_s24, 4  ;;  %s36_s25 = int_to_ptr.vmem [resolvable:$true] %s35_s25 }
   0x5   :  { %s2724_s26 = scalar_lea.vmem %s36_s25, 16384  ;;  %p2729_p1 = scmp.lt.s32.totalorder %s36_s25, %s36_s25 }
   0x6   :  { %p2725_p0 = scmp.ne.s32.totalorder %s36_s25, %s2724_s26  ;;  %p2730_p2 = scmp.lt.s32.totalorder %s2724_s26, %s2724_s26 }
   0x8   :  { %p2731_p3 = por %p2730_p2, %p2729_p1 }
   0xa   :  { %p2732_p4 = pnand %p2731_p3, %p2725_p0 }
   0xc   :  { %2735 = shalt.err (!%p2732_p4)
}
   0xd   :  { %s2825_s27 = smov 128   ;;  %s2826_s28 = smov 8  }
   0xe   :  { %41 = dma.hbm_to_vmem [thread:$0]  %s2968_s3, 16384, %s36_s25, [#allocation6], %s2825_s27, %s2825_s27, %s2826_s28  }
   0xf   :  { %s2827_s8 = smov [#allocation2]   ;;  %s2828_s10 = smov [#allocation7]  }
  0x10   :  { %s22_s9 = sshll.u32 %s2827_s8, 4  ;;  %s47_s11 = sshll.u32 %s2828_s10, 4  ;;  %s23_s9 = int_to_ptr.vmem [resolvable:$true] %s22_s9  ;;  %s48_s11 = int_to_ptr.vmem [resolvable:$true] %s47_s11 }
  0x11   :  { %s2744_s12 = scalar_lea.vmem %s23_s9, 1024  ;;  %p2749_p6 = scmp.lt.s32.totalorder %s23_s9, %s23_s9 }
  0x12   :  { %p2745_p5 = scmp.ne.s32.totalorder %s23_s9, %s2744_s12  ;;  %p2750_p7 = scmp.lt.s32.totalorder %s2744_s12, %s2744_s12 }
  0x14   :  { %p2751_p8 = por %p2750_p7, %p2749_p6 }
  0x16   :  { %p2752_p9 = pnand %p2751_p8, %p2745_p5 }
  0x18   :  { %2755 = shalt.err (!%p2752_p9)
}
  0x19   :  { %25 = dma.hbm_to_vmem [thread:$0]  %s2965_s0, 1024, %s23_s9, [#allocation3]  }
  0x1a   :  { %s2764_s15 = scalar_lea.vmem %s48_s11, 2048  ;;  %p2769_p11 = scmp.lt.s32.totalorder %s48_s11, %s48_s11 }
  0x1b   :  { %p2765_p10 = scmp.ne.s32.totalorder %s48_s11, %s2764_s15  ;;  %p2770_p12 = scmp.lt.s32.totalorder %s2764_s15, %s2764_s15 }
  0x1d   :  { %p2771_p13 = por %p2770_p12, %p2769_p11 }
  0x1f   :  { %p2772_p0 = pnand %p2771_p13, %p2765_p10 }
  0x21   :  { %2775 = shalt.err (!%p2772_p0)
}
  0x22   :  { %53 = dma.hbm_to_vmem [thread:$0]  %s2969_s4, 2048, %s48_s11, [#allocation6], %s2825_s27, %s2825_s27, %s2826_s28  }
  0x23   :  { %s2829_s17 = smov [#allocation8]  }
  0x24   :  { %s59_s18 = sshll.u32 %s2829_s17, 4  ;;  %s60_s18 = int_to_ptr.vmem [resolvable:$true] %s59_s18 }
  0x25   :  { %s2784_s19 = scalar_lea.vmem %s60_s18, 16384  ;;  %p2789_p2 = scmp.lt.s32.totalorder %s60_s18, %s60_s18 }
  0x26   :  { %p2785_p1 = scmp.ne.s32.totalorder %s60_s18, %s2784_s19  ;;  %p2790_p3 = scmp.lt.s32.totalorder %s2784_s19, %s2784_s19 }
  0x28   :  { %p2791_p4 = por %p2790_p3, %p2789_p2 }
  0x2a   :  { %p2792_p5 = pnand %p2791_p4, %p2785_p1 }
  0x2c   :  { %2795 = shalt.err (!%p2792_p5)
}
  0x2d   :  { %s2830_s0 = smov 512   ;;  %s2831_s20 = smov 32  }
  0x2e   :  { %65 = dma.hbm_to_vmem [thread:$0]  %s2970_s5, 16384, %s60_s18, [#allocation9], %s2830_s0, %s2830_s0, %s2831_s20  }
  0x2f   :  { %2816 = dma.done.wait [#allocation3], 1024  }
  0x30   :  { %2817 = vsyncadd [#allocation3], 4294966272 }
  0x31   :  { %2818 = dma.done.wait [#allocation6], 18432  }
  0x32   :  { %2819 = vsyncadd [#allocation6], 4294948864 }
  0x33   :  { %2820 = dma.done.wait [#allocation9], 16384  }
  0x34   :  { %2821 = vsyncadd [#allocation9], 4294950912  ;;  %v2832_v0 = vmov 0   ;;  %v89_v1 = vld [vmem:[%s2966_s1] sm:$0xff]  ;;  %v2496_v2 = vld [vmem:[#allocation5 + $0x74] ss:$8 sps:$4 sm:$0xff]  }
  0x35   :  { %2495 = vset.pattern.permute.xlu0 %v2832_v0  ;;  %493 = vmatprep.mubr.bf16.mxu0 %v2832_v0  ;;  %v2498_v3 = vld [vmem:[#allocation5 + $0x70] ss:$8 sps:$4 sm:$0xff]   ;;  %v2499_v4 = vld [vmem:[#allocation5 + $0x64] ss:$8 sps:$4 sm:$0xff]   ;;  %v2501_v5 = vld [vmem:[#allocation5 + $0x60] ss:$8 sps:$4 sm:$0xff]  }
  0x36   :  { %375 = vperm.xlu0 %2495, %v89_v1   ;;  %1153 = vmatprep.subr.bf16.mxu1 %v2496_v2  ;;  %v2502_v6 = vld [vmem:[#allocation5 + $0x54] ss:$8 sps:$4 sm:$0xff]   ;;  %v2504_v7 = vld [vmem:[#allocation5 + $0x50] ss:$8 sps:$4 sm:$0xff]   ;;  %v2505_v8 = vld [vmem:[#allocation5 + $0x44] ss:$8 sps:$4 sm:$0xff]  }
  0x37   :  { %1154 = vmatpush1.bf16.msra.mxu1 %v2498_v3  ;;  %v2507_v9 = vld [vmem:[#allocation5 + $0x40] ss:$8 sps:$4 sm:$0xff]   ;;  %v2520_v10 = vld [vmem:[#allocation7 + $0x74] ss:$8 sps:$4 sm:$0xff]   ;;  %v2522_v11 = vld [vmem:[#allocation7 + $0x70] ss:$8 sps:$4 sm:$0xff]  }
  0x38   :  { %1155 = vmatprep.subr.bf16.mxu1 %v2499_v4  ;;  %v2508_v12 = vld [vmem:[#allocation5 + $0x34] ss:$8 sps:$4 sm:$0xff]   ;;  %461 = vmatprep.subr.bf16.mxu0 %v2520_v10  ;;  %v2526_v13 = vld [vmem:[#allocation7 + $0x64] ss:$8 sps:$4 sm:$0xff]   ;;  %v2528_v14 = vld [vmem:[#allocation7 + $0x60] ss:$8 sps:$4 sm:$0xff]  }
  0x39   :  { %462 = vmatpush1.bf16.msra.mxu0 %v2522_v11  ;;  %v2510_v15 = vld [vmem:[#allocation5 + $0x30] ss:$8 sps:$4 sm:$0xff]   ;;  %v2511_v16 = vld [vmem:[#allocation5 + $0x24] ss:$8 sps:$4 sm:$0xff]   ;;  %v2532_v17 = vld [vmem:[#allocation7 + $0x54] ss:$8 sps:$4 sm:$0xff]  }
  0x3a   :  { %463 = vmatprep.subr.bf16.mxu0 %v2526_v13  ;;  %v2534_v18 = vld [vmem:[#allocation7 + $0x50] ss:$8 sps:$4 sm:$0xff]   ;;  %v2538_v19 = vld [vmem:[#allocation7 + $0x44] ss:$8 sps:$4 sm:$0xff]   ;;  %v2513_v20 = vld [vmem:[#allocation5 + $0x20] ss:$8 sps:$4 sm:$0xff]  }
  0x3b   :  { %1156 = vmatpush1.bf16.msra.mxu1 %v2501_v5  ;;  %v2514_v21 = vld [vmem:[#allocation5 + $0x14] ss:$8 sps:$4 sm:$0xff]   ;;  %v2540_v22 = vld [vmem:[#allocation7 + $0x40] ss:$8 sps:$4 sm:$0xff]   ;;  %v2516_v24 = vld [vmem:[#allocation5 + $0x10] ss:$8 sps:$4 sm:$0xff]  }
  0x3c   :  { %1157 = vmatprep.subr.bf16.mxu1 %v2502_v6  ;;  %v2544_v23 = vld [vmem:[#allocation7 + $0x34] ss:$8 sps:$4 sm:$0xff]   ;;  %v2517_v25 = vld [vmem:[#allocation5 + $0x4] ss:$8 sps:$4 sm:$0xff]   ;;  %v2546_v26 = vld [vmem:[#allocation7 + $0x30] ss:$8 sps:$4 sm:$0xff]  }
  0x3d   :  { %464 = vmatpush1.bf16.msra.mxu0 %v2528_v14  ;;  %v2550_v27 = vld [vmem:[#allocation7 + $0x24] ss:$8 sps:$4 sm:$0xff]   ;;  %v2519_v28 = vld [vmem:[#allocation5] ss:$8 sps:$4 sm:$0xff]   ;;  %v2523_v29 = vld [vmem:[#allocation5 + $0xf4] ss:$8 sps:$4 sm:$0xff]  }
  0x3e   :  { %465 = vmatprep.subr.bf16.mxu0 %v2532_v17  ;;  %v2552_v30 = vld [vmem:[#allocation7 + $0x20] ss:$8 sps:$4 sm:$0xff]   ;;  %v2556_v31 = vld [vmem:[#allocation7 + $0x14] ss:$8 sps:$4 sm:$0xff]   ;;  %v2525_v32 = vld [vmem:[#allocation5 + $0xf0] ss:$8 sps:$4 sm:$0xff]  }
  0x3f   :  { %1158 = vmatpush1.bf16.msra.mxu1 %v2504_v7  ;;  %v2529_v33 = vld [vmem:[#allocation5 + $0xe4] ss:$8 sps:$4 sm:$0xff]   ;;  %v2558_v35 = vld [vmem:[#allocation7 + $0x10] ss:$8 sps:$4 sm:$0xff]   ;;  %v2531_v38 = vld [vmem:[#allocation5 + $0xe0] ss:$8 sps:$4 sm:$0xff]  }
  0x40   :  { %1159 = vmatprep.subr.bf16.mxu1 %v2505_v8  ;;  %v82_v34 = vld [vmem:[#allocation2 + $0x8] sm:$0xff]  ;;  %v2535_v39 = vld [vmem:[#allocation5 + $0xd4] ss:$8 sps:$4 sm:$0xff]   ;;  %v2537_v42 = vld [vmem:[#allocation5 + $0xd0] ss:$8 sps:$4 sm:$0xff]  }
  0x41   :  { %466 = vmatpush1.bf16.msra.mxu0 %v2534_v18  ;;  %v365_v36 = vpack.c.bf16 %v82_v34, %v82_v34  ;;  %v2562_v37 = vld [vmem:[#allocation7 + $0x4] ss:$8 sps:$4 sm:$0xff]   ;;  %v2564_v40 = vld [vmem:[#allocation7] ss:$8 sps:$4 sm:$0xff]   ;;  %v2570_v41 = vld [vmem:[#allocation5 + $0x174] ss:$8 sps:$4 sm:$0xff]  }
  0x42   :  { %467 = vmatprep.subr.bf16.mxu0 %v2538_v19  ;;  %v2541_v43 = vld [vmem:[#allocation5 + $0xc4] ss:$8 sps:$4 sm:$0xff]   ;;  %v2543_v44 = vld [vmem:[#allocation5 + $0xc0] ss:$8 sps:$4 sm:$0xff]   ;;  %v2547_v45 = vld [vmem:[#allocation5 + $0xb4] ss:$8 sps:$4 sm:$0xff]  }
  0x43   :  { %1160 = vmatpush1.bf16.msra.mxu1 %v2507_v9  ;;  %1185 = vmatprep.mubr.bf16.mxu1 %v365_v36  ;;  %v2549_v46 = vld [vmem:[#allocation5 + $0xb0] ss:$8 sps:$4 sm:$0xff]   ;;  %v2553_v47 = vld [vmem:[#allocation5 + $0xa4] ss:$8 sps:$4 sm:$0xff]   ;;  %v2555_v48 = vld [vmem:[#allocation5 + $0xa0] ss:$8 sps:$4 sm:$0xff]  }
  0x44   :  { %1161 = vmatprep.subr.bf16.mxu1 %v2508_v12  ;;  %v2559_v49 = vld [vmem:[#allocation5 + $0x94] ss:$8 sps:$4 sm:$0xff]   ;;  %v2561_v50 = vld [vmem:[#allocation5 + $0x90] ss:$8 sps:$4 sm:$0xff]   ;;  %v2565_v51 = vld [vmem:[#allocation5 + $0x84] ss:$8 sps:$4 sm:$0xff]  }
  0x45   :  { %468 = vmatpush1.bf16.msra.mxu0 %v2540_v22  ;;  %v2567_v52 = vld [vmem:[#allocation5 + $0x80] ss:$8 sps:$4 sm:$0xff]   ;;  %v2573_v54 = vld [vmem:[#allocation5 + $0x274] ss:$8 sps:$4 sm:$0xff]   ;;  %v2571_v56 = vld [vmem:[#allocation5 + $0x270] ss:$8 sps:$4 sm:$0xff]  }
  0x46   :  { %469 = vmatprep.subr.bf16.mxu0 %v2544_v23  ;;  %v81_v53 = vld [vmem:[#allocation2] sm:$0xff]  ;;  %v2585_v59 = vld [vmem:[#allocation5 + $0x254] ss:$8 sps:$4 sm:$0xff]   ;;  %v2583_v60 = vld [vmem:[#allocation5 + $0x250] ss:$8 sps:$4 sm:$0xff]  }
  0x47   :  { %1162 = vmatpush1.bf16.msra.mxu1 %v2510_v15  ;;  %v364_v55 = vpack.c.bf16 %v81_v53, %v81_v53  ;;  %v2579_v57 = vld [vmem:[#allocation5 + $0x264] ss:$8 sps:$4 sm:$0xff]   ;;  %v2577_v58 = vld [vmem:[#allocation5 + $0x260] ss:$8 sps:$4 sm:$0xff]   ;;  %v2597_v63 = vld [vmem:[#allocation5 + $0x234] ss:$8 sps:$4 sm:$0xff]  }
  0x48   :  { %1163 = vmatprep.subr.bf16.mxu1 %v2511_v16  ;;  %v2591_v61 = vld [vmem:[#allocation5 + $0x244] ss:$8 sps:$4 sm:$0xff]   ;;  %v2589_v62 = vld [vmem:[#allocation5 + $0x240] ss:$8 sps:$4 sm:$0xff]   ;;  %v2595_v2 = vld [vmem:[#allocation5 + $0x230] ss:$8 sps:$4 sm:$0xff]  }
  0x49   :  { %470 = vmatpush1.bf16.msra.mxu0 %v2546_v26  ;;  %v86_v0 = vld [vmem:[#allocation2 + $0x28] sm:$0xff]  ;;  %v2609_v5 = vld [vmem:[#allocation5 + $0x214] ss:$8 sps:$4 sm:$0xff]   ;;  %v2607_v6 = vld [vmem:[#allocation5 + $0x210] ss:$8 sps:$4 sm:$0xff]  }
  0x4a   :  { %471 = vmatprep.subr.bf16.mxu0 %v2550_v27  ;;  %v369_v1 = vpack.c.bf16 %v86_v0, %v86_v0  ;;  %v2603_v3 = vld [vmem:[#allocation5 + $0x224] ss:$8 sps:$4 sm:$0xff]   ;;  %v2601_v4 = vld [vmem:[#allocation5 + $0x220] ss:$8 sps:$4 sm:$0xff]   ;;  %v2621_v9 = vld [vmem:[#allocation5 + $0x2f4] ss:$8 sps:$4 sm:$0xff]  }
  0x4b   :  { %1164 = vmatpush1.bf16.msra.mxu1 %v2513_v20  ;;  %v2615_v7 = vld [vmem:[#allocation5 + $0x204] ss:$8 sps:$4 sm:$0xff]   ;;  %v2613_v8 = vld [vmem:[#allocation5 + $0x200] ss:$8 sps:$4 sm:$0xff]   ;;  %v2619_v10 = vld [vmem:[#allocation5 + $0x2f0] ss:$8 sps:$4 sm:$0xff]  }
  0x4c   :  { %1165 = vmatprep.subr.bf16.mxu1 %v2514_v21  ;;  %v2627_v11 = vld [vmem:[#allocation5 + $0x2e4] ss:$8 sps:$4 sm:$0xff]   ;;  %v2625_v12 = vld [vmem:[#allocation5 + $0x2e0] ss:$8 sps:$4 sm:$0xff]   ;;  %v2633_v13 = vld [vmem:[#allocation5 + $0x2d4] ss:$8 sps:$4 sm:$0xff]   ;;  %v372_v21 = vlaneseq }
  0x4d   :  { %472 = vmatpush1.bf16.msra.mxu0 %v2552_v30  ;;  %v2631_v14 = vld [vmem:[#allocation5 + $0x2d0] ss:$8 sps:$4 sm:$0xff]   ;;  %v2639_v15 = vld [vmem:[#allocation5 + $0x2c4] ss:$8 sps:$4 sm:$0xff]   ;;  %v2637_v16 = vld [vmem:[#allocation5 + $0x2c0] ss:$8 sps:$4 sm:$0xff]  }
  0x4e   :  { %473 = vmatprep.subr.bf16.mxu0 %v2556_v31  ;;  %v2645_v17 = vld [vmem:[#allocation5 + $0x2b4] ss:$8 sps:$4 sm:$0xff]   ;;  %v2643_v18 = vld [vmem:[#allocation5 + $0x2b0] ss:$8 sps:$4 sm:$0xff]   ;;  %v2651_v19 = vld [vmem:[#allocation5 + $0x2a4] ss:$8 sps:$4 sm:$0xff]  }
  0x4f   :  { %1166 = vmatpush1.bf16.msra.mxu1 %v2516_v24  ;;  %v2649_v20 = vld [vmem:[#allocation5 + $0x2a0] ss:$8 sps:$4 sm:$0xff]   ;;  %v2657_v22 = vld [vmem:[#allocation5 + $0x294] ss:$8 sps:$4 sm:$0xff]   ;;  %v2655_v23 = vld [vmem:[#allocation5 + $0x290] ss:$8 sps:$4 sm:$0xff]  }
  0x50   :  { %1167 = vmatprep.subr.bf16.mxu1 %v2517_v25  ;;  %v373_v24 = vand.u32 127, %v372_v21  ;;  %v2663_v25 = vld [vmem:[#allocation5 + $0x284] ss:$8 sps:$4 sm:$0xff]   ;;  %v84_v26 = vld [vmem:[#allocation2 + $0x18] sm:$0xff]  ;;  %v2661_v31 = vld [vmem:[#allocation5 + $0x280] ss:$8 sps:$4 sm:$0xff]  }
  0x51   :  { %474 = vmatpush1.bf16.msra.mxu0 %v2558_v35  ;;  %v2576_v30 = vld [vmem:[#allocation5 + $0x164] ss:$8 sps:$4 sm:$0xff]   ;;  %v2574_v34 = vld [vmem:[#allocation5 + $0x160] ss:$8 sps:$4 sm:$0xff]   ;;  %v2582_v36 = vld [vmem:[#allocation5 + $0x154] ss:$8 sps:$4 sm:$0xff]  }
  0x52   :  { %475 = vmatprep.subr.bf16.mxu0 %v2562_v37  ;;  %v2580_v37 = vld [vmem:[#allocation5 + $0x150] ss:$8 sps:$4 sm:$0xff]  }
  0x53   :  { %1168 = vmatpush1.bf16.msra.mxu1 %v2519_v28  ;;  %v2568_v28 = vld [vmem:[#allocation5 + $0x170] ss:$8 sps:$4 sm:$0xff]  }
  0x54   :  { %1169 = vmatprep.subr.bf16.mxu1 %v2523_v29  ;;  %v367_v29 = vpack.c.bf16 %v84_v26, %v84_v26  ;;  %v2628_v53 = vld [vmem:[#allocation5 + $0x1d0] ss:$8 sps:$4 sm:$0xff]  }
  0x55   :  { %476 = vmatpush1.bf16.msra.mxu0 %v2564_v40  ;;  %v2594_v40 = vld [vmem:[#allocation5 + $0x134] ss:$8 sps:$4 sm:$0xff]   ;;  %v2694_v26 = vld [vmem:[#allocation5 + $0x3d0] ss:$8 sps:$4 sm:$0xff]  }
  0x56   :  { %1194 = vmatprep.subr.bf16.mxu0 %v2570_v41  ;;  %v2592_v41 = vld [vmem:[#allocation5 + $0x130] ss:$8 sps:$4 sm:$0xff]  }
  0x57   :  { %1170 = vmatpush2.bf16.msra.mxu1 %v2525_v32  ;;  %v85_v32 = vld [vmem:[#allocation2 + $0x20] sm:$0xff]  ;;  %v83_v0 = vld [vmem:[#allocation2 + $0x10] sm:$0xff] }
  0x58   :  { %1171 = vmatprep.subr.bf16.mxu1 %v2529_v33  ;;  %v2833_v33 = vmov 1.0|1.0   ;;  %v368_v35 = vpack.c.bf16 %v85_v32, %v85_v32  ;;  %v2703_v32 = vld [vmem:[#allocation5 + $0x3a0] ss:$8 sps:$4 sm:$0xff]  }
  0x5b   :  { %1172 = vmatpush2.bf16.msra.mxu1 %v2531_v38  ;;  %v2588_v38 = vld [vmem:[#allocation5 + $0x144] ss:$8 sps:$4 sm:$0xff]  }
  0x5c   :  { %1173 = vmatprep.subr.bf16.mxu1 %v2535_v39  ;;  %v2586_v39 = vld [vmem:[#allocation5 + $0x140] ss:$8 sps:$4 sm:$0xff]  }
  0x5f   :  { %1174 = vmatpush2.bf16.msra.mxu1 %v2537_v42  ;;  %v2600_v42 = vld [vmem:[#allocation5 + $0x124] ss:$8 sps:$4 sm:$0xff]  }
  0x60   :  { %1175 = vmatprep.subr.bf16.mxu1 %v2541_v43  ;;  %v2598_v43 = vld [vmem:[#allocation5 + $0x120] ss:$8 sps:$4 sm:$0xff]  }
  0x63   :  { %1176 = vmatpush2.bf16.msra.mxu1 %v2543_v44  ;;  %v2606_v44 = vld [vmem:[#allocation5 + $0x114] ss:$8 sps:$4 sm:$0xff]  }
  0x64   :  { %1177 = vmatprep.subr.bf16.mxu1 %v2547_v45  ;;  %v2604_v45 = vld [vmem:[#allocation5 + $0x110] ss:$8 sps:$4 sm:$0xff]  }
  0x67   :  { %1178 = vmatpush2.bf16.msra.mxu1 %v2549_v46  ;;  %v2612_v46 = vld [vmem:[#allocation5 + $0x104] ss:$8 sps:$4 sm:$0xff]  }
  0x68   :  { %1179 = vmatprep.subr.bf16.mxu1 %v2553_v47  ;;  %v2610_v47 = vld [vmem:[#allocation5 + $0x100] ss:$8 sps:$4 sm:$0xff]  }
  0x6b   :  { %1180 = vmatpush2.bf16.msra.mxu1 %v2555_v48  ;;  %v2618_v48 = vld [vmem:[#allocation5 + $0x1f4] ss:$8 sps:$4 sm:$0xff]  }
  0x6c   :  { %1181 = vmatprep.subr.bf16.mxu1 %v2559_v49  ;;  %v2616_v49 = vld [vmem:[#allocation5 + $0x1f0] ss:$8 sps:$4 sm:$0xff]  }
  0x6f   :  { %1182 = vmatpush2.bf16.msra.mxu1 %v2561_v50  ;;  %v2624_v50 = vld [vmem:[#allocation5 + $0x1e4] ss:$8 sps:$4 sm:$0xff]  }
  0x70   :  { %1183 = vmatprep.subr.bf16.mxu1 %v2565_v51  ;;  %v2622_v51 = vld [vmem:[#allocation5 + $0x1e0] ss:$8 sps:$4 sm:$0xff]  }
  0x73   :  { %1184 = vmatpush2.bf16.msra.mxu1 %v2567_v52  ;;  %v2630_v52 = vld [vmem:[#allocation5 + $0x1d4] ss:$8 sps:$4 sm:$0xff]  }
  0x74   :  { %1235 = vmatprep.subr.bf16.mxu1 %v2573_v54  ;;  %v2636_v54 = vld [vmem:[#allocation5 + $0x1c4] ss:$8 sps:$4 sm:$0xff]  }
  0x76   :  { %1186 = vmatmul.mubr.bf16.vlgmr.msra.gmra.mxu1 %v364_v55  ;;  %v2634_v55 = vld [vmem:[#allocation5 + $0x1c0] ss:$8 sps:$4 sm:$0xff]  }
  0x77   :  { %1236 = vmatpush1.bf16.msra.mxu1 %v2571_v56  ;;  %1267 = vmatprep.mubr.bf16.mxu1 %v369_v1  ;;  %v2642_v56 = vld [vmem:[#allocation5 + $0x1b4] ss:$8 sps:$4 sm:$0xff]  }
  0x78   :  { %1237 = vmatprep.subr.bf16.mxu1 %v2579_v57  ;;  %v2640_v57 = vld [vmem:[#allocation5 + $0x1b0] ss:$8 sps:$4 sm:$0xff]   ;;  %v2666_v1 = vld [vmem:[#allocation5 + $0x374] ss:$8 sps:$4 sm:$0xff]  }
  0x7b   :  { %1238 = vmatpush1.bf16.msra.mxu1 %v2577_v58  ;;  %v2648_v58 = vld [vmem:[#allocation5 + $0x1a4] ss:$8 sps:$4 sm:$0xff]  }
  0x7c   :  { %1239 = vmatprep.subr.bf16.mxu1 %v2585_v59  ;;  %v2646_v59 = vld [vmem:[#allocation5 + $0x1a0] ss:$8 sps:$4 sm:$0xff]  }
  0x7f   :  { %1240 = vmatpush1.bf16.msra.mxu1 %v2583_v60  ;;  %v2654_v60 = vld [vmem:[#allocation5 + $0x194] ss:$8 sps:$4 sm:$0xff]  }
  0x80   :  { %1241 = vmatprep.subr.bf16.mxu1 %v2591_v61  ;;  %v2652_v61 = vld [vmem:[#allocation5 + $0x190] ss:$8 sps:$4 sm:$0xff]  }
  0x83   :  { %1242 = vmatpush1.bf16.msra.mxu1 %v2589_v62  ;;  %v2660_v62 = vld [vmem:[#allocation5 + $0x184] ss:$8 sps:$4 sm:$0xff]  }
  0x84   :  { %1243 = vmatprep.subr.bf16.mxu1 %v2597_v63  ;;  %v2658_v63 = vld [vmem:[#allocation5 + $0x180] ss:$8 sps:$4 sm:$0xff]  }
  0x87   :  { %1244 = vmatpush1.bf16.msra.mxu1 %v2595_v2  ;;  %v88_v2 = vld [vmem:[#allocation2 + $0x38] sm:$0xff] }
  0x88   :  { %1245 = vmatprep.subr.bf16.mxu1 %v2603_v3  ;;  %v366_v3 = vpack.c.bf16 %v83_v0, %v83_v0 }
  0x8b   :  { %1246 = vmatpush1.bf16.msra.mxu1 %v2601_v4  ;;  %v2664_v4 = vld [vmem:[#allocation5 + $0x370] ss:$8 sps:$4 sm:$0xff]  }
  0x8c   :  { %1247 = vmatprep.subr.bf16.mxu1 %v2609_v5  ;;  %v371_v5 = vpack.c.bf16 %v88_v2, %v88_v2  ;;  %v271_v2 = vld [vmem:[#allocation8 + $0x120] sm:$0xff] }
  0x8f   :  { %1248 = vmatpush1.bf16.msra.mxu1 %v2607_v6  ;;  %v2669_v6 = vld [vmem:[#allocation5 + $0x364] ss:$8 sps:$4 sm:$0xff]  }
  0x90   :  { %1249 = vmatprep.subr.bf16.mxu1 %v2615_v7  ;;  %v2667_v7 = vld [vmem:[#allocation5 + $0x360] ss:$8 sps:$4 sm:$0xff]  }
  0x93   :  { %1250 = vmatpush1.bf16.msra.mxu1 %v2613_v8  ;;  %v2672_v8 = vld [vmem:[#allocation5 + $0x354] ss:$8 sps:$4 sm:$0xff]  }
  0x94   :  { %1251 = vmatprep.subr.bf16.mxu1 %v2621_v9  ;;  %v2670_v9 = vld [vmem:[#allocation5 + $0x350] ss:$8 sps:$4 sm:$0xff]  }
  0x97   :  { %1252 = vmatpush2.bf16.msra.mxu1 %v2619_v10  ;;  %v2675_v10 = vld [vmem:[#allocation5 + $0x344] ss:$8 sps:$4 sm:$0xff]  }
  0x98   :  { %1253 = vmatprep.subr.bf16.mxu1 %v2627_v11  ;;  %v2673_v11 = vld [vmem:[#allocation5 + $0x340] ss:$8 sps:$4 sm:$0xff]  }
  0x9b   :  { %1254 = vmatpush2.bf16.msra.mxu1 %v2625_v12  ;;  %v2678_v12 = vld [vmem:[#allocation5 + $0x334] ss:$8 sps:$4 sm:$0xff]  }
  0x9c   :  { %1255 = vmatprep.subr.bf16.mxu1 %v2633_v13  ;;  %v2676_v13 = vld [vmem:[#allocation5 + $0x330] ss:$8 sps:$4 sm:$0xff]  }
  0x9f   :  { %1256 = vmatpush2.bf16.msra.mxu1 %v2631_v14  ;;  %v2681_v14 = vld [vmem:[#allocation5 + $0x324] ss:$8 sps:$4 sm:$0xff]  }
  0xa0   :  { %1257 = vmatprep.subr.bf16.mxu1 %v2639_v15  ;;  %v2679_v15 = vld [vmem:[#allocation5 + $0x320] ss:$8 sps:$4 sm:$0xff]  }
  0xa3   :  { %1258 = vmatpush2.bf16.msra.mxu1 %v2637_v16  ;;  %v2684_v16 = vld [vmem:[#allocation5 + $0x314] ss:$8 sps:$4 sm:$0xff]  }
  0xa4   :  { %1259 = vmatprep.subr.bf16.mxu1 %v2645_v17  ;;  %v2682_v17 = vld [vmem:[#allocation5 + $0x310] ss:$8 sps:$4 sm:$0xff]  }
  0xa7   :  { %1260 = vmatpush2.bf16.msra.mxu1 %v2643_v18  ;;  %v2687_v18 = vld [vmem:[#allocation5 + $0x304] ss:$8 sps:$4 sm:$0xff]  }
  0xa8   :  { %1261 = vmatprep.subr.bf16.mxu1 %v2651_v19  ;;  %v2685_v19 = vld [vmem:[#allocation5 + $0x300] ss:$8 sps:$4 sm:$0xff]  }
  0xab   :  { %1262 = vmatpush2.bf16.msra.mxu1 %v2649_v20  ;;  %v2690_v20 = vld [vmem:[#allocation5 + $0x3f4] ss:$8 sps:$4 sm:$0xff]  }
  0xac   :  { %1263 = vmatprep.subr.bf16.mxu1 %v2657_v22  ;;  %v2688_v22 = vld [vmem:[#allocation5 + $0x3f0] ss:$8 sps:$4 sm:$0xff]  }
  0xaf   :  { %1264 = vmatpush2.bf16.msra.mxu1 %v2655_v23  ;;  %v2693_v23 = vld [vmem:[#allocation5 + $0x3e4] ss:$8 sps:$4 sm:$0xff]  }
  0xb0   :  { %1265 = vmatprep.subr.bf16.mxu1 %v2663_v25  ;;  %v2696_v25 = vld [vmem:[#allocation5 + $0x3d4] ss:$8 sps:$4 sm:$0xff]  }
  0xb1   :  { %v376_v27 = vpop.permute.xlu0 %375 }
  0xb2   :  { %vm377_vm0 = vcmp.eq.s32.totalorder %v373_v24, %v376_v27  ;;  %v2691_v24 = vld [vmem:[#allocation5 + $0x3e0] ss:$8 sps:$4 sm:$0xff]   ;;  %v2699_v27 = vld [vmem:[#allocation5 + $0x3c4] ss:$8 sps:$4 sm:$0xff]  }
  0xb3   :  { %vm2226_vm1 = vmpackc.low %vm377_vm0, %vm377_vm0  ;;  %1266 = vmatpush2.bf16.msra.mxu1 %v2661_v31  ;;  %v2705_v31 = vld [vmem:[#allocation5 + $0x3a4] ss:$8 sps:$4 sm:$0xff]  }
  0xb4   :  { %2227 = vmatmul.mubr.msk.bf16.vlgmr.msra.gmra.mxu0 %vm2226_vm1, %v2833_v33  ;;  %v2708_v33 = vld [vmem:[#allocation5 + $0x394] ss:$8 sps:$4 sm:$0xff]  }
  0xb5   :  { %1195 = vmatpush1.bf16.msra.mxu0 %v2568_v28  ;;  %1226 = vmatprep.mubr.bf16.mxu0 %v367_v29  ;;  %v2697_v28 = vld [vmem:[#allocation5 + $0x3c0] ss:$8 sps:$4 sm:$0xff]   ;;  %v2702_v29 = vld [vmem:[#allocation5 + $0x3b4] ss:$8 sps:$4 sm:$0xff]  }
  0xb6   :  { %1196 = vmatprep.subr.bf16.mxu0 %v2576_v30  ;;  %1268 = vmatmul.mubr.bf16.vlgmr.msra.gmra.mxu1 %v368_v35  ;;  %v2700_v30 = vld [vmem:[#allocation5 + $0x3b0] ss:$8 sps:$4 sm:$0xff]   ;;  %v2711_v35 = vld [vmem:[#allocation5 + $0x384] ss:$8 sps:$4 sm:$0xff]  }
  0xb9   :  { %1197 = vmatpush1.bf16.msra.mxu0 %v2574_v34  ;;  %v2706_v34 = vld [vmem:[#allocation5 + $0x390] ss:$8 sps:$4 sm:$0xff]  }
  0xba   :  { %1198 = vmatprep.subr.bf16.mxu0 %v2582_v36  ;;  %v2709_v36 = vld [vmem:[#allocation5 + $0x380] ss:$8 sps:$4 sm:$0xff]  }
  0xbd   :  { %1199 = vmatpush1.bf16.msra.mxu0 %v2580_v37  ;;  %v87_v37 = vld [vmem:[#allocation2 + $0x30] sm:$0xff] }
  0xbe   :  { %1200 = vmatprep.subr.bf16.mxu0 %v2588_v38  ;;  %v370_v38 = vpack.c.bf16 %v87_v37, %v87_v37  ;;  %v235_v37 = vld [vmem:[#allocation8] sm:$0xff] }
  0xc1   :  { %1201 = vmatpush1.bf16.msra.mxu0 %v2586_v39 }
  0xc2   :  { %1202 = vmatprep.subr.bf16.mxu0 %v2594_v40 }
  0xc5   :  { %1203 = vmatpush1.bf16.msra.mxu0 %v2592_v41  ;;  %v291_v41 = vld [vmem:[#allocation8 + $0x1c0] sm:$0xff] }
  0xc6   :  { %1204 = vmatprep.subr.bf16.mxu0 %v2600_v42  ;;  %v295_v42 = vld [vmem:[#allocation8 + $0x1e0] sm:$0xff] }
  0xc9   :  { %1205 = vmatpush1.bf16.msra.mxu0 %v2598_v43  ;;  %v292_v43 = vld [vmem:[#allocation8 + $0x1c8] sm:$0xff] }
  0xca   :  { %1206 = vmatprep.subr.bf16.mxu0 %v2606_v44  ;;  %v2412_v44 = vcombine.low %v291_v41, %v295_v42 }
  0xcd   :  { %1207 = vmatpush1.bf16.msra.mxu0 %v2604_v45  ;;  %v2413_v45 = vcombine.high %v291_v41, %v295_v42  ;;  %v236_v41 = vld [vmem:[#allocation8 + $0x8] sm:$0xff] }
  0xce   :  { %1208 = vmatprep.subr.bf16.mxu0 %v2612_v46  ;;  %v296_v46 = vld [vmem:[#allocation8 + $0x1e8] sm:$0xff] }
  0xcf   :  { %2020 = vmatprep.subr.bf16.mxu1 %v2413_v45 }
  0xd0   :  { %2021 = vmatpush1.bf16.msra.mxu1 %v2412_v44 }
  0xd1   :  { %1209 = vmatpush1.bf16.msra.mxu0 %v2610_v47  ;;  %v283_v47 = vld [vmem:[#allocation8 + $0x180] sm:$0xff] }
  0xd2   :  { %1210 = vmatprep.subr.bf16.mxu0 %v2618_v48  ;;  %v287_v48 = vld [vmem:[#allocation8 + $0x1a0] sm:$0xff] }
  0xd5   :  { %1211 = vmatpush2.bf16.msra.mxu0 %v2616_v49 }
  0xd6   :  { %1212 = vmatprep.subr.bf16.mxu0 %v2624_v50  ;;  %v2414_v50 = vcombine.low %v292_v43, %v296_v46 }
  0xd9   :  { %1213 = vmatpush2.bf16.msra.mxu0 %v2622_v51  ;;  %v2415_v51 = vcombine.high %v292_v43, %v296_v46  ;;  %v240_v43 = vld [vmem:[#allocation8 + $0x28] sm:$0xff] }
  0xda   :  { %1214 = vmatprep.subr.bf16.mxu0 %v2630_v52  ;;  %v2405_v52 = vcombine.high %v283_v47, %v287_v48  ;;  %v2358_v46 = vcombine.low %v236_v41, %v240_v43 }
  0xdc   :  { %2022 = vmatprep.subr.bf16.mxu1 %v2405_v52 }
  0xdd   :  { %1215 = vmatpush2.bf16.msra.mxu0 %v2628_v53  ;;  %v284_v53 = vld [vmem:[#allocation8 + $0x188] sm:$0xff] }
  0xde   :  { %1216 = vmatprep.subr.bf16.mxu0 %v2636_v54  ;;  %v288_v54 = vld [vmem:[#allocation8 + $0x1a8] sm:$0xff] }
  0xe1   :  { %1217 = vmatpush2.bf16.msra.mxu0 %v2634_v55  ;;  %v275_v55 = vld [vmem:[#allocation8 + $0x140] sm:$0xff] }
  0xe2   :  { %1218 = vmatprep.subr.bf16.mxu0 %v2642_v56  ;;  %v2407_v56 = vcombine.high %v284_v53, %v288_v54 }
  0xe5   :  { %1219 = vmatpush2.bf16.msra.mxu0 %v2640_v57  ;;  %v279_v57 = vld [vmem:[#allocation8 + $0x160] sm:$0xff] }
  0xe6   :  { %1220 = vmatprep.subr.bf16.mxu0 %v2648_v58  ;;  %v276_v58 = vld [vmem:[#allocation8 + $0x148] sm:$0xff] }
  0xe9   :  { %1221 = vmatpush2.bf16.msra.mxu0 %v2646_v59  ;;  %v280_v59 = vld [vmem:[#allocation8 + $0x168] sm:$0xff] }
  0xea   :  { %1222 = vmatprep.subr.bf16.mxu0 %v2654_v60  ;;  %v2399_v0 = vcombine.high %v276_v58, %v280_v59 }
  0xed   :  { %1223 = vmatpush2.bf16.msra.mxu0 %v2652_v61  ;;  %v2404_v61 = vcombine.low %v283_v47, %v287_v48  ;;  %v2359_v47 = vcombine.high %v236_v41, %v240_v43  ;;  %v311_v41 = vld [vmem:[#allocation8 + $0x260] sm:$0xff]  ;;  %v312_v43 = vld [vmem:[#allocation8 + $0x268] sm:$0xff] }
  0xee   :  { %1224 = vmatprep.subr.bf16.mxu0 %v2660_v62  ;;  %v2406_v62 = vcombine.low %v284_v53, %v288_v54  ;;  %v360_v54 = vld [vmem:[#allocation8 + $0x3e8] sm:$0xff] }
  0xef   :  { %2023 = vmatpush1.bf16.msra.mxu1 %v2404_v61  ;;  %v351_v61 = vld [vmem:[#allocation8 + $0x3a0] sm:$0xff] }
  0xf1   :  { %1225 = vmatpush2.bf16.msra.mxu0 %v2658_v63  ;;  %v2397_v63 = vcombine.high %v275_v55, %v279_v57 }
  0xf2   :  { %1276 = vmatprep.subr.bf16.mxu0 %v2666_v1  ;;  %v267_v1 = vld [vmem:[#allocation8 + $0x100] sm:$0xff] }
  0xf3   :  { %2024 = vmatprep.subr.bf16.mxu1 %v2397_v63 }
  0xf4   :  { %1227 = vmatmul.mubr.bf16.vlgmr.msra.gmra.mxu0 %v366_v3  ;;  %v268_v3 = vld [vmem:[#allocation8 + $0x108] sm:$0xff] }
  0xf5   :  { %1277 = vmatpush1.bf16.msra.mxu0 %v2664_v4  ;;  %1308 = vmatprep.mubr.bf16.mxu0 %v371_v5  ;;  %v272_v4 = vld [vmem:[#allocation8 + $0x128] sm:$0xff]  ;;  %v2396_v5 = vcombine.low %v275_v55, %v279_v57 }
  0xf6   :  { %1278 = vmatprep.subr.bf16.mxu0 %v2669_v6  ;;  %v2398_v6 = vcombine.low %v276_v58, %v280_v59 }
  0xf7   :  { %2025 = vmatpush1.bf16.msra.mxu1 %v2396_v5 }
  0xf9   :  { %1279 = vmatpush1.bf16.msra.mxu0 %v2667_v7  ;;  %v2389_v7 = vcombine.high %v267_v1, %v271_v2 }
  0xfa   :  { %1280 = vmatprep.subr.bf16.mxu0 %v2672_v8  ;;  %v2391_v8 = vcombine.high %v268_v3, %v272_v4 }
  0xfb   :  { %2026 = vmatprep.subr.bf16.mxu1 %v2389_v7  ;;  %v343_v7 = vld [vmem:[#allocation8 + $0x360] sm:$0xff] }
  0xfd   :  { %1281 = vmatpush1.bf16.msra.mxu0 %v2670_v9  ;;  %v259_v9 = vld [vmem:[#allocation8 + $0xc0] sm:$0xff] }
  0xfe   :  { %1282 = vmatprep.subr.bf16.mxu0 %v2675_v10  ;;  %v263_v10 = vld [vmem:[#allocation8 + $0xe0] sm:$0xff] }
 0x101   :  { %1283 = vmatpush1.bf16.msra.mxu0 %v2673_v11  ;;  %v260_v11 = vld [vmem:[#allocation8 + $0xc8] sm:$0xff] }
 0x102   :  { %1284 = vmatprep.subr.bf16.mxu0 %v2678_v12  ;;  %v264_v12 = vld [vmem:[#allocation8 + $0xe8] sm:$0xff] }
 0x105   :  { %1285 = vmatpush1.bf16.msra.mxu0 %v2676_v13  ;;  %v2388_v13 = vcombine.low %v267_v1, %v271_v2  ;;  %v352_v1 = vld [vmem:[#allocation8 + $0x3a8] sm:$0xff] }
 0x106   :  { %1286 = vmatprep.subr.bf16.mxu0 %v2681_v14  ;;  %v2390_v14 = vcombine.low %v268_v3, %v272_v4 }
 0x107   :  { %2027 = vmatpush1.bf16.msra.mxu1 %v2388_v13 }
 0x109   :  { %1287 = vmatpush1.bf16.msra.mxu0 %v2679_v15  ;;  %v2381_v15 = vcombine.high %v259_v9, %v263_v10 }
 0x10a   :  { %1288 = vmatprep.subr.bf16.mxu0 %v2684_v16  ;;  %v2383_v16 = vcombine.high %v260_v11, %v264_v12 }
 0x10b   :  { %2028 = vmatprep.subr.bf16.mxu1 %v2381_v15  ;;  %v335_v15 = vld [vmem:[#allocation8 + $0x320] sm:$0xff] }
 0x10d   :  { %1289 = vmatpush1.bf16.msra.mxu0 %v2682_v17  ;;  %v251_v17 = vld [vmem:[#allocation8 + $0x80] sm:$0xff] }
 0x10e   :  { %1290 = vmatprep.subr.bf16.mxu0 %v2687_v18  ;;  %v255_v18 = vld [vmem:[#allocation8 + $0xa0] sm:$0xff] }
 0x111   :  { %1291 = vmatpush1.bf16.msra.mxu0 %v2685_v19  ;;  %v252_v19 = vld [vmem:[#allocation8 + $0x88] sm:$0xff] }
 0x112   :  { %1292 = vmatprep.subr.bf16.mxu0 %v2690_v20  ;;  %v256_v20 = vld [vmem:[#allocation8 + $0xa8] sm:$0xff] }
 0x115   :  { %1293 = vmatpush2.bf16.msra.mxu0 %v2688_v22  ;;  %v2380_v22 = vcombine.low %v259_v9, %v263_v10  ;;  %v344_v10 = vld [vmem:[#allocation8 + $0x368] sm:$0xff] }
 0x116   :  { %1294 = vmatprep.subr.bf16.mxu0 %v2693_v23  ;;  %v2382_v23 = vcombine.low %v260_v11, %v264_v12 }
 0x117   :  { %2029 = vmatpush1.bf16.msra.mxu1 %v2380_v22  ;;  %v327_v22 = vld [vmem:[#allocation8 + $0x2e0] sm:$0xff] }
 0x119   :  { %1295 = vmatpush2.bf16.msra.mxu0 %v2691_v24  ;;  %v2373_v24 = vcombine.high %v251_v17, %v255_v18 }
 0x11a   :  { %1296 = vmatprep.subr.bf16.mxu0 %v2696_v25  ;;  %v2375_v25 = vcombine.high %v252_v19, %v256_v20 }
 0x11b   :  { %2030 = vmatprep.subr.bf16.mxu1 %v2373_v24 }
 0x11d   :  { %1297 = vmatpush2.bf16.msra.mxu0 %v2694_v26  ;;  %v243_v26 = vld [vmem:[#allocation8 + $0x40] sm:$0xff] }
 0x11e   :  { %1298 = vmatprep.subr.bf16.mxu0 %v2699_v27  ;;  %v247_v27 = vld [vmem:[#allocation8 + $0x60] sm:$0xff] }
 0x121   :  { %1299 = vmatpush2.bf16.msra.mxu0 %v2697_v28  ;;  %v244_v28 = vld [vmem:[#allocation8 + $0x48] sm:$0xff] }
 0x122   :  { %1300 = vmatprep.subr.bf16.mxu0 %v2702_v29  ;;  %v248_v29 = vld [vmem:[#allocation8 + $0x68] sm:$0xff] }
 0x125   :  { %1301 = vmatpush2.bf16.msra.mxu0 %v2700_v30  ;;  %v2372_v30 = vcombine.low %v251_v17, %v255_v18 }
 0x126   :  { %1302 = vmatprep.subr.bf16.mxu0 %v2705_v31  ;;  %v2374_v31 = vcombine.low %v252_v19, %v256_v20  ;;  %v336_v19 = vld [vmem:[#allocation8 + $0x328] sm:$0xff]  ;;  %v323_v20 = vld [vmem:[#allocation8 + $0x2c0] sm:$0xff] }
 0x127   :  { %2031 = vmatpush1.bf16.msra.mxu1 %v2372_v30  ;;  %v319_v30 = vld [vmem:[#allocation8 + $0x2a0] sm:$0xff] }
 0x129   :  { %1303 = vmatpush2.bf16.msra.mxu0 %v2703_v32  ;;  %v2365_v32 = vcombine.high %v243_v26, %v247_v27 }
 0x12a   :  { %1304 = vmatprep.subr.bf16.mxu0 %v2708_v33  ;;  %v2367_v33 = vcombine.high %v244_v28, %v248_v29 }
 0x12b   :  { %2032 = vmatprep.subr.bf16.mxu1 %v2365_v32  ;;  %v320_v32 = vld [vmem:[#allocation8 + $0x2a8] sm:$0xff] }
 0x12d   :  { %1305 = vmatpush2.bf16.msra.mxu0 %v2706_v34  ;;  %v2364_v34 = vcombine.low %v243_v26, %v247_v27  ;;  %v324_v26 = vld [vmem:[#allocation8 + $0x2c8] sm:$0xff] }
 0x12e   :  { %1306 = vmatprep.subr.bf16.mxu0 %v2711_v35  ;;  %v2366_v35 = vcombine.low %v244_v28, %v248_v29  ;;  %v328_v27 = vld [vmem:[#allocation8 + $0x2e8] sm:$0xff]  ;;  %v315_v28 = vld [vmem:[#allocation8 + $0x280] sm:$0xff] }
 0x12f   :  { %2033 = vmatpush1.bf16.msra.mxu1 %v2364_v34  ;;  %v2447_v29 = vcombine.high %v324_v26, %v328_v27  ;;  %v2446_v34 = vcombine.low %v324_v26, %v328_v27 }
 0x131   :  { %1307 = vmatpush2.bf16.msra.mxu0 %v2709_v36 }
 0x132   :  { %2061 = vmatprep.subr.bf16.mxu0 %v2415_v51  ;;  %v356_v51 = vld [vmem:[#allocation8 + $0x3c8] sm:$0xff] }
 0x133   :  { %v2478_v57 = vcombine.low %v356_v51, %v360_v54  ;;  %v2479_v58 = vcombine.high %v356_v51, %v360_v54  ;;  %v300_v51 = vld [vmem:[#allocation8 + $0x208] sm:$0xff] }
 0x134   :  { %1309 = vmatmul.mubr.bf16.vlgmr.msra.gmra.mxu0 %v370_v38  ;;  %v239_v38 = vld [vmem:[#allocation8 + $0x20] sm:$0xff] }
 0x135   :  { %2062 = vmatpush1.bf16.msra.mxu0 %v2414_v50  ;;  %v2357_v42 = vcombine.high %v235_v37, %v239_v38  ;;  %v2356_v45 = vcombine.low %v235_v37, %v239_v38  ;;  %v359_v50 = vld [vmem:[#allocation8 + $0x3e0] sm:$0xff] }
 0x136   :  { %v2891_v39 = vpop.f32.mrf.mxu1  ;;  %2063 = vmatprep.subr.bf16.mxu0 %v2407_v56  ;;  %v307_v38 = vld [vmem:[#allocation8 + $0x240] sm:$0xff] }
 0x137   :  { %2034 = vmatprep.subr.bf16.mxu1 %v2357_v42  ;;  %v308_v42 = vld [vmem:[#allocation8 + $0x248] sm:$0xff]  ;;  %v2428_v54 = vcombine.low %v307_v38, %v311_v41 }
 0x138   :  { %v2893_v40 = vpop.f32.mrf.mxu1  ;;  %2035 = vmatpush1.bf16.msra.mxu1 %v2356_v45  ;;  %v2436_v45 = vcombine.low %v315_v28, %v319_v30 }
 0x139   :  { %2064 = vmatpush1.bf16.msra.mxu0 %v2406_v62  ;;  %v348_v62 = vld [vmem:[#allocation8 + $0x388] sm:$0xff] }
 0x13a   :  { %v1191_v49 = vpop.f32.mrf.mxu1  ;;  %2065 = vmatprep.subr.bf16.mxu0 %v2399_v0  ;;  %v2470_v3 = vcombine.low %v348_v62, %v352_v1  ;;  %v2471_v4 = vcombine.high %v348_v62, %v352_v1  ;;  %v2905_v62 = vld [vmem:[#allocation8 + $0x1f0] sm:$0xff]  ;;  %v2911_v1 = vld [vmem:[#allocation8 + $0x1f8] sm:$0xff] }
 0x13b   :  { %v355_v49 = vld [vmem:[#allocation8 + $0x3c0] sm:$0xff] }
 0x13c   :  { %v1192_v60 = vpop.f32.mrf.mxu1  ;;  %v2477_v53 = vcombine.high %v355_v49, %v359_v50  ;;  %v2476_v56 = vcombine.low %v355_v49, %v359_v50  ;;  %v299_v49 = vld [vmem:[#allocation8 + $0x200] sm:$0xff] }
 0x13d   :  { %2066 = vmatpush1.bf16.msra.mxu0 %v2398_v6  ;;  %v347_v60 = vld [vmem:[#allocation8 + $0x380] sm:$0xff] }
 0x13e   :  { %2067 = vmatprep.subr.bf16.mxu0 %v2391_v8  ;;  %2036 = vmatprep.subr.bf16.mxu1 %v2477_v53  ;;  %v2469_v0 = vcombine.high %v347_v60, %v351_v61  ;;  %v2468_v2 = vcombine.low %v347_v60, %v351_v61  ;;  %v339_v6 = vld [vmem:[#allocation8 + $0x340] sm:$0xff]  ;;  %v340_v8 = vld [vmem:[#allocation8 + $0x348] sm:$0xff]  ;;  %v2903_v61 = vld [vmem:[#allocation8 + $0x1d0] sm:$0xff] }
 0x13f   :  { %2037 = vmatpush2.bf16.msra.mxu1 %v2476_v56  ;;  %v2461_v9 = vcombine.high %v339_v6, %v343_v7  ;;  %v2460_v11 = vcombine.low %v339_v6, %v343_v7  ;;  %v2462_v12 = vcombine.low %v340_v8, %v344_v10  ;;  %v2463_v13 = vcombine.high %v340_v8, %v344_v10  ;;  %v303_v50 = vld [vmem:[#allocation8 + $0x220] sm:$0xff]  ;;  %v304_v53 = vld [vmem:[#allocation8 + $0x228] sm:$0xff] }
 0x140   :  { %2038 = vmatprep.subr.bf16.mxu1 %v2469_v0  ;;  %v2421_v56 = vcombine.high %v299_v49, %v303_v50  ;;  %v2422_v60 = vcombine.low %v300_v51, %v304_v53  ;;  %v2417_v0 = vcombine.high %v2903_v61, %v2905_v62  ;;  %v90_v7 = vld [vmem:[%s2967_s2] sm:$0x3] }
 0x141   :  { %2068 = vmatpush1.bf16.msra.mxu0 %v2390_v14  ;;  %v331_v14 = vld [vmem:[#allocation8 + $0x300] sm:$0xff] }
 0x142   :  { %2069 = vmatprep.subr.bf16.mxu0 %v2383_v16  ;;  %v332_v16 = vld [vmem:[#allocation8 + $0x308] sm:$0xff]  ;;  %v2452_v17 = vcombine.low %v331_v14, %v335_v15  ;;  %v2453_v18 = vcombine.high %v331_v14, %v335_v15 }
 0x143   :  { %2039 = vmatpush2.bf16.msra.mxu1 %v2468_v2  ;;  %v2455_v24 = vcombine.high %v332_v16, %v336_v19  ;;  %v2416_v2 = vcombine.low %v2903_v61, %v2905_v62 }
 0x144   :  { %2040 = vmatprep.subr.bf16.mxu1 %v2461_v9 }
 0x145   :  { %2070 = vmatpush1.bf16.msra.mxu0 %v2382_v23  ;;  %v2454_v23 = vcombine.low %v332_v16, %v336_v19 }
 0x146   :  { %2071 = vmatprep.subr.bf16.mxu0 %v2375_v25  ;;  %v2445_v25 = vcombine.high %v323_v20, %v327_v22 }
 0x147   :  { %2041 = vmatpush2.bf16.msra.mxu1 %v2460_v11 }
 0x148   :  { %2042 = vmatprep.subr.bf16.mxu1 %v2453_v18 }
 0x149   :  { %2072 = vmatpush1.bf16.msra.mxu0 %v2374_v31  ;;  %v316_v31 = vld [vmem:[#allocation8 + $0x288] sm:$0xff] }
 0x14a   :  { %2073 = vmatprep.subr.bf16.mxu0 %v2367_v33  ;;  %v2444_v33 = vcombine.low %v323_v20, %v327_v22  ;;  %v2439_v37 = vcombine.high %v316_v31, %v320_v32 }
 0x14b   :  { %2043 = vmatpush2.bf16.msra.mxu1 %v2452_v17 }
 0x14c   :  { %2044 = vmatprep.subr.bf16.mxu1 %v2445_v25 }
 0x14d   :  { %2074 = vmatpush1.bf16.msra.mxu0 %v2366_v35  ;;  %v2437_v35 = vcombine.high %v315_v28, %v319_v30 }
 0x14e   :  { %2075 = vmatprep.subr.bf16.mxu0 %v2359_v47  ;;  %v2429_v47 = vcombine.high %v307_v38, %v311_v41 }
 0x14f   :  { %2045 = vmatpush2.bf16.msra.mxu1 %v2444_v33 }
 0x150   :  { %2046 = vmatprep.subr.bf16.mxu1 %v2437_v35 }
 0x151   :  { %2076 = vmatpush1.bf16.msra.mxu0 %v2358_v46  ;;  %v2438_v46 = vcombine.low %v316_v31, %v320_v32 }
 0x152   :  { %2077 = vmatprep.subr.bf16.mxu0 %v2479_v58  ;;  %v2420_v58 = vcombine.low %v299_v49, %v303_v50 }
 0x153   :  { %2047 = vmatpush2.bf16.msra.mxu1 %v2436_v45  ;;  %v285_v45 = vld [vmem:[#allocation8 + $0x190] sm:$0xff] }
 0x154   :  { %2048 = vmatprep.subr.bf16.mxu1 %v2429_v47  ;;  %v286_v47 = vld [vmem:[#allocation8 + $0x198] sm:$0xff] }
 0x155   :  { %2078 = vmatpush2.bf16.msra.mxu0 %v2478_v57  ;;  %v2423_v57 = vcombine.high %v300_v51, %v304_v53  ;;  %v277_v51 = vld [vmem:[#allocation8 + $0x150] sm:$0xff] }
 0x156   :  { %2079 = vmatprep.subr.bf16.mxu0 %v2471_v4 }
 0x157   :  { %2049 = vmatpush2.bf16.msra.mxu1 %v2428_v54 }
 0x158   :  { %2050 = vmatprep.subr.bf16.mxu1 %v2421_v56  ;;  %v278_v56 = vld [vmem:[#allocation8 + $0x158] sm:$0xff] }
 0x159   :  { %2080 = vmatpush2.bf16.msra.mxu0 %v2470_v3 }
 0x15a   :  { %2081 = vmatprep.subr.bf16.mxu0 %v2463_v13 }
 0x15b   :  { %2051 = vmatpush2.bf16.msra.mxu1 %v2420_v58 }
 0x15c   :  { %2102 = vmatprep.subr.bf16.mxu1 %v2417_v0 }
 0x15d   :  { %2082 = vmatpush2.bf16.msra.mxu0 %v2462_v12 }
 0x15e   :  { %2083 = vmatprep.subr.bf16.mxu0 %v2455_v24 }
 0x161   :  { %2084 = vmatpush2.bf16.msra.mxu0 %v2454_v23 }
 0x162   :  { %2085 = vmatprep.subr.bf16.mxu0 %v2447_v29 }
 0x165   :  { %2086 = vmatpush2.bf16.msra.mxu0 %v2446_v34 }
 0x166   :  { %2087 = vmatprep.subr.bf16.mxu0 %v2439_v37 }
 0x169   :  { %2088 = vmatpush2.bf16.msra.mxu0 %v2438_v46  ;;  %v289_v46 = vld [vmem:[#allocation8 + $0x1b0] sm:$0xff] }
 0x16a   :  { %v2409_v53 = vcombine.high %v285_v45, %v289_v46  ;;  %v2408_v58 = vcombine.low %v285_v45, %v289_v46 }
 0x174   :  { %v2895_v36 = vpop.f32.mrf.mxu0 }
 0x176   :  { %v2897_v44 = vpop.f32.mrf.mxu0  ;;  %v2899_v52 = vpop.f32.mrf.mxu1 }
 0x178   :  { %v499_v48 = vpop.f32.mrf.mxu0  ;;  %v2901_v59 = vpop.f32.mrf.mxu1 }
 0x179   :  { %v2431_v48 = vcombine.high %v308_v42, %v312_v43 }
 0x17a   :  { %v500_v55 = vpop.f32.mrf.mxu0  ;;  %v1273_v63 = vpop.f32.mrf.mxu1 }
 0x17b   :  { %v2430_v55 = vcombine.low %v308_v42, %v312_v43  ;;  %2089 = vmatprep.subr.bf16.mxu0 %v2431_v48  ;;  %v2907_v63 = vld [vmem:[#allocation8 + $0x1d8] sm:$0xff] }
 0x17c   :  { %v1274_v5 = vpop.f32.mrf.mxu1  ;;  %v2418_v3 = vcombine.low %v2907_v63, %v2911_v1  ;;  %v2419_v4 = vcombine.high %v2907_v63, %v2911_v1  ;;  %v290_v48 = vld [vmem:[#allocation8 + $0x1b8] sm:$0xff] }
 0x17d   :  { %2090 = vmatpush2.bf16.msra.mxu0 %v2430_v55  ;;  %v2920_v5 = vshrl.u32 %v372_v21, 7  ;;  %v2411_v54 = vcombine.high %v286_v47, %v290_v48  ;;  %v281_v55 = vld [vmem:[#allocation8 + $0x170] sm:$0xff] }
 0x17e   :  { %2091 = vmatprep.subr.bf16.mxu0 %v2423_v57  ;;  %v282_v57 = vld [vmem:[#allocation8 + $0x178] sm:$0xff]  ;;  %v2401_v0 = vcombine.high %v277_v51, %v281_v55  ;;  %v2400_v61 = vcombine.low %v277_v51, %v281_v55 }
 0x17f   :  { %v505_v6 = vsub.s32 0, %v2920_v5  ;;  %v509_v8 = vsub.s32 1, %v2920_v5  ;;  %v2402_v62 = vcombine.low %v278_v56, %v282_v57  ;;  %v350_v51 = vld [vmem:[#allocation8 + $0x398] sm:$0xff] }
 0x181   :  { %2092 = vmatpush2.bf16.msra.mxu0 %v2422_v60  ;;  %v506_v9 = vrot.slane %v90_v7, %v505_v6  ;;  %v510_v10 = vrot.slane %v90_v7, %v509_v8  ;;  %v2410_v60 = vcombine.low %v286_v47, %v290_v48  ;;  %v269_v7 = vld [vmem:[#allocation8 + $0x110] sm:$0xff] }
 0x182   :  { %2143 = vmatprep.subr.bf16.mxu0 %v2419_v4  ;;  %v2403_v4 = vcombine.high %v278_v56, %v282_v57  ;;  %v349_v48 = vld [vmem:[#allocation8 + $0x390] sm:$0xff] }
 0x183   :  { %v1188_v11 = vadd.f32 %v2891_v39, %v506_v9  ;;  %v1190_v12 = vadd.f32 %v2893_v40, %v510_v10  ;;  %v273_v9 = vld [vmem:[#allocation8 + $0x130] sm:$0xff]  ;;  %v270_v10 = vld [vmem:[#allocation8 + $0x118] sm:$0xff] }
 0x184   :  { %v2393_v63 = vcombine.high %v269_v7, %v273_v9 }
 0x1b4   :  { %v1228_v21 = vpop.f32.mrf.mxu0 }
 0x1b5   :  { %v1229_v13 = vadd.f32 %v1228_v21, %v1188_v11  ;;  %v274_v11 = vld [vmem:[#allocation8 + $0x138] sm:$0xff] }
 0x1b6   :  { %v1230_v14 = vpop.f32.mrf.mxu0  ;;  %v2395_v1 = vcombine.high %v270_v10, %v274_v11  ;;  %v266_v21 = vld [vmem:[#allocation8 + $0xf8] sm:$0xff] }
 0x1b7   :  { %v1231_v15 = vadd.f32 %v1230_v14, %v1190_v12  ;;  %v1270_v16 = vadd.f32 %v2899_v52, %v1229_v13  ;;  %v262_v12 = vld [vmem:[#allocation8 + $0xd8] sm:$0xff]  ;;  %v2392_v13 = vcombine.low %v269_v7, %v273_v9  ;;  %v2394_v14 = vcombine.low %v270_v10, %v274_v11 }
 0x1b8   :  { %v1232_v17 = vpop.f32.mrf.mxu0 }
 0x1b9   :  { %v1272_v18 = vadd.f32 %v2901_v59, %v1231_v15  ;;  %v253_v17 = vld [vmem:[#allocation8 + $0x90] sm:$0xff] }
 0x1ba   :  { %v1233_v19 = vpop.f32.mrf.mxu0 }
 0x1bb   :  { %v254_v19 = vld [vmem:[#allocation8 + $0x98] sm:$0xff] }
 0x1f4   :  { %v1310_v20 = vpop.f32.mrf.mxu0 }
 0x1f5   :  { %v1311_v22 = vadd.f32 %v1310_v20, %v1270_v16  ;;  %v2387_v16 = vcombine.high %v262_v12, %v266_v21  ;;  %v258_v20 = vld [vmem:[#allocation8 + $0xb8] sm:$0xff] }
 0x1f6   :  { %v1312_v23 = vpop.f32.mrf.mxu0 }
 0x1f7   :  { %v1317_v24 = vadd.f32 %v1311_v22, %v2895_v36  ;;  %v1313_v25 = vadd.f32 %v1312_v23, %v1272_v18  ;;  %v257_v18 = vld [vmem:[#allocation8 + $0xb0] sm:$0xff]  ;;  %v2386_v23 = vcombine.low %v262_v12, %v266_v21 }
 0x1f8   :  { %v1314_v26 = vpop.f32.mrf.mxu0 }
 0x1f9   :  { %v1319_v39 = vmul.f32 %v1317_v24, %v1317_v24  ;;  %v1318_v40 = vadd.f32 %v1313_v25, %v2897_v44  ;;  %v2379_v25 = vcombine.high %v254_v19, %v258_v20  ;;  %v245_v26 = vld [vmem:[#allocation8 + $0x50] sm:$0xff] }
 0x1fa   :  { %v1315_v27 = vpop.f32.mrf.mxu0 }
 0x1fb   :  { %v1321_v28 = vmul.f32 %v1319_v39, %v1317_v24  ;;  %v1320_v29 = vmul.f32 %v1318_v40, %v1318_v40  ;;  %v249_v39 = vld [vmem:[#allocation8 + $0x70] sm:$0xff]  ;;  %v250_v27 = vld [vmem:[#allocation8 + $0x78] sm:$0xff] }
 0x1fd   :  { %v1323_v30 = vmul.f32 0.044715, %v1321_v28  ;;  %v1322_v31 = vmul.f32 %v1320_v29, %v1318_v40  ;;  %v2376_v28 = vcombine.low %v253_v17, %v257_v18  ;;  %v2378_v29 = vcombine.low %v254_v19, %v258_v20 }
 0x1ff   :  { %v1325_v52 = vadd.f32 %v1323_v30, %v1317_v24  ;;  %v1324_v32 = vmul.f32 0.044715, %v1322_v31  ;;  %v2369_v30 = vcombine.high %v245_v26, %v249_v39 }
 0x201   :  { %v1327_v33 = vmul.f32 0.7978846, %v1325_v52  ;;  %v1326_v59 = vadd.f32 %v1324_v32, %v1318_v40  ;;  %v237_v52 = vld [vmem:[#allocation8 + $0x10] sm:$0xff] }
 0x202   :  { %v241_v32 = vld [vmem:[#allocation8 + $0x30] sm:$0xff] }
 0x203   :  { %2712 = vtanh.f32 %v1327_v33  ;;  %v1328_v34 = vmul.f32 0.7978846, %v1326_v59  ;;  %v238_v33 = vld [vmem:[#allocation8 + $0x18] sm:$0xff] }
 0x204   :  { %v242_v59 = vld [vmem:[#allocation8 + $0x38] sm:$0xff] }
 0x205   :  { %2714 = vtanh.f32 %v1328_v34  ;;  %v2368_v34 = vcombine.low %v245_v26, %v249_v39  ;;  %v2362_v45 = vcombine.low %v238_v33, %v242_v59 }
 0x210   :  { %v2713_v35 = vpop.eup %2712 }
 0x211   :  { %v1331_v37 = vadd.f32 1.0, %v2713_v35 }
 0x212   :  { %v2715_v36 = vpop.eup %2714 }
 0x213   :  { %v1332_v38 = vadd.f32 1.0, %v2715_v36  ;;  %v1333_v41 = vmul.f32 0.5, %v1331_v37  ;;  %v2361_v37 = vcombine.high %v237_v52, %v241_v32  ;;  %v2363_v36 = vcombine.high %v238_v33, %v242_v59 }
 0x215   :  { %v1334_v42 = vmul.f32 0.5, %v1332_v38  ;;  %v1335_v43 = vmul.f32 %v1333_v41, %v1317_v24  ;;  %v2377_v24 = vcombine.high %v253_v17, %v257_v18  ;;  %v357_v38 = vld [vmem:[#allocation8 + $0x3d0] sm:$0xff] }
 0x216   :  { %v361_v41 = vld [vmem:[#allocation8 + $0x3f0] sm:$0xff] }
 0x217   :  { %v1336_v44 = vmul.f32 %v1334_v42, %v1318_v40  ;;  %v2937_v50 = vpack.c.bf16 %v1335_v43, %v1335_v43  ;;  %v246_v40 = vld [vmem:[#allocation8 + $0x58] sm:$0xff]  ;;  %v2481_v46 = vcombine.high %v357_v38, %v361_v41 }
 0x218   :  { %v2371_v31 = vcombine.high %v246_v40, %v250_v27  ;;  %v2370_v35 = vcombine.low %v246_v40, %v250_v27  ;;  %v358_v42 = vld [vmem:[#allocation8 + $0x3d8] sm:$0xff] }
 0x219   :  { %v1338_v49 = vpack.c.bf16 %v1336_v44, %v1336_v44  ;;  %v362_v43 = vld [vmem:[#allocation8 + $0x3f8] sm:$0xff]  ;;  %v2360_v44 = vcombine.low %v237_v52, %v241_v32 }
 0x21a   :  { %v2483_v47 = vcombine.high %v358_v42, %v362_v43  ;;  %v2482_v55 = vcombine.low %v358_v42, %v362_v43 }
 0x21b   :  { %2052 = vmatprep.mubr.bf16.mxu1 %v1338_v49  ;;  %2093 = vmatprep.mubr.bf16.mxu0 %v1338_v49 }
 0x21c   :  { %2053 = vmatmul.mubr.bf16.vlgmr.msra.gmra.mxu1 %v2937_v50  ;;  %2094 = vmatmul.mubr.bf16.vlgmr.msra.gmra.mxu0 %v2937_v50 }
 0x21d   :  { %2103 = vmatpush1.bf16.msra.mxu1 %v2416_v2  ;;  %2144 = vmatpush1.bf16.msra.mxu0 %v2418_v3  ;;  %v261_v2 = vld [vmem:[#allocation8 + $0xd0] sm:$0xff] }
 0x21e   :  { %2134 = vmatprep.mubr.bf16.mxu1 %v1338_v49  ;;  %2175 = vmatprep.mubr.bf16.mxu0 %v1338_v49  ;;  %v265_v3 = vld [vmem:[#allocation8 + $0xf0] sm:$0xff] }
 0x21f   :  { %2104 = vmatprep.subr.bf16.mxu1 %v2409_v53  ;;  %2145 = vmatprep.subr.bf16.mxu0 %v2411_v54  ;;  %v2385_v15 = vcombine.high %v261_v2, %v265_v3  ;;  %v2384_v22 = vcombine.low %v261_v2, %v265_v3  ;;  %v353_v49 = vld [vmem:[#allocation8 + $0x3b0] sm:$0xff]  ;;  %v354_v53 = vld [vmem:[#allocation8 + $0x3b8] sm:$0xff]  ;;  %v2480_v54 = vcombine.low %v357_v38, %v361_v41 }
 0x220   :  { %v2473_v56 = vcombine.high %v349_v48, %v353_v49  ;;  %v2475_v57 = vcombine.high %v350_v51, %v354_v53  ;;  %v2472_v7 = vcombine.low %v349_v48, %v353_v49  ;;  %v2474_v9 = vcombine.low %v350_v51, %v354_v53 }
 0x221   :  { %2105 = vmatpush1.bf16.msra.mxu1 %v2408_v58  ;;  %2146 = vmatpush1.bf16.msra.mxu0 %v2410_v60  ;;  %v341_v58 = vld [vmem:[#allocation8 + $0x350] sm:$0xff]  ;;  %v1354_v48 = vsub.s32 3, %v2920_v5 }
 0x222   :  { %2106 = vmatprep.subr.bf16.mxu1 %v2401_v0  ;;  %2147 = vmatprep.subr.bf16.mxu0 %v2403_v4  ;;  %v345_v60 = vld [vmem:[#allocation8 + $0x370] sm:$0xff]  ;;  %v342_v0 = vld [vmem:[#allocation8 + $0x358] sm:$0xff] }
 0x223   :  { %v346_v4 = vld [vmem:[#allocation8 + $0x378] sm:$0xff]  ;;  %v2465_v10 = vcombine.high %v341_v58, %v345_v60  ;;  %v2464_v2 = vcombine.low %v341_v58, %v345_v60 }
 0x224   :  { %v2467_v11 = vcombine.high %v342_v0, %v346_v4  ;;  %v2466_v3 = vcombine.low %v342_v0, %v346_v4 }
 0x225   :  { %2107 = vmatpush1.bf16.msra.mxu1 %v2400_v61  ;;  %2148 = vmatpush1.bf16.msra.mxu0 %v2402_v62  ;;  %v333_v61 = vld [vmem:[#allocation8 + $0x310] sm:$0xff] }
 0x226   :  { %2108 = vmatprep.subr.bf16.mxu1 %v2393_v63  ;;  %2149 = vmatprep.subr.bf16.mxu0 %v2395_v1  ;;  %v337_v62 = vld [vmem:[#allocation8 + $0x330] sm:$0xff]  ;;  %v334_v63 = vld [vmem:[#allocation8 + $0x318] sm:$0xff] }
 0x227   :  { %v338_v1 = vld [vmem:[#allocation8 + $0x338] sm:$0xff]  ;;  %v2457_v12 = vcombine.high %v333_v61, %v337_v62  ;;  %v2456_v17 = vcombine.low %v333_v61, %v337_v62  ;;  %v1362_v61 = vsub.s32 5, %v2920_v5  ;;  %v1370_v62 = vsub.s32 7, %v2920_v5 }
 0x228   :  { %v2459_v21 = vcombine.high %v334_v63, %v338_v1  ;;  %v2458_v18 = vcombine.low %v334_v63, %v338_v1 }
 0x229   :  { %2109 = vmatpush1.bf16.msra.mxu1 %v2392_v13  ;;  %2150 = vmatpush1.bf16.msra.mxu0 %v2394_v14  ;;  %v325_v13 = vld [vmem:[#allocation8 + $0x2d0] sm:$0xff] }
 0x22a   :  { %2110 = vmatprep.subr.bf16.mxu1 %v2385_v15  ;;  %2151 = vmatprep.subr.bf16.mxu0 %v2387_v16  ;;  %v329_v14 = vld [vmem:[#allocation8 + $0x2f0] sm:$0xff]  ;;  %v326_v15 = vld [vmem:[#allocation8 + $0x2d8] sm:$0xff] }
 0x22b   :  { %v330_v16 = vld [vmem:[#allocation8 + $0x2f8] sm:$0xff]  ;;  %v2449_v19 = vcombine.high %v325_v13, %v329_v14  ;;  %v2448_v26 = vcombine.low %v325_v13, %v329_v14 }
 0x22c   :  { %v2451_v20 = vcombine.high %v326_v15, %v330_v16  ;;  %v2450_v39 = vcombine.low %v326_v15, %v330_v16 }
 0x22d   :  { %2111 = vmatpush1.bf16.msra.mxu1 %v2384_v22  ;;  %2152 = vmatpush1.bf16.msra.mxu0 %v2386_v23  ;;  %v317_v22 = vld [vmem:[#allocation8 + $0x290] sm:$0xff] }
 0x22e   :  { %2112 = vmatprep.subr.bf16.mxu1 %v2377_v24  ;;  %2153 = vmatprep.subr.bf16.mxu0 %v2379_v25  ;;  %v321_v23 = vld [vmem:[#allocation8 + $0x2b0] sm:$0xff]  ;;  %v318_v24 = vld [vmem:[#allocation8 + $0x298] sm:$0xff] }
 0x22f   :  { %v322_v25 = vld [vmem:[#allocation8 + $0x2b8] sm:$0xff]  ;;  %v2441_v40 = vcombine.high %v317_v22, %v321_v23  ;;  %v2440_v52 = vcombine.low %v317_v22, %v321_v23 }
 0x230   :  { %v2443_v27 = vcombine.high %v318_v24, %v322_v25  ;;  %v2442_v32 = vcombine.low %v318_v24, %v322_v25 }
 0x231   :  { %2113 = vmatpush1.bf16.msra.mxu1 %v2376_v28  ;;  %2154 = vmatpush1.bf16.msra.mxu0 %v2378_v29  ;;  %v309_v28 = vld [vmem:[#allocation8 + $0x250] sm:$0xff] }
 0x232   :  { %2114 = vmatprep.subr.bf16.mxu1 %v2369_v30  ;;  %2155 = vmatprep.subr.bf16.mxu0 %v2371_v31  ;;  %v313_v29 = vld [vmem:[#allocation8 + $0x270] sm:$0xff]  ;;  %v310_v30 = vld [vmem:[#allocation8 + $0x258] sm:$0xff] }
 0x233   :  { %v314_v31 = vld [vmem:[#allocation8 + $0x278] sm:$0xff]  ;;  %v2433_v33 = vcombine.high %v309_v28, %v313_v29  ;;  %v2432_v38 = vcombine.low %v309_v28, %v313_v29 }
 0x234   :  { %v2435_v59 = vcombine.high %v310_v30, %v314_v31  ;;  %v2434_v41 = vcombine.low %v310_v30, %v314_v31 }
 0x235   :  { %2115 = vmatpush1.bf16.msra.mxu1 %v2368_v34  ;;  %2156 = vmatpush1.bf16.msra.mxu0 %v2370_v35  ;;  %v301_v34 = vld [vmem:[#allocation8 + $0x210] sm:$0xff] }
 0x236   :  { %2116 = vmatprep.subr.bf16.mxu1 %v2361_v37  ;;  %2157 = vmatprep.subr.bf16.mxu0 %v2363_v36  ;;  %v305_v35 = vld [vmem:[#allocation8 + $0x230] sm:$0xff]  ;;  %v302_v37 = vld [vmem:[#allocation8 + $0x218] sm:$0xff] }
 0x237   :  { %v306_v36 = vld [vmem:[#allocation8 + $0x238] sm:$0xff]  ;;  %v2425_v42 = vcombine.high %v301_v34, %v305_v35 }
 0x238   :  { %v2427_v43 = vcombine.high %v302_v37, %v306_v36 }
 0x239   :  { %2117 = vmatpush1.bf16.msra.mxu1 %v2360_v44  ;;  %2158 = vmatpush1.bf16.msra.mxu0 %v2362_v45  ;;  %v2424_v44 = vcombine.low %v301_v34, %v305_v35  ;;  %v2426_v45 = vcombine.low %v302_v37, %v306_v36 }
 0x23a   :  { %2118 = vmatprep.subr.bf16.mxu1 %v2481_v46  ;;  %2159 = vmatprep.subr.bf16.mxu0 %v2483_v47  ;;  %v1350_v46 = vsub.s32 2, %v2920_v5  ;;  %v363_v47 = vld [vmem:[%s2971_s6] sm:$0xff]  ;;  %s2834_s6 = smov [#allocation10]  }
 0x23b   :  { %v1343_v49 = vrot.slane %v363_v47, %v505_v6  ;;  %v1347_v53 = vrot.slane %v363_v47, %v509_v8  ;;  %v1366_v8 = vsub.s32 6, %v2920_v5  ;;  %s2198_s25 = sshll.u32 %s2834_s6, 4  ;;  %s2199_s25 = int_to_ptr.vmem [resolvable:$true] %s2198_s25 }
 0x23c   :  { %v1351_v51 = vrot.slane %v363_v47, %v1350_v46  ;;  %s2796_s26 = scalar_lea.vmem %s2199_s25, 1024  ;;  %p2801_p7 = scmp.lt.s32.totalorder %s2199_s25, %s2199_s25 }
 0x23d   :  { %2119 = vmatpush2.bf16.msra.mxu1 %v2480_v54  ;;  %2160 = vmatpush2.bf16.msra.mxu0 %v2482_v55  ;;  %v1355_v54 = vrot.slane %v363_v47, %v1354_v48  ;;  %v1367_v1 = vrot.slane %v363_v47, %v1366_v8  ;;  %p2797_p6 = scmp.ne.s32.totalorder %s2199_s25, %s2796_s26  ;;  %p2802_p8 = scmp.lt.s32.totalorder %s2796_s26, %s2796_s26 }
 0x23e   :  { %2120 = vmatprep.subr.bf16.mxu1 %v2473_v56  ;;  %2161 = vmatprep.subr.bf16.mxu0 %v2475_v57 }
 0x23f   :  { %p2803_p9 = por %p2802_p8, %p2801_p7 }
 0x241   :  { %2121 = vmatpush2.bf16.msra.mxu1 %v2472_v7  ;;  %2162 = vmatpush2.bf16.msra.mxu0 %v2474_v9  ;;  %p2804_p10 = pnand %p2803_p9, %p2797_p6 }
 0x242   :  { %2122 = vmatprep.subr.bf16.mxu1 %v2465_v10  ;;  %2163 = vmatprep.subr.bf16.mxu0 %v2467_v11  ;;  %v1358_v11 = vsub.s32 4, %v2920_v5 }
 0x244   :  { %v1359_v63 = vrot.slane %v363_v47, %v1358_v11 }
 0x245   :  { %2123 = vmatpush2.bf16.msra.mxu1 %v2464_v2  ;;  %2164 = vmatpush2.bf16.msra.mxu0 %v2466_v3  ;;  %v1363_v2 = vrot.slane %v363_v47, %v1362_v61  ;;  %v1371_v3 = vrot.slane %v363_v47, %v1370_v62 }
 0x246   :  { %2124 = vmatprep.subr.bf16.mxu1 %v2457_v12  ;;  %2165 = vmatprep.subr.bf16.mxu0 %v2459_v21 }
 0x249   :  { %2125 = vmatpush2.bf16.msra.mxu1 %v2456_v17  ;;  %2166 = vmatpush2.bf16.msra.mxu0 %v2458_v18 }
 0x24a   :  { %2126 = vmatprep.subr.bf16.mxu1 %v2449_v19  ;;  %2167 = vmatprep.subr.bf16.mxu0 %v2451_v20 }
 0x24d   :  { %2127 = vmatpush2.bf16.msra.mxu1 %v2448_v26  ;;  %2168 = vmatpush2.bf16.msra.mxu0 %v2450_v39 }
 0x24e   :  { %2128 = vmatprep.subr.bf16.mxu1 %v2441_v40  ;;  %2169 = vmatprep.subr.bf16.mxu0 %v2443_v27 }
 0x251   :  { %2129 = vmatpush2.bf16.msra.mxu1 %v2440_v52  ;;  %2170 = vmatpush2.bf16.msra.mxu0 %v2442_v32 }
 0x252   :  { %2130 = vmatprep.subr.bf16.mxu1 %v2433_v33  ;;  %2171 = vmatprep.subr.bf16.mxu0 %v2435_v59 }
 0x255   :  { %2131 = vmatpush2.bf16.msra.mxu1 %v2432_v38  ;;  %2172 = vmatpush2.bf16.msra.mxu0 %v2434_v41 }
 0x256   :  { %2132 = vmatprep.subr.bf16.mxu1 %v2425_v42  ;;  %2173 = vmatprep.subr.bf16.mxu0 %v2427_v43 }
 0x259   :  { %2133 = vmatpush2.bf16.msra.mxu1 %v2424_v44  ;;  %2174 = vmatpush2.bf16.msra.mxu0 %v2426_v45 }
 0x25c   :  { %2135 = vmatmul.mubr.bf16.vlgmr.msra.gmra.mxu1 %v2937_v50  ;;  %2176 = vmatmul.mubr.bf16.vlgmr.msra.gmra.mxu0 %v2937_v50 }
 0x2dc   :  { %v2054_v55 = vpop.f32.mrf.mxu1  ;;  %v2095_v56 = vpop.f32.mrf.mxu0 }
 0x2dd   :  { %v2055_v57 = vadd.f32 %v2054_v55, %v1343_v49  ;;  %v2096_v50 = vadd.f32 %v2095_v56, %v1351_v51 }
 0x2de   :  { %v2056_v58 = vpop.f32.mrf.mxu1  ;;  %v2097_v60 = vpop.f32.mrf.mxu0 }
 0x2df   :  { %2184 = vst [vmem:[#allocation10] sm:$0xff] %v2055_v57  ;;  %2186 = vst [vmem:[#allocation10 + $0x10] sm:$0xff] %v2096_v50  ;;  %v2057_v0 = vadd.f32 %v2056_v58, %v1347_v53  ;;  %v2098_v4 = vadd.f32 %v2097_v60, %v1355_v54 }
 0x2e0   :  { %v2058_v7 = vpop.f32.mrf.mxu1  ;;  %v2099_v9 = vpop.f32.mrf.mxu0 }
 0x2e1   :  { %2185 = vst [vmem:[#allocation10 + $0x8] sm:$0xff] %v2057_v0  ;;  %2187 = vst [vmem:[#allocation10 + $0x18] sm:$0xff] %v2098_v4 }
 0x2e2   :  { %v2059_v6 = vpop.f32.mrf.mxu1  ;;  %v2100_v10 = vpop.f32.mrf.mxu0 }
 0x31c   :  { %v2136_v12 = vpop.f32.mrf.mxu1  ;;  %v2177_v21 = vpop.f32.mrf.mxu0 }
 0x31d   :  { %v2137_v13 = vadd.f32 %v2136_v12, %v1359_v63  ;;  %v2178_v14 = vadd.f32 %v2177_v21, %v1367_v1 }
 0x31e   :  { %v2138_v15 = vpop.f32.mrf.mxu1  ;;  %v2179_v16 = vpop.f32.mrf.mxu0 }
 0x31f   :  { %2188 = vst [vmem:[#allocation10 + $0x20] sm:$0xff] %v2137_v13  ;;  %2190 = vst [vmem:[#allocation10 + $0x30] sm:$0xff] %v2178_v14  ;;  %v2139_v17 = vadd.f32 %v2138_v15, %v1363_v2  ;;  %v2180_v18 = vadd.f32 %v2179_v16, %v1371_v3 }
 0x320   :  { %v2140_v19 = vpop.f32.mrf.mxu1  ;;  %v2181_v20 = vpop.f32.mrf.mxu0 }
 0x321   :  { %2189 = vst [vmem:[#allocation10 + $0x28] sm:$0xff] %v2139_v17  ;;  %2191 = vst [vmem:[#allocation10 + $0x38] sm:$0xff] %v2180_v18 }
 0x322   :  { %v2141_v5 = vpop.f32.mrf.mxu1  ;;  %v2182_v22 = vpop.f32.mrf.mxu0 }
 0x323   :  { %2807 = shalt.err (!%p2804_p10)
}
 0x324   :  { %2201 = dma.vmem_to_hbm [thread:$0]  %s2199_s25, 1024, %s2972_s7, [#allocation4]  }
 0x325   :  { %2822 = dma.done.wait [#allocation4], 1024  }
 0x326   :  { %2823 = vsyncadd [#allocation4], 4294966272 }
 0x327   :  { %2205 = vsyncpa [#allocation3], 1 }
 0x328   :  { %2206 = vsyncpa [#allocation6], 1 }
 0x329   :  { %2207 = vsyncpa [#allocation9], 1 }
 0x32a   :  { %2208 = vsyncpa [#allocation4], 1 }

</bundles_post_ra>
